<compile_context>
chip_gen: v7x
topology: tpu7x:2x2x1
jax: 0.10.0
libtpu: 0.0.40
codegen_flags: <defaults>
</compile_context>

<pallas_src>
import math

import jax
import jax.numpy as jnp
from jax import lax
from jax.experimental import pallas as pl
from jax.experimental.pallas import tpu as pltpu


def rae_block_kernel(x2d_ref, eps_ref,
                     wih_f_ref, whh_f_ref, bx_f_ref, bhn_f_ref,
                     wih_b_ref, whh_b_ref, bx_b_ref, bhn_b_ref,
                     wlin_f_ref, wlin_b_ref, blin_ref,
                     whh_d_ref, bd_ref, bhn_d_ref,
                     wout_ref, bout_ref,
                     y2d_ref, dec2d_ref, dec_ic_ref, kl_ref,
                     xproj_f_ref, xproj_b_ref):
    f32 = jnp.float32
    SB = x2d_ref.shape[0]
    B, D = eps_ref.shape
    H = whh_f_ref.shape[0]
    S = SB // B

    def mm(a, b):
        return jnp.dot(a, b, preferred_element_type=jnp.float32)

    # ---------------- Encoder: input projection hoisted out of the scans ----------------
    # One MXU-friendly (S*B, 3H) matmul per direction; biases bih (all gates) and
    # bhh (r, z gates) are pre-folded into bx_* by the wrapper.
    x2d = x2d_ref[...].astype(f32)
    xproj_f_ref[...] = mm(x2d, wih_f_ref[...]) + bx_f_ref[...]
    xproj_b_ref[...] = mm(x2d, wih_b_ref[...]) + bx_b_ref[...]

    # Hoist loop-invariant weights/biases into registers (JAX does not CSE per-iter loads).
    whh_f = whh_f_ref[...]
    whh_b = whh_b_ref[...]
    bhn_f = bhn_f_ref[...]
    bhn_b = bhn_b_ref[...]

    def gru_step(xg, h, whh, bhn):
        # PyTorch nn.GRU gate equations, packed gate order (r | z | n).
        hg = mm(h, whh)                                   # single packed matmul per step
        r = jax.nn.sigmoid(xg[:, :H] + hg[:, :H])
        z = jax.nn.sigmoid(xg[:, H:2 * H] + hg[:, H:2 * H])
        n = jnp.tanh(xg[:, 2 * H:] + r * (hg[:, 2 * H:] + bhn))
        return (1.0 - z) * n + z * h

    h0 = jnp.zeros((B, H), f32)

    # Interleave the two independent encoder directions in one (unrolled) loop.
    def enc_body(t, carry):
        h_f, h_b = carry
        xf = xproj_f_ref[pl.ds(t * B, B), :]
        xb = xproj_b_ref[pl.ds((S - 1 - t) * B, B), :]
        return (gru_step(xf, h_f, whh_f, bhn_f),
                gru_step(xb, h_b, whh_b, bhn_b))

    h_fwd, h_bwd = lax.fori_loop(0, S, enc_body, (h0, h0), unroll=True)

    # linear_out on concat([h_fwd, h_bwd]); packed as two (H, 2D) matmuls -> [mean|logvar].
    lin = mm(h_fwd, wlin_f_ref[...]) + mm(h_bwd, wlin_b_ref[...]) + blin_ref[...]
    mean = lin[:, :D]
    logvar = lin[:, D:]

    # kl_div_normals(prior_mean=0, mean, prior_logvar=0, logvar).mean(dim=(0,1))
    inv_var = jnp.exp(-logvar)
    kl_elem = 0.5 * (logvar + inv_var + mean * mean * inv_var + 1.0)
    kl_ref[...] = jnp.mean(kl_elem, axis=(0, 1), keepdims=True)

    # sample_gaussian: reparameterized decoder initial condition.
    dec_ic = jnp.exp(0.5 * logvar) * eps_ref[...].astype(f32) + mean
    dec_ic_ref[...] = dec_ic.astype(dec_ic_ref.dtype)

    # ---------------- Decoder: single-layer GRU driven by an all-zero input ----------------
    # Decoder.gen_input() is identically zero, so the input-to-hidden matmuls reduce
    # to their bias terms (exact, not an approximation). Biases are pre-combined by
    # the wrapper: bd = [bih_r+bhh_r | bih_z+bhh_z | bih_n], bhn_d = bhh_n.
    # TODO(synk): GRU_Modified source is not provided upstream; a standard GRU cell
    #             (same gate structure as nn.GRUCell) is used for the decoder RNN.
    whh_d = whh_d_ref[...]
    bd = bd_ref[...]
    bd_r = bd[:, :D]
    bd_z = bd[:, D:2 * D]
    bd_n = bd[:, 2 * D:]
    bhn_d = bhn_d_ref[...]

    def dec_body(t, h):
        hg = mm(h, whh_d)                                 # single packed matmul per step
        r = jax.nn.sigmoid(hg[:, :D] + bd_r)
        z = jax.nn.sigmoid(hg[:, D:2 * D] + bd_z)
        n = jnp.tanh(bd_n + r * (hg[:, 2 * D:] + bhn_d))
        h_new = (1.0 - z) * n + z * h
        dec2d_ref[pl.ds(t * B, B), :] = h_new.astype(dec2d_ref.dtype)
        return h_new

    lax.fori_loop(0, S, dec_body, dec_ic, unroll=True)

    # block_out Linear(D -> I) pulled out of the recurrence: one big matmul,
    # one lane-dense store instead of S tiny masked stores.
    y2d_ref[...] = (mm(dec2d_ref[...], wout_ref[...]) + bout_ref[...]).astype(y2d_ref.dtype)


def pack_params(p):
    """Pack per-gate parameters into MXU-friendly wide matrices (gate order r|z|n)."""
    def pack3(w):                                   # (3, A, C) -> (A, 3C)
        return jnp.concatenate([w[0], w[1], w[2]], axis=-1)

    def pack_bias(bih, bhh):                        # fold bih (all gates) + bhh (r, z)
        return jnp.concatenate([bih[0] + bhh[0], bih[1] + bhh[1], bih[2]], axis=-1)

    return dict(
        wih_f=pack3(p["w_ih_f"]), whh_f=pack3(p["w_hh_f"]),
        bx_f=pack_bias(p["b_ih_f"], p["b_hh_f"]), bhn_f=p["b_hh_f"][2],
        wih_b=pack3(p["w_ih_b"]), whh_b=pack3(p["w_hh_b"]),
        bx_b=pack_bias(p["b_ih_b"], p["b_hh_b"]), bhn_b=p["b_hh_b"][2],
        # linear_out packed as [mean | logvar] columns, split by fwd/bwd rows
        wlin_f=jnp.concatenate([p["w_lin"][0, 0], p["w_lin"][1, 0]], axis=-1),  # (H, 2D)
        wlin_b=jnp.concatenate([p["w_lin"][0, 1], p["w_lin"][1, 1]], axis=-1),  # (H, 2D)
        blin=jnp.concatenate([p["b_lin"][0], p["b_lin"][1]], axis=-1),          # (1, 2D)
        whh_d=pack3(p["w_hh_d"]),
        bd=pack_bias(p["b_ih_d"], p["b_hh_d"]), bhn_d=p["b_hh_d"][2],
        wout=p["w_out"], bout=p["b_out"],
    )


def rae_block_forward(x, eps, p):
    """x: (B, S, I) batch_first, eps: (B, D) N(0,1) noise. Returns PyTorch-layout outputs."""
    B, S, I = x.shape
    D = p["w_hh_d"].shape[-1]
    H = p["w_hh_f"].shape[-1]
    pk = pack_params(p)

    # time-major, flattened to 2-D so the kernel never reshapes
    x2d = jnp.transpose(x, (1, 0, 2)).reshape(S * B, I).astype(jnp.float32)

    args = (x2d, eps.astype(jnp.float32),
            pk["wih_f"], pk["whh_f"], pk["bx_f"], pk["bhn_f"],
            pk["wih_b"], pk["whh_b"], pk["bx_b"], pk["bhn_b"],
            pk["wlin_f"], pk["wlin_b"], pk["blin"],
            pk["whh_d"], pk["bd"], pk["bhn_d"],
            pk["wout"], pk["bout"])

    vmem = pl.BlockSpec(memory_space=pltpu.MemorySpace.VMEM)
    out_shape = (
        jax.ShapeDtypeStruct((S * B, I), jnp.float32),   # block_out(decoder_out), time-major flat
        jax.ShapeDtypeStruct((S * B, D), jnp.float32),   # decoder_out, time-major flat
        jax.ShapeDtypeStruct((B, D), jnp.float32),       # decoder_ic
        jax.ShapeDtypeStruct((1, 1), jnp.float32),       # kl_div (scalar)
    )
    y2d, dec2d, dec_ic, kl = pl.pallas_call(
        rae_block_kernel,
        out_shape=out_shape,
        in_specs=[vmem] * len(args),
        out_specs=(vmem, vmem, vmem, vmem),
        scratch_shapes=[pltpu.VMEM((S * B, 3 * H), jnp.float32),   # hoisted x-projection (fwd)
                        pltpu.VMEM((S * B, 3 * H), jnp.float32)],  # hoisted x-projection (bwd)
        compiler_params=pltpu.CompilerParams(vmem_limit_bytes=32 * 1024 * 1024),
    )(*args)

    y = y2d.reshape(S, B, I).transpose(1, 0, 2)
    dec_out = dec2d.reshape(S, B, D).transpose(1, 0, 2)
    return y, dec_out, dec_ic, kl[0, 0]


def init_params(key, input_size, encoder_size, decoder_size):
    """Deterministic synthetic parameters with the shapes implied by RAE_block.__init__."""
    I, H, D = input_size, encoder_size, decoder_size
    ks = iter(jax.random.split(key, 32))

    def u(shape, scale):
        return jax.random.uniform(next(ks), shape, jnp.float32, -scale, scale)

    se, sd, sl = 1.0 / math.sqrt(H), 1.0 / math.sqrt(D), 1.0 / math.sqrt(2 * H)
    return dict(
        # encoder nn.GRU forward direction; per-gate (r, z, n) weights stored pre-transposed (in, out)
        w_ih_f=u((3, I, H), se), w_hh_f=u((3, H, H), se),
        b_ih_f=u((3, 1, H), se), b_hh_f=u((3, 1, H), se),
        # encoder nn.GRU reverse direction
        w_ih_b=u((3, I, H), se), w_hh_b=u((3, H, H), se),
        b_ih_b=u((3, 1, H), se), b_hh_b=u((3, 1, H), se),
        # encoder linear_out: Linear(2H -> 2D) packed [mean|logvar] x [fwd|bwd] x (H, D)
        w_lin=u((2, 2, H, D), sl), b_lin=u((2, 1, D), sl),
        # decoder GRU (input_size=1). The input-to-hidden weight is unused because the
        # decoder input is identically zero; only its bias contributes.
        w_hh_d=u((3, D, D), sd), b_ih_d=u((3, 1, D), sd), b_hh_d=u((3, 1, D), sd),
        # block_out: Linear(D -> I), stored pre-transposed, bias (1, I)
        w_out=u((D, I), sd), b_out=u((1, I), sd),
    )


def rae_block_reference(x, eps, p):
    """Pure-JAX reference of the same forward pass (for correctness checking)."""
    B, S, I = x.shape
    H = p["w_hh_f"].shape[-1]

    def cell(x_t, h, wih, whh, bih, bhh):
        r = jax.nn.sigmoid(x_t @ wih[0] + bih[0] + h @ whh[0] + bhh[0])
        z = jax.nn.sigmoid(x_t @ wih[1] + bih[1] + h @ whh[1] + bhh[1])
        n = jnp.tanh(x_t @ wih[2] + bih[2] + r * (h @ whh[2] + bhh[2]))
        return (1.0 - z) * n + z * h

    h = jnp.zeros((B, H), jnp.float32)
    for t in range(S):
        h = cell(x[:, t], h, p["w_ih_f"], p["w_hh_f"], p["b_ih_f"], p["b_hh_f"])
    h_fwd = h
    h = jnp.zeros((B, H), jnp.float32)
    for t in reversed(range(S)):
        h = cell(x[:, t], h, p["w_ih_b"], p["w_hh_b"], p["b_ih_b"], p["b_hh_b"])
    h_bwd = h

    mean = h_fwd @ p["w_lin"][0, 0] + h_bwd @ p["w_lin"][0, 1] + p["b_lin"][0]
    logvar = h_fwd @ p["w_lin"][1, 0] + h_bwd @ p["w_lin"][1, 1] + p["b_lin"][1]
    kl = jnp.mean(0.5 * (logvar + jnp.exp(-logvar) + mean ** 2 * jnp.exp(-logvar) + 1.0))
    dec_ic = jnp.exp(0.5 * logvar) * eps + mean

    h = dec_ic
    outs = []
    for _ in range(S):
        r = jax.nn.sigmoid(p["b_ih_d"][0] + h @ p["w_hh_d"][0] + p["b_hh_d"][0])
        z = jax.nn.sigmoid(p["b_ih_d"][1] + h @ p["w_hh_d"][1] + p["b_hh_d"][1])
        n = jnp.tanh(p["b_ih_d"][2] + r * (h @ p["w_hh_d"][2] + p["b_hh_d"][2]))
        h = (1.0 - z) * n + z * h
        outs.append(h)
    dec_out = jnp.stack(outs, axis=1)
    y = dec_out @ p["w_out"] + p["b_out"]
    return y, dec_out, dec_ic, kl


if __name__ == "__main__":
    B, S = 2, 8
    input_size, encoder_size, decoder_size = 4, 16, 32  # H != D so linear_out is a real Linear

    key = jax.random.PRNGKey(0)
    kx, keps, kp = jax.random.split(key, 3)
    x = jax.random.normal(kx, (B, S, input_size), jnp.float32)
    # torch.randn in sample_gaussian -> deterministic N(0,1) noise generated here, passed in.
    eps = jax.random.normal(keps, (B, decoder_size), jnp.float32)
    params = init_params(kp, input_size, encoder_size, decoder_size)

    y, dec_out, dec_ic, kl = jax.block_until_ready(rae_block_forward(x, eps, params))

    y_r, dec_out_r, dec_ic_r, kl_r = rae_block_reference(x, eps, params)
    assert jnp.allclose(y, y_r, atol=2e-3, rtol=2e-3)
    assert jnp.allclose(dec_out, dec_out_r, atol=2e-3, rtol=2e-3)
    assert jnp.allclose(dec_ic, dec_ic_r, atol=2e-3, rtol=2e-3)
    assert jnp.allclose(kl, kl_r, atol=2e-3, rtol=2e-3)

    print("KERNEL_OK")
</pallas_src>

<mosaic_0001>
module attributes {stable_mosaic.version = 11 : i64} {
  func.func @rae_block_kernel(%arg0: memref<16x4xf32, #tpu.memory_space<vmem>>, %arg1: memref<2x32xf32, #tpu.memory_space<vmem>>, %arg2: memref<4x48xf32, #tpu.memory_space<vmem>>, %arg3: memref<16x48xf32, #tpu.memory_space<vmem>>, %arg4: memref<1x48xf32, #tpu.memory_space<vmem>>, %arg5: memref<1x16xf32, #tpu.memory_space<vmem>>, %arg6: memref<4x48xf32, #tpu.memory_space<vmem>>, %arg7: memref<16x48xf32, #tpu.memory_space<vmem>>, %arg8: memref<1x48xf32, #tpu.memory_space<vmem>>, %arg9: memref<1x16xf32, #tpu.memory_space<vmem>>, %arg10: memref<16x64xf32, #tpu.memory_space<vmem>>, %arg11: memref<16x64xf32, #tpu.memory_space<vmem>>, %arg12: memref<1x64xf32, #tpu.memory_space<vmem>>, %arg13: memref<32x96xf32, #tpu.memory_space<vmem>>, %arg14: memref<1x96xf32, #tpu.memory_space<vmem>>, %arg15: memref<1x32xf32, #tpu.memory_space<vmem>>, %arg16: memref<32x4xf32, #tpu.memory_space<vmem>>, %arg17: memref<1x4xf32, #tpu.memory_space<vmem>>, %arg18: memref<16x4xf32, #tpu.memory_space<vmem>>, %arg19: memref<16x32xf32, #tpu.memory_space<vmem>>, %arg20: memref<2x32xf32, #tpu.memory_space<vmem>>, %arg21: memref<1x1xf32, #tpu.memory_space<vmem>>, %arg22: memref<16x48xf32, #tpu.memory_space<vmem>>, %arg23: memref<16x48xf32, #tpu.memory_space<vmem>>) attributes {dimension_semantics = [], scalar_prefetch = 0 : i64, scratch_operands = 2 : i64, tpu.core_type = #tpu.core_type<tc>} {
    %c0 = arith.constant 0 : index
    %c0_0 = arith.constant 0 : index
    %0 = vector.load %arg0[%c0, %c0_0] : memref<16x4xf32, #tpu.memory_space<vmem>>, vector<16x4xf32>
    %c0_1 = arith.constant 0 : index
    %c0_2 = arith.constant 0 : index
    %1 = vector.load %arg2[%c0_1, %c0_2] : memref<4x48xf32, #tpu.memory_space<vmem>>, vector<4x48xf32>
    %cst = arith.constant dense<0.000000e+00> : vector<16x48xf32>
    %2 = tpu.matmul %0, %1, %cst {dimension_numbers = #tpu.dot_dimension_numbers<[1], [0], [0], [1], [0, 0, 1, 1], [], []>} : vector<16x4xf32>, vector<4x48xf32>, vector<16x48xf32> -> vector<16x48xf32>
    %c0_3 = arith.constant 0 : index
    %c0_4 = arith.constant 0 : index
    %3 = vector.load %arg4[%c0_3, %c0_4] : memref<1x48xf32, #tpu.memory_space<vmem>>, vector<1x48xf32>
    %4 = vector.broadcast %3 : vector<1x48xf32> to vector<16x48xf32>
    %5 = arith.addf %2, %4 : vector<16x48xf32>
    %c0_5 = arith.constant 0 : index
    %c0_6 = arith.constant 0 : index
    %6 = vector.load %arg22[%c0_5, %c0_6] : memref<16x48xf32, #tpu.memory_space<vmem>>, vector<16x48xf32>
    tpu.vector_store %arg22[%c0_5, %c0_6], %5 {strides = array<i32>} : memref<16x48xf32, #tpu.memory_space<vmem>>, vector<16x48xf32>,
    %c0_7 = arith.constant 0 : index
    %c0_8 = arith.constant 0 : index
    %7 = vector.load %arg6[%c0_7, %c0_8] : memref<4x48xf32, #tpu.memory_space<vmem>>, vector<4x48xf32>
    %cst_9 = arith.constant dense<0.000000e+00> : vector<16x48xf32>
    %8 = tpu.matmul %0, %7, %cst_9 {dimension_numbers = #tpu.dot_dimension_numbers<[1], [0], [0], [1], [0, 0, 1, 1], [], []>} : vector<16x4xf32>, vector<4x48xf32>, vector<16x48xf32> -> vector<16x48xf32>
    %c0_10 = arith.constant 0 : index
    %c0_11 = arith.constant 0 : index
    %9 = vector.load %arg8[%c0_10, %c0_11] : memref<1x48xf32, #tpu.memory_space<vmem>>, vector<1x48xf32>
    %10 = vector.broadcast %9 : vector<1x48xf32> to vector<16x48xf32>
    %11 = arith.addf %8, %10 : vector<16x48xf32>
    %c0_12 = arith.constant 0 : index
    %c0_13 = arith.constant 0 : index
    %12 = vector.load %arg23[%c0_12, %c0_13] : memref<16x48xf32, #tpu.memory_space<vmem>>, vector<16x48xf32>
    tpu.vector_store %arg23[%c0_12, %c0_13], %11 {strides = array<i32>} : memref<16x48xf32, #tpu.memory_space<vmem>>, vector<16x48xf32>,
    %c0_14 = arith.constant 0 : index
    %c0_15 = arith.constant 0 : index
    %13 = vector.load %arg3[%c0_14, %c0_15] : memref<16x48xf32, #tpu.memory_space<vmem>>, vector<16x48xf32>
    %c0_16 = arith.constant 0 : index
    %c0_17 = arith.constant 0 : index
    %14 = vector.load %arg7[%c0_16, %c0_17] : memref<16x48xf32, #tpu.memory_space<vmem>>, vector<16x48xf32>
    %c0_18 = arith.constant 0 : index
    %c0_19 = arith.constant 0 : index
    %15 = vector.load %arg5[%c0_18, %c0_19] : memref<1x16xf32, #tpu.memory_space<vmem>>, vector<1x16xf32>
    %c0_20 = arith.constant 0 : index
    %c0_21 = arith.constant 0 : index
    %16 = vector.load %arg9[%c0_20, %c0_21] : memref<1x16xf32, #tpu.memory_space<vmem>>, vector<1x16xf32>
    %cst_22 = arith.constant 0.000000e+00 : f32
    %17 = vector.broadcast %cst_22 : f32 to vector<2x16xf32>
    %c0_i32 = arith.constant 0 : i32
    %c2_i32 = arith.constant 2 : i32
    %18 = arith.muli %c0_i32, %c2_i32 : i32
    %19 = arith.index_cast %18 : i32 to index
    %c0_23 = arith.constant 0 : index
    %20 = vector.load %arg22[%19, %c0_23] : memref<16x48xf32, #tpu.memory_space<vmem>>, vector<2x48xf32>
    %c7_i32 = arith.constant 7 : i32
    %21 = arith.subi %c7_i32, %c0_i32 : i32
    %c2_i32_24 = arith.constant 2 : i32
    %22 = arith.muli %21, %c2_i32_24 : i32
    %23 = arith.index_cast %22 : i32 to index
    %c0_25 = arith.constant 0 : index
    %24 = vector.load %arg23[%23, %c0_25] : memref<16x48xf32, #tpu.memory_space<vmem>>, vector<2x48xf32>
    %cst_26 = arith.constant dense<0.000000e+00> : vector<2x48xf32>
    %25 = tpu.matmul %17, %13, %cst_26 {dimension_numbers = #tpu.dot_dimension_numbers<[1], [0], [0], [1], [0, 0, 1, 1], [], []>} : vector<2x16xf32>, vector<16x48xf32>, vector<2x48xf32> -> vector<2x48xf32>
    %26 = vector.extract_strided_slice %20 {offsets = [0, 0], sizes = [2, 16], strides = [1, 1]} : vector<2x48xf32> to vector<2x16xf32>
    %27 = vector.extract_strided_slice %25 {offsets = [0, 0], sizes = [2, 16], strides = [1, 1]} : vector<2x48xf32> to vector<2x16xf32>
    %28 = arith.addf %26, %27 : vector<2x16xf32>
    %29 = arith.negf %28 : vector<2x16xf32>
    %30 = math.exp %29 : vector<2x16xf32>
    %cst_27 = arith.constant 1.000000e+00 : f32
    %31 = vector.broadcast %cst_27 : f32 to vector<2x16xf32>
    %32 = arith.addf %31, %30 : vector<2x16xf32>
    %33 = arith.divf %31, %32 : vector<2x16xf32>
    %34 = vector.extract_strided_slice %20 {offsets = [0, 16], sizes = [2, 16], strides = [1, 1]} : vector<2x48xf32> to vector<2x16xf32>
    %35 = vector.extract_strided_slice %25 {offsets = [0, 16], sizes = [2, 16], strides = [1, 1]} : vector<2x48xf32> to vector<2x16xf32>
    %36 = arith.addf %34, %35 : vector<2x16xf32>
    %37 = arith.negf %36 : vector<2x16xf32>
    %38 = math.exp %37 : vector<2x16xf32>
    %cst_28 = arith.constant 1.000000e+00 : f32
    %39 = vector.broadcast %cst_28 : f32 to vector<2x16xf32>
    %40 = arith.addf %39, %38 : vector<2x16xf32>
    %41 = arith.divf %39, %40 : vector<2x16xf32>
    %42 = vector.extract_strided_slice %20 {offsets = [0, 32], sizes = [2, 16], strides = [1, 1]} : vector<2x48xf32> to vector<2x16xf32>
    %43 = vector.extract_strided_slice %25 {offsets = [0, 32], sizes = [2, 16], strides = [1, 1]} : vector<2x48xf32> to vector<2x16xf32>
    %44 = vector.broadcast %15 : vector<1x16xf32> to vector<2x16xf32>
    %45 = arith.addf %43, %44 : vector<2x16xf32>
    %46 = arith.mulf %33, %45 : vector<2x16xf32>
    %47 = arith.addf %42, %46 : vector<2x16xf32>
    %48 = math.tanh %47 : vector<2x16xf32>
    %cst_29 = arith.constant 1.000000e+00 : f32
    %49 = vector.broadcast %cst_29 : f32 to vector<2x16xf32>
    %50 = arith.subf %49, %41 : vector<2x16xf32>
    %51 = arith.mulf %50, %48 : vector<2x16xf32>
    %52 = arith.mulf %41, %17 : vector<2x16xf32>
    %53 = arith.addf %51, %52 : vector<2x16xf32>
    %cst_30 = arith.constant dense<0.000000e+00> : vector<2x48xf32>
    %54 = tpu.matmul %17, %14, %cst_30 {dimension_numbers = #tpu.dot_dimension_numbers<[1], [0], [0], [1], [0, 0, 1, 1], [], []>} : vector<2x16xf32>, vector<16x48xf32>, vector<2x48xf32> -> vector<2x48xf32>
    %55 = vector.extract_strided_slice %24 {offsets = [0, 0], sizes = [2, 16], strides = [1, 1]} : vector<2x48xf32> to vector<2x16xf32>
    %56 = vector.extract_strided_slice %54 {offsets = [0, 0], sizes = [2, 16], strides = [1, 1]} : vector<2x48xf32> to vector<2x16xf32>
    %57 = arith.addf %55, %56 : vector<2x16xf32>
    %58 = arith.negf %57 : vector<2x16xf32>
    %59 = math.exp %58 : vector<2x16xf32>
    %cst_31 = arith.constant 1.000000e+00 : f32
    %60 = vector.broadcast %cst_31 : f32 to vector<2x16xf32>
    %61 = arith.addf %60, %59 : vector<2x16xf32>
    %62 = arith.divf %60, %61 : vector<2x16xf32>
    %63 = vector.extract_strided_slice %24 {offsets = [0, 16], sizes = [2, 16], strides = [1, 1]} : vector<2x48xf32> to vector<2x16xf32>
    %64 = vector.extract_strided_slice %54 {offsets = [0, 16], sizes = [2, 16], strides = [1, 1]} : vector<2x48xf32> to vector<2x16xf32>
    %65 = arith.addf %63, %64 : vector<2x16xf32>
    %66 = arith.negf %65 : vector<2x16xf32>
    %67 = math.exp %66 : vector<2x16xf32>
    %cst_32 = arith.constant 1.000000e+00 : f32
    %68 = vector.broadcast %cst_32 : f32 to vector<2x16xf32>
    %69 = arith.addf %68, %67 : vector<2x16xf32>
    %70 = arith.divf %68, %69 : vector<2x16xf32>
    %71 = vector.extract_strided_slice %24 {offsets = [0, 32], sizes = [2, 16], strides = [1, 1]} : vector<2x48xf32> to vector<2x16xf32>
    %72 = vector.extract_strided_slice %54 {offsets = [0, 32], sizes = [2, 16], strides = [1, 1]} : vector<2x48xf32> to vector<2x16xf32>
    %73 = vector.broadcast %16 : vector<1x16xf32> to vector<2x16xf32>
    %74 = arith.addf %72, %73 : vector<2x16xf32>
    %75 = arith.mulf %62, %74 : vector<2x16xf32>
    %76 = arith.addf %71, %75 : vector<2x16xf32>
    %77 = math.tanh %76 : vector<2x16xf32>
    %cst_33 = arith.constant 1.000000e+00 : f32
    %78 = vector.broadcast %cst_33 : f32 to vector<2x16xf32>
    %79 = arith.subf %78, %70 : vector<2x16xf32>
    %80 = arith.mulf %79, %77 : vector<2x16xf32>
    %81 = arith.mulf %70, %17 : vector<2x16xf32>
    %82 = arith.addf %80, %81 : vector<2x16xf32>
    %c1_i32 = arith.constant 1 : i32
    %c2_i32_34 = arith.constant 2 : i32
    %83 = arith.muli %c1_i32, %c2_i32_34 : i32
    %84 = arith.index_cast %83 : i32 to index
    %c0_35 = arith.constant 0 : index
    %85 = vector.load %arg22[%84, %c0_35] : memref<16x48xf32, #tpu.memory_space<vmem>>, vector<2x48xf32>
    %c7_i32_36 = arith.constant 7 : i32
    %86 = arith.subi %c7_i32_36, %c1_i32 : i32
    %c2_i32_37 = arith.constant 2 : i32
    %87 = arith.muli %86, %c2_i32_37 : i32
    %88 = arith.index_cast %87 : i32 to index
    %c0_38 = arith.constant 0 : index
    %89 = vector.load %arg23[%88, %c0_38] : memref<16x48xf32, #tpu.memory_space<vmem>>, vector<2x48xf32>
    %cst_39 = arith.constant dense<0.000000e+00> : vector<2x48xf32>
    %90 = tpu.matmul %53, %13, %cst_39 {dimension_numbers = #tpu.dot_dimension_numbers<[1], [0], [0], [1], [0, 0, 1, 1], [], []>} : vector<2x16xf32>, vector<16x48xf32>, vector<2x48xf32> -> vector<2x48xf32>
    %91 = vector.extract_strided_slice %85 {offsets = [0, 0], sizes = [2, 16], strides = [1, 1]} : vector<2x48xf32> to vector<2x16xf32>
    %92 = vector.extract_strided_slice %90 {offsets = [0, 0], sizes = [2, 16], strides = [1, 1]} : vector<2x48xf32> to vector<2x16xf32>
    %93 = arith.addf %91, %92 : vector<2x16xf32>
    %94 = arith.negf %93 : vector<2x16xf32>
    %95 = math.exp %94 : vector<2x16xf32>
    %cst_40 = arith.constant 1.000000e+00 : f32
    %96 = vector.broadcast %cst_40 : f32 to vector<2x16xf32>
    %97 = arith.addf %96, %95 : vector<2x16xf32>
    %98 = arith.divf %96, %97 : vector<2x16xf32>
    %99 = vector.extract_strided_slice %85 {offsets = [0, 16], sizes = [2, 16], strides = [1, 1]} : vector<2x48xf32> to vector<2x16xf32>
    %100 = vector.extract_strided_slice %90 {offsets = [0, 16], sizes = [2, 16], strides = [1, 1]} : vector<2x48xf32> to vector<2x16xf32>
    %101 = arith.addf %99, %100 : vector<2x16xf32>
    %102 = arith.negf %101 : vector<2x16xf32>
    %103 = math.exp %102 : vector<2x16xf32>
    %cst_41 = arith.constant 1.000000e+00 : f32
    %104 = vector.broadcast %cst_41 : f32 to vector<2x16xf32>
    %105 = arith.addf %104, %103 : vector<2x16xf32>
    %106 = arith.divf %104, %105 : vector<2x16xf32>
    %107 = vector.extract_strided_slice %85 {offsets = [0, 32], sizes = [2, 16], strides = [1, 1]} : vector<2x48xf32> to vector<2x16xf32>
    %108 = vector.extract_strided_slice %90 {offsets = [0, 32], sizes = [2, 16], strides = [1, 1]} : vector<2x48xf32> to vector<2x16xf32>
    %109 = vector.broadcast %15 : vector<1x16xf32> to vector<2x16xf32>
    %110 = arith.addf %108, %109 : vector<2x16xf32>
    %111 = arith.mulf %98, %110 : vector<2x16xf32>
    %112 = arith.addf %107, %111 : vector<2x16xf32>
    %113 = math.tanh %112 : vector<2x16xf32>
    %cst_42 = arith.constant 1.000000e+00 : f32
    %114 = vector.broadcast %cst_42 : f32 to vector<2x16xf32>
    %115 = arith.subf %114, %106 : vector<2x16xf32>
    %116 = arith.mulf %115, %113 : vector<2x16xf32>
    %117 = arith.mulf %106, %53 : vector<2x16xf32>
    %118 = arith.addf %116, %117 : vector<2x16xf32>
    %cst_43 = arith.constant dense<0.000000e+00> : vector<2x48xf32>
    %119 = tpu.matmul %82, %14, %cst_43 {dimension_numbers = #tpu.dot_dimension_numbers<[1], [0], [0], [1], [0, 0, 1, 1], [], []>} : vector<2x16xf32>, vector<16x48xf32>, vector<2x48xf32> -> vector<2x48xf32>
    %120 = vector.extract_strided_slice %89 {offsets = [0, 0], sizes = [2, 16], strides = [1, 1]} : vector<2x48xf32> to vector<2x16xf32>
    %121 = vector.extract_strided_slice %119 {offsets = [0, 0], sizes = [2, 16], strides = [1, 1]} : vector<2x48xf32> to vector<2x16xf32>
    %122 = arith.addf %120, %121 : vector<2x16xf32>
    %123 = arith.negf %122 : vector<2x16xf32>
    %124 = math.exp %123 : vector<2x16xf32>
    %cst_44 = arith.constant 1.000000e+00 : f32
    %125 = vector.broadcast %cst_44 : f32 to vector<2x16xf32>
    %126 = arith.addf %125, %124 : vector<2x16xf32>
    %127 = arith.divf %125, %126 : vector<2x16xf32>
    %128 = vector.extract_strided_slice %89 {offsets = [0, 16], sizes = [2, 16], strides = [1, 1]} : vector<2x48xf32> to vector<2x16xf32>
    %129 = vector.extract_strided_slice %119 {offsets = [0, 16], sizes = [2, 16], strides = [1, 1]} : vector<2x48xf32> to vector<2x16xf32>
    %130 = arith.addf %128, %129 : vector<2x16xf32>
    %131 = arith.negf %130 : vector<2x16xf32>
    %132 = math.exp %131 : vector<2x16xf32>
    %cst_45 = arith.constant 1.000000e+00 : f32
    %133 = vector.broadcast %cst_45 : f32 to vector<2x16xf32>
    %134 = arith.addf %133, %132 : vector<2x16xf32>
    %135 = arith.divf %133, %134 : vector<2x16xf32>
    %136 = vector.extract_strided_slice %89 {offsets = [0, 32], sizes = [2, 16], strides = [1, 1]} : vector<2x48xf32> to vector<2x16xf32>
    %137 = vector.extract_strided_slice %119 {offsets = [0, 32], sizes = [2, 16], strides = [1, 1]} : vector<2x48xf32> to vector<2x16xf32>
    %138 = vector.broadcast %16 : vector<1x16xf32> to vector<2x16xf32>
    %139 = arith.addf %137, %138 : vector<2x16xf32>
    %140 = arith.mulf %127, %139 : vector<2x16xf32>
    %141 = arith.addf %136, %140 : vector<2x16xf32>
    %142 = math.tanh %141 : vector<2x16xf32>
    %cst_46 = arith.constant 1.000000e+00 : f32
    %143 = vector.broadcast %cst_46 : f32 to vector<2x16xf32>
    %144 = arith.subf %143, %135 : vector<2x16xf32>
    %145 = arith.mulf %144, %142 : vector<2x16xf32>
    %146 = arith.mulf %135, %82 : vector<2x16xf32>
    %147 = arith.addf %145, %146 : vector<2x16xf32>
    %c2_i32_47 = arith.constant 2 : i32
    %c2_i32_48 = arith.constant 2 : i32
    %148 = arith.muli %c2_i32_47, %c2_i32_48 : i32
    %149 = arith.index_cast %148 : i32 to index
    %c0_49 = arith.constant 0 : index
    %150 = vector.load %arg22[%149, %c0_49] : memref<16x48xf32, #tpu.memory_space<vmem>>, vector<2x48xf32>
    %c7_i32_50 = arith.constant 7 : i32
    %151 = arith.subi %c7_i32_50, %c2_i32_47 : i32
    %c2_i32_51 = arith.constant 2 : i32
    %152 = arith.muli %151, %c2_i32_51 : i32
    %153 = arith.index_cast %152 : i32 to index
    %c0_52 = arith.constant 0 : index
    %154 = vector.load %arg23[%153, %c0_52] : memref<16x48xf32, #tpu.memory_space<vmem>>, vector<2x48xf32>
    %cst_53 = arith.constant dense<0.000000e+00> : vector<2x48xf32>
    %155 = tpu.matmul %118, %13, %cst_53 {dimension_numbers = #tpu.dot_dimension_numbers<[1], [0], [0], [1], [0, 0, 1, 1], [], []>} : vector<2x16xf32>, vector<16x48xf32>, vector<2x48xf32> -> vector<2x48xf32>
    %156 = vector.extract_strided_slice %150 {offsets = [0, 0], sizes = [2, 16], strides = [1, 1]} : vector<2x48xf32> to vector<2x16xf32>
    %157 = vector.extract_strided_slice %155 {offsets = [0, 0], sizes = [2, 16], strides = [1, 1]} : vector<2x48xf32> to vector<2x16xf32>
    %158 = arith.addf %156, %157 : vector<2x16xf32>
    %159 = arith.negf %158 : vector<2x16xf32>
    %160 = math.exp %159 : vector<2x16xf32>
    %cst_54 = arith.constant 1.000000e+00 : f32
    %161 = vector.broadcast %cst_54 : f32 to vector<2x16xf32>
    %162 = arith.addf %161, %160 : vector<2x16xf32>
    %163 = arith.divf %161, %162 : vector<2x16xf32>
    %164 = vector.extract_strided_slice %150 {offsets = [0, 16], sizes = [2, 16], strides = [1, 1]} : vector<2x48xf32> to vector<2x16xf32>
    %165 = vector.extract_strided_slice %155 {offsets = [0, 16], sizes = [2, 16], strides = [1, 1]} : vector<2x48xf32> to vector<2x16xf32>
    %166 = arith.addf %164, %165 : vector<2x16xf32>
    %167 = arith.negf %166 : vector<2x16xf32>
    %168 = math.exp %167 : vector<2x16xf32>
    %cst_55 = arith.constant 1.000000e+00 : f32
    %169 = vector.broadcast %cst_55 : f32 to vector<2x16xf32>
    %170 = arith.addf %169, %168 : vector<2x16xf32>
    %171 = arith.divf %169, %170 : vector<2x16xf32>
    %172 = vector.extract_strided_slice %150 {offsets = [0, 32], sizes = [2, 16], strides = [1, 1]} : vector<2x48xf32> to vector<2x16xf32>
    %173 = vector.extract_strided_slice %155 {offsets = [0, 32], sizes = [2, 16], strides = [1, 1]} : vector<2x48xf32> to vector<2x16xf32>
    %174 = vector.broadcast %15 : vector<1x16xf32> to vector<2x16xf32>
    %175 = arith.addf %173, %174 : vector<2x16xf32>
    %176 = arith.mulf %163, %175 : vector<2x16xf32>
    %177 = arith.addf %172, %176 : vector<2x16xf32>
    %178 = math.tanh %177 : vector<2x16xf32>
    %cst_56 = arith.constant 1.000000e+00 : f32
    %179 = vector.broadcast %cst_56 : f32 to vector<2x16xf32>
    %180 = arith.subf %179, %171 : vector<2x16xf32>
    %181 = arith.mulf %180, %178 : vector<2x16xf32>
    %182 = arith.mulf %171, %118 : vector<2x16xf32>
    %183 = arith.addf %181, %182 : vector<2x16xf32>
    %cst_57 = arith.constant dense<0.000000e+00> : vector<2x48xf32>
    %184 = tpu.matmul %147, %14, %cst_57 {dimension_numbers = #tpu.dot_dimension_numbers<[1], [0], [0], [1], [0, 0, 1, 1], [], []>} : vector<2x16xf32>, vector<16x48xf32>, vector<2x48xf32> -> vector<2x48xf32>
    %185 = vector.extract_strided_slice %154 {offsets = [0, 0], sizes = [2, 16], strides = [1, 1]} : vector<2x48xf32> to vector<2x16xf32>
    %186 = vector.extract_strided_slice %184 {offsets = [0, 0], sizes = [2, 16], strides = [1, 1]} : vector<2x48xf32> to vector<2x16xf32>
    %187 = arith.addf %185, %186 : vector<2x16xf32>
    %188 = arith.negf %187 : vector<2x16xf32>
    %189 = math.exp %188 : vector<2x16xf32>
    %cst_58 = arith.constant 1.000000e+00 : f32
    %190 = vector.broadcast %cst_58 : f32 to vector<2x16xf32>
    %191 = arith.addf %190, %189 : vector<2x16xf32>
    %192 = arith.divf %190, %191 : vector<2x16xf32>
    %193 = vector.extract_strided_slice %154 {offsets = [0, 16], sizes = [2, 16], strides = [1, 1]} : vector<2x48xf32> to vector<2x16xf32>
    %194 = vector.extract_strided_slice %184 {offsets = [0, 16], sizes = [2, 16], strides = [1, 1]} : vector<2x48xf32> to vector<2x16xf32>
    %195 = arith.addf %193, %194 : vector<2x16xf32>
    %196 = arith.negf %195 : vector<2x16xf32>
    %197 = math.exp %196 : vector<2x16xf32>
    %cst_59 = arith.constant 1.000000e+00 : f32
    %198 = vector.broadcast %cst_59 : f32 to vector<2x16xf32>
    %199 = arith.addf %198, %197 : vector<2x16xf32>
    %200 = arith.divf %198, %199 : vector<2x16xf32>
    %201 = vector.extract_strided_slice %154 {offsets = [0, 32], sizes = [2, 16], strides = [1, 1]} : vector<2x48xf32> to vector<2x16xf32>
    %202 = vector.extract_strided_slice %184 {offsets = [0, 32], sizes = [2, 16], strides = [1, 1]} : vector<2x48xf32> to vector<2x16xf32>
    %203 = vector.broadcast %16 : vector<1x16xf32> to vector<2x16xf32>
    %204 = arith.addf %202, %203 : vector<2x16xf32>
    %205 = arith.mulf %192, %204 : vector<2x16xf32>
    %206 = arith.addf %201, %205 : vector<2x16xf32>
    %207 = math.tanh %206 : vector<2x16xf32>
    %cst_60 = arith.constant 1.000000e+00 : f32
    %208 = vector.broadcast %cst_60 : f32 to vector<2x16xf32>
    %209 = arith.subf %208, %200 : vector<2x16xf32>
    %210 = arith.mulf %209, %207 : vector<2x16xf32>
    %211 = arith.mulf %200, %147 : vector<2x16xf32>
    %212 = arith.addf %210, %211 : vector<2x16xf32>
    %c3_i32 = arith.constant 3 : i32
    %c2_i32_61 = arith.constant 2 : i32
    %213 = arith.muli %c3_i32, %c2_i32_61 : i32
    %214 = arith.index_cast %213 : i32 to index
    %c0_62 = arith.constant 0 : index
    %215 = vector.load %arg22[%214, %c0_62] : memref<16x48xf32, #tpu.memory_space<vmem>>, vector<2x48xf32>
    %c7_i32_63 = arith.constant 7 : i32
    %216 = arith.subi %c7_i32_63, %c3_i32 : i32
    %c2_i32_64 = arith.constant 2 : i32
    %217 = arith.muli %216, %c2_i32_64 : i32
    %218 = arith.index_cast %217 : i32 to index
    %c0_65 = arith.constant 0 : index
    %219 = vector.load %arg23[%218, %c0_65] : memref<16x48xf32, #tpu.memory_space<vmem>>, vector<2x48xf32>
    %cst_66 = arith.constant dense<0.000000e+00> : vector<2x48xf32>
    %220 = tpu.matmul %183, %13, %cst_66 {dimension_numbers = #tpu.dot_dimension_numbers<[1], [0], [0], [1], [0, 0, 1, 1], [], []>} : vector<2x16xf32>, vector<16x48xf32>, vector<2x48xf32> -> vector<2x48xf32>
    %221 = vector.extract_strided_slice %215 {offsets = [0, 0], sizes = [2, 16], strides = [1, 1]} : vector<2x48xf32> to vector<2x16xf32>
    %222 = vector.extract_strided_slice %220 {offsets = [0, 0], sizes = [2, 16], strides = [1, 1]} : vector<2x48xf32> to vector<2x16xf32>
    %223 = arith.addf %221, %222 : vector<2x16xf32>
    %224 = arith.negf %223 : vector<2x16xf32>
    %225 = math.exp %224 : vector<2x16xf32>
    %cst_67 = arith.constant 1.000000e+00 : f32
    %226 = vector.broadcast %cst_67 : f32 to vector<2x16xf32>
    %227 = arith.addf %226, %225 : vector<2x16xf32>
    %228 = arith.divf %226, %227 : vector<2x16xf32>
    %229 = vector.extract_strided_slice %215 {offsets = [0, 16], sizes = [2, 16], strides = [1, 1]} : vector<2x48xf32> to vector<2x16xf32>
    %230 = vector.extract_strided_slice %220 {offsets = [0, 16], sizes = [2, 16], strides = [1, 1]} : vector<2x48xf32> to vector<2x16xf32>
    %231 = arith.addf %229, %230 : vector<2x16xf32>
    %232 = arith.negf %231 : vector<2x16xf32>
    %233 = math.exp %232 : vector<2x16xf32>
    %cst_68 = arith.constant 1.000000e+00 : f32
    %234 = vector.broadcast %cst_68 : f32 to vector<2x16xf32>
    %235 = arith.addf %234, %233 : vector<2x16xf32>
    %236 = arith.divf %234, %235 : vector<2x16xf32>
    %237 = vector.extract_strided_slice %215 {offsets = [0, 32], sizes = [2, 16], strides = [1, 1]} : vector<2x48xf32> to vector<2x16xf32>
    %238 = vector.extract_strided_slice %220 {offsets = [0, 32], sizes = [2, 16], strides = [1, 1]} : vector<2x48xf32> to vector<2x16xf32>
    %239 = vector.broadcast %15 : vector<1x16xf32> to vector<2x16xf32>
    %240 = arith.addf %238, %239 : vector<2x16xf32>
    %241 = arith.mulf %228, %240 : vector<2x16xf32>
    %242 = arith.addf %237, %241 : vector<2x16xf32>
    %243 = math.tanh %242 : vector<2x16xf32>
    %cst_69 = arith.constant 1.000000e+00 : f32
    %244 = vector.broadcast %cst_69 : f32 to vector<2x16xf32>
    %245 = arith.subf %244, %236 : vector<2x16xf32>
    %246 = arith.mulf %245, %243 : vector<2x16xf32>
    %247 = arith.mulf %236, %183 : vector<2x16xf32>
    %248 = arith.addf %246, %247 : vector<2x16xf32>
    %cst_70 = arith.constant dense<0.000000e+00> : vector<2x48xf32>
    %249 = tpu.matmul %212, %14, %cst_70 {dimension_numbers = #tpu.dot_dimension_numbers<[1], [0], [0], [1], [0, 0, 1, 1], [], []>} : vector<2x16xf32>, vector<16x48xf32>, vector<2x48xf32> -> vector<2x48xf32>
    %250 = vector.extract_strided_slice %219 {offsets = [0, 0], sizes = [2, 16], strides = [1, 1]} : vector<2x48xf32> to vector<2x16xf32>
    %251 = vector.extract_strided_slice %249 {offsets = [0, 0], sizes = [2, 16], strides = [1, 1]} : vector<2x48xf32> to vector<2x16xf32>
    %252 = arith.addf %250, %251 : vector<2x16xf32>
    %253 = arith.negf %252 : vector<2x16xf32>
    %254 = math.exp %253 : vector<2x16xf32>
    %cst_71 = arith.constant 1.000000e+00 : f32
    %255 = vector.broadcast %cst_71 : f32 to vector<2x16xf32>
    %256 = arith.addf %255, %254 : vector<2x16xf32>
    %257 = arith.divf %255, %256 : vector<2x16xf32>
    %258 = vector.extract_strided_slice %219 {offsets = [0, 16], sizes = [2, 16], strides = [1, 1]} : vector<2x48xf32> to vector<2x16xf32>
    %259 = vector.extract_strided_slice %249 {offsets = [0, 16], sizes = [2, 16], strides = [1, 1]} : vector<2x48xf32> to vector<2x16xf32>
    %260 = arith.addf %258, %259 : vector<2x16xf32>
    %261 = arith.negf %260 : vector<2x16xf32>
    %262 = math.exp %261 : vector<2x16xf32>
    %cst_72 = arith.constant 1.000000e+00 : f32
    %263 = vector.broadcast %cst_72 : f32 to vector<2x16xf32>
    %264 = arith.addf %263, %262 : vector<2x16xf32>
    %265 = arith.divf %263, %264 : vector<2x16xf32>
    %266 = vector.extract_strided_slice %219 {offsets = [0, 32], sizes = [2, 16], strides = [1, 1]} : vector<2x48xf32> to vector<2x16xf32>
    %267 = vector.extract_strided_slice %249 {offsets = [0, 32], sizes = [2, 16], strides = [1, 1]} : vector<2x48xf32> to vector<2x16xf32>
    %268 = vector.broadcast %16 : vector<1x16xf32> to vector<2x16xf32>
    %269 = arith.addf %267, %268 : vector<2x16xf32>
    %270 = arith.mulf %257, %269 : vector<2x16xf32>
    %271 = arith.addf %266, %270 : vector<2x16xf32>
    %272 = math.tanh %271 : vector<2x16xf32>
    %cst_73 = arith.constant 1.000000e+00 : f32
    %273 = vector.broadcast %cst_73 : f32 to vector<2x16xf32>
    %274 = arith.subf %273, %265 : vector<2x16xf32>
    %275 = arith.mulf %274, %272 : vector<2x16xf32>
    %276 = arith.mulf %265, %212 : vector<2x16xf32>
    %277 = arith.addf %275, %276 : vector<2x16xf32>
    %c4_i32 = arith.constant 4 : i32
    %c2_i32_74 = arith.constant 2 : i32
    %278 = arith.muli %c4_i32, %c2_i32_74 : i32
    %279 = arith.index_cast %278 : i32 to index
    %c0_75 = arith.constant 0 : index
    %280 = vector.load %arg22[%279, %c0_75] : memref<16x48xf32, #tpu.memory_space<vmem>>, vector<2x48xf32>
    %c7_i32_76 = arith.constant 7 : i32
    %281 = arith.subi %c7_i32_76, %c4_i32 : i32
    %c2_i32_77 = arith.constant 2 : i32
    %282 = arith.muli %281, %c2_i32_77 : i32
    %283 = arith.index_cast %282 : i32 to index
    %c0_78 = arith.constant 0 : index
    %284 = vector.load %arg23[%283, %c0_78] : memref<16x48xf32, #tpu.memory_space<vmem>>, vector<2x48xf32>
    %cst_79 = arith.constant dense<0.000000e+00> : vector<2x48xf32>
    %285 = tpu.matmul %248, %13, %cst_79 {dimension_numbers = #tpu.dot_dimension_numbers<[1], [0], [0], [1], [0, 0, 1, 1], [], []>} : vector<2x16xf32>, vector<16x48xf32>, vector<2x48xf32> -> vector<2x48xf32>
    %286 = vector.extract_strided_slice %280 {offsets = [0, 0], sizes = [2, 16], strides = [1, 1]} : vector<2x48xf32> to vector<2x16xf32>
    %287 = vector.extract_strided_slice %285 {offsets = [0, 0], sizes = [2, 16], strides = [1, 1]} : vector<2x48xf32> to vector<2x16xf32>
    %288 = arith.addf %286, %287 : vector<2x16xf32>
    %289 = arith.negf %288 : vector<2x16xf32>
    %290 = math.exp %289 : vector<2x16xf32>
    %cst_80 = arith.constant 1.000000e+00 : f32
    %291 = vector.broadcast %cst_80 : f32 to vector<2x16xf32>
    %292 = arith.addf %291, %290 : vector<2x16xf32>
    %293 = arith.divf %291, %292 : vector<2x16xf32>
    %294 = vector.extract_strided_slice %280 {offsets = [0, 16], sizes = [2, 16], strides = [1, 1]} : vector<2x48xf32> to vector<2x16xf32>
    %295 = vector.extract_strided_slice %285 {offsets = [0, 16], sizes = [2, 16], strides = [1, 1]} : vector<2x48xf32> to vector<2x16xf32>
    %296 = arith.addf %294, %295 : vector<2x16xf32>
    %297 = arith.negf %296 : vector<2x16xf32>
    %298 = math.exp %297 : vector<2x16xf32>
    %cst_81 = arith.constant 1.000000e+00 : f32
    %299 = vector.broadcast %cst_81 : f32 to vector<2x16xf32>
    %300 = arith.addf %299, %298 : vector<2x16xf32>
    %301 = arith.divf %299, %300 : vector<2x16xf32>
    %302 = vector.extract_strided_slice %280 {offsets = [0, 32], sizes = [2, 16], strides = [1, 1]} : vector<2x48xf32> to vector<2x16xf32>
    %303 = vector.extract_strided_slice %285 {offsets = [0, 32], sizes = [2, 16], strides = [1, 1]} : vector<2x48xf32> to vector<2x16xf32>
    %304 = vector.broadcast %15 : vector<1x16xf32> to vector<2x16xf32>
    %305 = arith.addf %303, %304 : vector<2x16xf32>
    %306 = arith.mulf %293, %305 : vector<2x16xf32>
    %307 = arith.addf %302, %306 : vector<2x16xf32>
    %308 = math.tanh %307 : vector<2x16xf32>
    %cst_82 = arith.constant 1.000000e+00 : f32
    %309 = vector.broadcast %cst_82 : f32 to vector<2x16xf32>
    %310 = arith.subf %309, %301 : vector<2x16xf32>
    %311 = arith.mulf %310, %308 : vector<2x16xf32>
    %312 = arith.mulf %301, %248 : vector<2x16xf32>
    %313 = arith.addf %311, %312 : vector<2x16xf32>
    %cst_83 = arith.constant dense<0.000000e+00> : vector<2x48xf32>
    %314 = tpu.matmul %277, %14, %cst_83 {dimension_numbers = #tpu.dot_dimension_numbers<[1], [0], [0], [1], [0, 0, 1, 1], [], []>} : vector<2x16xf32>, vector<16x48xf32>, vector<2x48xf32> -> vector<2x48xf32>
    %315 = vector.extract_strided_slice %284 {offsets = [0, 0], sizes = [2, 16], strides = [1, 1]} : vector<2x48xf32> to vector<2x16xf32>
    %316 = vector.extract_strided_slice %314 {offsets = [0, 0], sizes = [2, 16], strides = [1, 1]} : vector<2x48xf32> to vector<2x16xf32>
    %317 = arith.addf %315, %316 : vector<2x16xf32>
    %318 = arith.negf %317 : vector<2x16xf32>
    %319 = math.exp %318 : vector<2x16xf32>
    %cst_84 = arith.constant 1.000000e+00 : f32
    %320 = vector.broadcast %cst_84 : f32 to vector<2x16xf32>
    %321 = arith.addf %320, %319 : vector<2x16xf32>
    %322 = arith.divf %320, %321 : vector<2x16xf32>
    %323 = vector.extract_strided_slice %284 {offsets = [0, 16], sizes = [2, 16], strides = [1, 1]} : vector<2x48xf32> to vector<2x16xf32>
    %324 = vector.extract_strided_slice %314 {offsets = [0, 16], sizes = [2, 16], strides = [1, 1]} : vector<2x48xf32> to vector<2x16xf32>
    %325 = arith.addf %323, %324 : vector<2x16xf32>
    %326 = arith.negf %325 : vector<2x16xf32>
    %327 = math.exp %326 : vector<2x16xf32>
    %cst_85 = arith.constant 1.000000e+00 : f32
    %328 = vector.broadcast %cst_85 : f32 to vector<2x16xf32>
    %329 = arith.addf %328, %327 : vector<2x16xf32>
    %330 = arith.divf %328, %329 : vector<2x16xf32>
    %331 = vector.extract_strided_slice %284 {offsets = [0, 32], sizes = [2, 16], strides = [1, 1]} : vector<2x48xf32> to vector<2x16xf32>
    %332 = vector.extract_strided_slice %314 {offsets = [0, 32], sizes = [2, 16], strides = [1, 1]} : vector<2x48xf32> to vector<2x16xf32>
    %333 = vector.broadcast %16 : vector<1x16xf32> to vector<2x16xf32>
    %334 = arith.addf %332, %333 : vector<2x16xf32>
    %335 = arith.mulf %322, %334 : vector<2x16xf32>
    %336 = arith.addf %331, %335 : vector<2x16xf32>
    %337 = math.tanh %336 : vector<2x16xf32>
    %cst_86 = arith.constant 1.000000e+00 : f32
    %338 = vector.broadcast %cst_86 : f32 to vector<2x16xf32>
    %339 = arith.subf %338, %330 : vector<2x16xf32>
    %340 = arith.mulf %339, %337 : vector<2x16xf32>
    %341 = arith.mulf %330, %277 : vector<2x16xf32>
    %342 = arith.addf %340, %341 : vector<2x16xf32>
    %c5_i32 = arith.constant 5 : i32
    %c2_i32_87 = arith.constant 2 : i32
    %343 = arith.muli %c5_i32, %c2_i32_87 : i32
    %344 = arith.index_cast %343 : i32 to index
    %c0_88 = arith.constant 0 : index
    %345 = vector.load %arg22[%344, %c0_88] : memref<16x48xf32, #tpu.memory_space<vmem>>, vector<2x48xf32>
    %c7_i32_89 = arith.constant 7 : i32
    %346 = arith.subi %c7_i32_89, %c5_i32 : i32
    %c2_i32_90 = arith.constant 2 : i32
    %347 = arith.muli %346, %c2_i32_90 : i32
    %348 = arith.index_cast %347 : i32 to index
    %c0_91 = arith.constant 0 : index
    %349 = vector.load %arg23[%348, %c0_91] : memref<16x48xf32, #tpu.memory_space<vmem>>, vector<2x48xf32>
    %cst_92 = arith.constant dense<0.000000e+00> : vector<2x48xf32>
    %350 = tpu.matmul %313, %13, %cst_92 {dimension_numbers = #tpu.dot_dimension_numbers<[1], [0], [0], [1], [0, 0, 1, 1], [], []>} : vector<2x16xf32>, vector<16x48xf32>, vector<2x48xf32> -> vector<2x48xf32>
    %351 = vector.extract_strided_slice %345 {offsets = [0, 0], sizes = [2, 16], strides = [1, 1]} : vector<2x48xf32> to vector<2x16xf32>
    %352 = vector.extract_strided_slice %350 {offsets = [0, 0], sizes = [2, 16], strides = [1, 1]} : vector<2x48xf32> to vector<2x16xf32>
    %353 = arith.addf %351, %352 : vector<2x16xf32>
    %354 = arith.negf %353 : vector<2x16xf32>
    %355 = math.exp %354 : vector<2x16xf32>
    %cst_93 = arith.constant 1.000000e+00 : f32
    %356 = vector.broadcast %cst_93 : f32 to vector<2x16xf32>
    %357 = arith.addf %356, %355 : vector<2x16xf32>
    %358 = arith.divf %356, %357 : vector<2x16xf32>
    %359 = vector.extract_strided_slice %345 {offsets = [0, 16], sizes = [2, 16], strides = [1, 1]} : vector<2x48xf32> to vector<2x16xf32>
    %360 = vector.extract_strided_slice %350 {offsets = [0, 16], sizes = [2, 16], strides = [1, 1]} : vector<2x48xf32> to vector<2x16xf32>
    %361 = arith.addf %359, %360 : vector<2x16xf32>
    %362 = arith.negf %361 : vector<2x16xf32>
    %363 = math.exp %362 : vector<2x16xf32>
    %cst_94 = arith.constant 1.000000e+00 : f32
    %364 = vector.broadcast %cst_94 : f32 to vector<2x16xf32>
    %365 = arith.addf %364, %363 : vector<2x16xf32>
    %366 = arith.divf %364, %365 : vector<2x16xf32>
    %367 = vector.extract_strided_slice %345 {offsets = [0, 32], sizes = [2, 16], strides = [1, 1]} : vector<2x48xf32> to vector<2x16xf32>
    %368 = vector.extract_strided_slice %350 {offsets = [0, 32], sizes = [2, 16], strides = [1, 1]} : vector<2x48xf32> to vector<2x16xf32>
    %369 = vector.broadcast %15 : vector<1x16xf32> to vector<2x16xf32>
    %370 = arith.addf %368, %369 : vector<2x16xf32>
    %371 = arith.mulf %358, %370 : vector<2x16xf32>
    %372 = arith.addf %367, %371 : vector<2x16xf32>
    %373 = math.tanh %372 : vector<2x16xf32>
    %cst_95 = arith.constant 1.000000e+00 : f32
    %374 = vector.broadcast %cst_95 : f32 to vector<2x16xf32>
    %375 = arith.subf %374, %366 : vector<2x16xf32>
    %376 = arith.mulf %375, %373 : vector<2x16xf32>
    %377 = arith.mulf %366, %313 : vector<2x16xf32>
    %378 = arith.addf %376, %377 : vector<2x16xf32>
    %cst_96 = arith.constant dense<0.000000e+00> : vector<2x48xf32>
    %379 = tpu.matmul %342, %14, %cst_96 {dimension_numbers = #tpu.dot_dimension_numbers<[1], [0], [0], [1], [0, 0, 1, 1], [], []>} : vector<2x16xf32>, vector<16x48xf32>, vector<2x48xf32> -> vector<2x48xf32>
    %380 = vector.extract_strided_slice %349 {offsets = [0, 0], sizes = [2, 16], strides = [1, 1]} : vector<2x48xf32> to vector<2x16xf32>
    %381 = vector.extract_strided_slice %379 {offsets = [0, 0], sizes = [2, 16], strides = [1, 1]} : vector<2x48xf32> to vector<2x16xf32>
    %382 = arith.addf %380, %381 : vector<2x16xf32>
    %383 = arith.negf %382 : vector<2x16xf32>
    %384 = math.exp %383 : vector<2x16xf32>
    %cst_97 = arith.constant 1.000000e+00 : f32
    %385 = vector.broadcast %cst_97 : f32 to vector<2x16xf32>
    %386 = arith.addf %385, %384 : vector<2x16xf32>
    %387 = arith.divf %385, %386 : vector<2x16xf32>
    %388 = vector.extract_strided_slice %349 {offsets = [0, 16], sizes = [2, 16], strides = [1, 1]} : vector<2x48xf32> to vector<2x16xf32>
    %389 = vector.extract_strided_slice %379 {offsets = [0, 16], sizes = [2, 16], strides = [1, 1]} : vector<2x48xf32> to vector<2x16xf32>
    %390 = arith.addf %388, %389 : vector<2x16xf32>
    %391 = arith.negf %390 : vector<2x16xf32>
    %392 = math.exp %391 : vector<2x16xf32>
    %cst_98 = arith.constant 1.000000e+00 : f32
    %393 = vector.broadcast %cst_98 : f32 to vector<2x16xf32>
    %394 = arith.addf %393, %392 : vector<2x16xf32>
    %395 = arith.divf %393, %394 : vector<2x16xf32>
    %396 = vector.extract_strided_slice %349 {offsets = [0, 32], sizes = [2, 16], strides = [1, 1]} : vector<2x48xf32> to vector<2x16xf32>
    %397 = vector.extract_strided_slice %379 {offsets = [0, 32], sizes = [2, 16], strides = [1, 1]} : vector<2x48xf32> to vector<2x16xf32>
    %398 = vector.broadcast %16 : vector<1x16xf32> to vector<2x16xf32>
    %399 = arith.addf %397, %398 : vector<2x16xf32>
    %400 = arith.mulf %387, %399 : vector<2x16xf32>
    %401 = arith.addf %396, %400 : vector<2x16xf32>
    %402 = math.tanh %401 : vector<2x16xf32>
    %cst_99 = arith.constant 1.000000e+00 : f32
    %403 = vector.broadcast %cst_99 : f32 to vector<2x16xf32>
    %404 = arith.subf %403, %395 : vector<2x16xf32>
    %405 = arith.mulf %404, %402 : vector<2x16xf32>
    %406 = arith.mulf %395, %342 : vector<2x16xf32>
    %407 = arith.addf %405, %406 : vector<2x16xf32>
    %c6_i32 = arith.constant 6 : i32
    %c2_i32_100 = arith.constant 2 : i32
    %408 = arith.muli %c6_i32, %c2_i32_100 : i32
    %409 = arith.index_cast %408 : i32 to index
    %c0_101 = arith.constant 0 : index
    %410 = vector.load %arg22[%409, %c0_101] : memref<16x48xf32, #tpu.memory_space<vmem>>, vector<2x48xf32>
    %c7_i32_102 = arith.constant 7 : i32
    %411 = arith.subi %c7_i32_102, %c6_i32 : i32
    %c2_i32_103 = arith.constant 2 : i32
    %412 = arith.muli %411, %c2_i32_103 : i32
    %413 = arith.index_cast %412 : i32 to index
    %c0_104 = arith.constant 0 : index
    %414 = vector.load %arg23[%413, %c0_104] : memref<16x48xf32, #tpu.memory_space<vmem>>, vector<2x48xf32>
    %cst_105 = arith.constant dense<0.000000e+00> : vector<2x48xf32>
    %415 = tpu.matmul %378, %13, %cst_105 {dimension_numbers = #tpu.dot_dimension_numbers<[1], [0], [0], [1], [0, 0, 1, 1], [], []>} : vector<2x16xf32>, vector<16x48xf32>, vector<2x48xf32> -> vector<2x48xf32>
    %416 = vector.extract_strided_slice %410 {offsets = [0, 0], sizes = [2, 16], strides = [1, 1]} : vector<2x48xf32> to vector<2x16xf32>
    %417 = vector.extract_strided_slice %415 {offsets = [0, 0], sizes = [2, 16], strides = [1, 1]} : vector<2x48xf32> to vector<2x16xf32>
    %418 = arith.addf %416, %417 : vector<2x16xf32>
    %419 = arith.negf %418 : vector<2x16xf32>
    %420 = math.exp %419 : vector<2x16xf32>
    %cst_106 = arith.constant 1.000000e+00 : f32
    %421 = vector.broadcast %cst_106 : f32 to vector<2x16xf32>
    %422 = arith.addf %421, %420 : vector<2x16xf32>
    %423 = arith.divf %421, %422 : vector<2x16xf32>
    %424 = vector.extract_strided_slice %410 {offsets = [0, 16], sizes = [2, 16], strides = [1, 1]} : vector<2x48xf32> to vector<2x16xf32>
    %425 = vector.extract_strided_slice %415 {offsets = [0, 16], sizes = [2, 16], strides = [1, 1]} : vector<2x48xf32> to vector<2x16xf32>
    %426 = arith.addf %424, %425 : vector<2x16xf32>
    %427 = arith.negf %426 : vector<2x16xf32>
    %428 = math.exp %427 : vector<2x16xf32>
    %cst_107 = arith.constant 1.000000e+00 : f32
    %429 = vector.broadcast %cst_107 : f32 to vector<2x16xf32>
    %430 = arith.addf %429, %428 : vector<2x16xf32>
    %431 = arith.divf %429, %430 : vector<2x16xf32>
    %432 = vector.extract_strided_slice %410 {offsets = [0, 32], sizes = [2, 16], strides = [1, 1]} : vector<2x48xf32> to vector<2x16xf32>
    %433 = vector.extract_strided_slice %415 {offsets = [0, 32], sizes = [2, 16], strides = [1, 1]} : vector<2x48xf32> to vector<2x16xf32>
    %434 = vector.broadcast %15 : vector<1x16xf32> to vector<2x16xf32>
    %435 = arith.addf %433, %434 : vector<2x16xf32>
    %436 = arith.mulf %423, %435 : vector<2x16xf32>
    %437 = arith.addf %432, %436 : vector<2x16xf32>
    %438 = math.tanh %437 : vector<2x16xf32>
    %cst_108 = arith.constant 1.000000e+00 : f32
    %439 = vector.broadcast %cst_108 : f32 to vector<2x16xf32>
    %440 = arith.subf %439, %431 : vector<2x16xf32>
    %441 = arith.mulf %440, %438 : vector<2x16xf32>
    %442 = arith.mulf %431, %378 : vector<2x16xf32>
    %443 = arith.addf %441, %442 : vector<2x16xf32>
    %cst_109 = arith.constant dense<0.000000e+00> : vector<2x48xf32>
    %444 = tpu.matmul %407, %14, %cst_109 {dimension_numbers = #tpu.dot_dimension_numbers<[1], [0], [0], [1], [0, 0, 1, 1], [], []>} : vector<2x16xf32>, vector<16x48xf32>, vector<2x48xf32> -> vector<2x48xf32>
    %445 = vector.extract_strided_slice %414 {offsets = [0, 0], sizes = [2, 16], strides = [1, 1]} : vector<2x48xf32> to vector<2x16xf32>
    %446 = vector.extract_strided_slice %444 {offsets = [0, 0], sizes = [2, 16], strides = [1, 1]} : vector<2x48xf32> to vector<2x16xf32>
    %447 = arith.addf %445, %446 : vector<2x16xf32>
    %448 = arith.negf %447 : vector<2x16xf32>
    %449 = math.exp %448 : vector<2x16xf32>
    %cst_110 = arith.constant 1.000000e+00 : f32
    %450 = vector.broadcast %cst_110 : f32 to vector<2x16xf32>
    %451 = arith.addf %450, %449 : vector<2x16xf32>
    %452 = arith.divf %450, %451 : vector<2x16xf32>
    %453 = vector.extract_strided_slice %414 {offsets = [0, 16], sizes = [2, 16], strides = [1, 1]} : vector<2x48xf32> to vector<2x16xf32>
    %454 = vector.extract_strided_slice %444 {offsets = [0, 16], sizes = [2, 16], strides = [1, 1]} : vector<2x48xf32> to vector<2x16xf32>
    %455 = arith.addf %453, %454 : vector<2x16xf32>
    %456 = arith.negf %455 : vector<2x16xf32>
    %457 = math.exp %456 : vector<2x16xf32>
    %cst_111 = arith.constant 1.000000e+00 : f32
    %458 = vector.broadcast %cst_111 : f32 to vector<2x16xf32>
    %459 = arith.addf %458, %457 : vector<2x16xf32>
    %460 = arith.divf %458, %459 : vector<2x16xf32>
    %461 = vector.extract_strided_slice %414 {offsets = [0, 32], sizes = [2, 16], strides = [1, 1]} : vector<2x48xf32> to vector<2x16xf32>
    %462 = vector.extract_strided_slice %444 {offsets = [0, 32], sizes = [2, 16], strides = [1, 1]} : vector<2x48xf32> to vector<2x16xf32>
    %463 = vector.broadcast %16 : vector<1x16xf32> to vector<2x16xf32>
    %464 = arith.addf %462, %463 : vector<2x16xf32>
    %465 = arith.mulf %452, %464 : vector<2x16xf32>
    %466 = arith.addf %461, %465 : vector<2x16xf32>
    %467 = math.tanh %466 : vector<2x16xf32>
    %cst_112 = arith.constant 1.000000e+00 : f32
    %468 = vector.broadcast %cst_112 : f32 to vector<2x16xf32>
    %469 = arith.subf %468, %460 : vector<2x16xf32>
    %470 = arith.mulf %469, %467 : vector<2x16xf32>
    %471 = arith.mulf %460, %407 : vector<2x16xf32>
    %472 = arith.addf %470, %471 : vector<2x16xf32>
    %c7_i32_113 = arith.constant 7 : i32
    %c2_i32_114 = arith.constant 2 : i32
    %473 = arith.muli %c7_i32_113, %c2_i32_114 : i32
    %474 = arith.index_cast %473 : i32 to index
    %c0_115 = arith.constant 0 : index
    %475 = vector.load %arg22[%474, %c0_115] : memref<16x48xf32, #tpu.memory_space<vmem>>, vector<2x48xf32>
    %c7_i32_116 = arith.constant 7 : i32
    %476 = arith.subi %c7_i32_116, %c7_i32_113 : i32
    %c2_i32_117 = arith.constant 2 : i32
    %477 = arith.muli %476, %c2_i32_117 : i32
    %478 = arith.index_cast %477 : i32 to index
    %c0_118 = arith.constant 0 : index
    %479 = vector.load %arg23[%478, %c0_118] : memref<16x48xf32, #tpu.memory_space<vmem>>, vector<2x48xf32>
    %cst_119 = arith.constant dense<0.000000e+00> : vector<2x48xf32>
    %480 = tpu.matmul %443, %13, %cst_119 {dimension_numbers = #tpu.dot_dimension_numbers<[1], [0], [0], [1], [0, 0, 1, 1], [], []>} : vector<2x16xf32>, vector<16x48xf32>, vector<2x48xf32> -> vector<2x48xf32>
    %481 = vector.extract_strided_slice %475 {offsets = [0, 0], sizes = [2, 16], strides = [1, 1]} : vector<2x48xf32> to vector<2x16xf32>
    %482 = vector.extract_strided_slice %480 {offsets = [0, 0], sizes = [2, 16], strides = [1, 1]} : vector<2x48xf32> to vector<2x16xf32>
    %483 = arith.addf %481, %482 : vector<2x16xf32>
    %484 = arith.negf %483 : vector<2x16xf32>
    %485 = math.exp %484 : vector<2x16xf32>
    %cst_120 = arith.constant 1.000000e+00 : f32
    %486 = vector.broadcast %cst_120 : f32 to vector<2x16xf32>
    %487 = arith.addf %486, %485 : vector<2x16xf32>
    %488 = arith.divf %486, %487 : vector<2x16xf32>
    %489 = vector.extract_strided_slice %475 {offsets = [0, 16], sizes = [2, 16], strides = [1, 1]} : vector<2x48xf32> to vector<2x16xf32>
    %490 = vector.extract_strided_slice %480 {offsets = [0, 16], sizes = [2, 16], strides = [1, 1]} : vector<2x48xf32> to vector<2x16xf32>
    %491 = arith.addf %489, %490 : vector<2x16xf32>
    %492 = arith.negf %491 : vector<2x16xf32>
    %493 = math.exp %492 : vector<2x16xf32>
    %cst_121 = arith.constant 1.000000e+00 : f32
    %494 = vector.broadcast %cst_121 : f32 to vector<2x16xf32>
    %495 = arith.addf %494, %493 : vector<2x16xf32>
    %496 = arith.divf %494, %495 : vector<2x16xf32>
    %497 = vector.extract_strided_slice %475 {offsets = [0, 32], sizes = [2, 16], strides = [1, 1]} : vector<2x48xf32> to vector<2x16xf32>
    %498 = vector.extract_strided_slice %480 {offsets = [0, 32], sizes = [2, 16], strides = [1, 1]} : vector<2x48xf32> to vector<2x16xf32>
    %499 = vector.broadcast %15 : vector<1x16xf32> to vector<2x16xf32>
    %500 = arith.addf %498, %499 : vector<2x16xf32>
    %501 = arith.mulf %488, %500 : vector<2x16xf32>
    %502 = arith.addf %497, %501 : vector<2x16xf32>
    %503 = math.tanh %502 : vector<2x16xf32>
    %cst_122 = arith.constant 1.000000e+00 : f32
    %504 = vector.broadcast %cst_122 : f32 to vector<2x16xf32>
    %505 = arith.subf %504, %496 : vector<2x16xf32>
    %506 = arith.mulf %505, %503 : vector<2x16xf32>
    %507 = arith.mulf %496, %443 : vector<2x16xf32>
    %508 = arith.addf %506, %507 : vector<2x16xf32>
    %cst_123 = arith.constant dense<0.000000e+00> : vector<2x48xf32>
    %509 = tpu.matmul %472, %14, %cst_123 {dimension_numbers = #tpu.dot_dimension_numbers<[1], [0], [0], [1], [0, 0, 1, 1], [], []>} : vector<2x16xf32>, vector<16x48xf32>, vector<2x48xf32> -> vector<2x48xf32>
    %510 = vector.extract_strided_slice %479 {offsets = [0, 0], sizes = [2, 16], strides = [1, 1]} : vector<2x48xf32> to vector<2x16xf32>
    %511 = vector.extract_strided_slice %509 {offsets = [0, 0], sizes = [2, 16], strides = [1, 1]} : vector<2x48xf32> to vector<2x16xf32>
    %512 = arith.addf %510, %511 : vector<2x16xf32>
    %513 = arith.negf %512 : vector<2x16xf32>
    %514 = math.exp %513 : vector<2x16xf32>
    %cst_124 = arith.constant 1.000000e+00 : f32
    %515 = vector.broadcast %cst_124 : f32 to vector<2x16xf32>
    %516 = arith.addf %515, %514 : vector<2x16xf32>
    %517 = arith.divf %515, %516 : vector<2x16xf32>
    %518 = vector.extract_strided_slice %479 {offsets = [0, 16], sizes = [2, 16], strides = [1, 1]} : vector<2x48xf32> to vector<2x16xf32>
    %519 = vector.extract_strided_slice %509 {offsets = [0, 16], sizes = [2, 16], strides = [1, 1]} : vector<2x48xf32> to vector<2x16xf32>
    %520 = arith.addf %518, %519 : vector<2x16xf32>
    %521 = arith.negf %520 : vector<2x16xf32>
    %522 = math.exp %521 : vector<2x16xf32>
    %cst_125 = arith.constant 1.000000e+00 : f32
    %523 = vector.broadcast %cst_125 : f32 to vector<2x16xf32>
    %524 = arith.addf %523, %522 : vector<2x16xf32>
    %525 = arith.divf %523, %524 : vector<2x16xf32>
    %526 = vector.extract_strided_slice %479 {offsets = [0, 32], sizes = [2, 16], strides = [1, 1]} : vector<2x48xf32> to vector<2x16xf32>
    %527 = vector.extract_strided_slice %509 {offsets = [0, 32], sizes = [2, 16], strides = [1, 1]} : vector<2x48xf32> to vector<2x16xf32>
    %528 = vector.broadcast %16 : vector<1x16xf32> to vector<2x16xf32>
    %529 = arith.addf %527, %528 : vector<2x16xf32>
    %530 = arith.mulf %517, %529 : vector<2x16xf32>
    %531 = arith.addf %526, %530 : vector<2x16xf32>
    %532 = math.tanh %531 : vector<2x16xf32>
    %cst_126 = arith.constant 1.000000e+00 : f32
    %533 = vector.broadcast %cst_126 : f32 to vector<2x16xf32>
    %534 = arith.subf %533, %525 : vector<2x16xf32>
    %535 = arith.mulf %534, %532 : vector<2x16xf32>
    %536 = arith.mulf %525, %472 : vector<2x16xf32>
    %537 = arith.addf %535, %536 : vector<2x16xf32>
    %c8_i32 = arith.constant 8 : i32
    %c0_127 = arith.constant 0 : index
    %c0_128 = arith.constant 0 : index
    %538 = vector.load %arg10[%c0_127, %c0_128] : memref<16x64xf32, #tpu.memory_space<vmem>>, vector<16x64xf32>
    %cst_129 = arith.constant dense<0.000000e+00> : vector<2x64xf32>
    %539 = tpu.matmul %508, %538, %cst_129 {dimension_numbers = #tpu.dot_dimension_numbers<[1], [0], [0], [1], [0, 0, 1, 1], [], []>} : vector<2x16xf32>, vector<16x64xf32>, vector<2x64xf32> -> vector<2x64xf32>
    %c0_130 = arith.constant 0 : index
    %c0_131 = arith.constant 0 : index
    %540 = vector.load %arg11[%c0_130, %c0_131] : memref<16x64xf32, #tpu.memory_space<vmem>>, vector<16x64xf32>
    %cst_132 = arith.constant dense<0.000000e+00> : vector<2x64xf32>
    %541 = tpu.matmul %537, %540, %cst_132 {dimension_numbers = #tpu.dot_dimension_numbers<[1], [0], [0], [1], [0, 0, 1, 1], [], []>} : vector<2x16xf32>, vector<16x64xf32>, vector<2x64xf32> -> vector<2x64xf32>
    %542 = arith.addf %539, %541 : vector<2x64xf32>
    %c0_133 = arith.constant 0 : index
    %c0_134 = arith.constant 0 : index
    %543 = vector.load %arg12[%c0_133, %c0_134] : memref<1x64xf32, #tpu.memory_space<vmem>>, vector<1x64xf32>
    %544 = vector.broadcast %543 : vector<1x64xf32> to vector<2x64xf32>
    %545 = arith.addf %542, %544 : vector<2x64xf32>
    %546 = vector.extract_strided_slice %545 {offsets = [0, 0], sizes = [2, 32], strides = [1, 1]} : vector<2x64xf32> to vector<2x32xf32>
    %547 = vector.extract_strided_slice %545 {offsets = [0, 32], sizes = [2, 32], strides = [1, 1]} : vector<2x64xf32> to vector<2x32xf32>
    %cst_135 = arith.constant 0.000000e+00 : f32
    %548 = vector.broadcast %cst_135 : f32 to vector<2x32xf32>
    %549 = arith.subf %548, %547 : vector<2x32xf32>
    %550 = math.exp %549 : vector<2x32xf32>
    %551 = arith.addf %547, %550 : vector<2x32xf32>
    %552 = arith.mulf %546, %546 : vector<2x32xf32>
    %553 = arith.mulf %552, %550 : vector<2x32xf32>
    %554 = arith.addf %551, %553 : vector<2x32xf32>
    %cst_136 = arith.constant 1.000000e+00 : f32
    %555 = vector.broadcast %cst_136 : f32 to vector<2x32xf32>
    %556 = arith.addf %554, %555 : vector<2x32xf32>
    %cst_137 = arith.constant 5.000000e-01 : f32
    %557 = vector.broadcast %cst_137 : f32 to vector<2x32xf32>
    %558 = arith.mulf %557, %556 : vector<2x32xf32>
    %559 = vector.shape_cast %558 : vector<2x32xf32> to vector<1x2x32xf32>
    %cst_138 = arith.constant dense<0.000000e+00> : vector<1xf32>
    %560 = vector.multi_reduction <add>, %559, %cst_138 [1, 2] : vector<1x2x32xf32> to vector<1xf32>
    %561 = vector.shape_cast %560 : vector<1xf32> to vector<1x1x1xf32>
    %562 = vector.extract %561[0, 0, 0] : f32 from vector<1x1x1xf32>
    %563 = vector.broadcast %562 : f32 to vector<1x1xf32>
    %cst_139 = arith.constant 6.400000e+01 : f32
    %564 = vector.broadcast %cst_139 : f32 to vector<1x1xf32>
    %565 = arith.divf %563, %564 : vector<1x1xf32>
    %c0_140 = arith.constant 0 : index
    %c0_141 = arith.constant 0 : index
    %566 = vector.load %arg21[%c0_140, %c0_141] : memref<1x1xf32, #tpu.memory_space<vmem>>, vector<1x1xf32>
    tpu.vector_store %arg21[%c0_140, %c0_141], %565 {strides = array<i32>} : memref<1x1xf32, #tpu.memory_space<vmem>>, vector<1x1xf32>,
    %cst_142 = arith.constant 5.000000e-01 : f32
    %567 = vector.broadcast %cst_142 : f32 to vector<2x32xf32>
    %568 = arith.mulf %567, %547 : vector<2x32xf32>
    %569 = math.exp %568 : vector<2x32xf32>
    %c0_143 = arith.constant 0 : index
    %c0_144 = arith.constant 0 : index
    %570 = vector.load %arg1[%c0_143, %c0_144] : memref<2x32xf32, #tpu.memory_space<vmem>>, vector<2x32xf32>
    %571 = arith.mulf %569, %570 : vector<2x32xf32>
    %572 = arith.addf %571, %546 : vector<2x32xf32>
    %c0_145 = arith.constant 0 : index
    %c0_146 = arith.constant 0 : index
    %573 = vector.load %arg20[%c0_145, %c0_146] : memref<2x32xf32, #tpu.memory_space<vmem>>, vector<2x32xf32>
    tpu.vector_store %arg20[%c0_145, %c0_146], %572 {strides = array<i32>} : memref<2x32xf32, #tpu.memory_space<vmem>>, vector<2x32xf32>,
    %c0_147 = arith.constant 0 : index
    %c0_148 = arith.constant 0 : index
    %574 = vector.load %arg13[%c0_147, %c0_148] : memref<32x96xf32, #tpu.memory_space<vmem>>, vector<32x96xf32>
    %c0_149 = arith.constant 0 : index
    %c0_150 = arith.constant 0 : index
    %575 = vector.load %arg14[%c0_149, %c0_150] : memref<1x96xf32, #tpu.memory_space<vmem>>, vector<1x96xf32>
    %576 = vector.extract_strided_slice %575 {offsets = [0, 0], sizes = [1, 32], strides = [1, 1]} : vector<1x96xf32> to vector<1x32xf32>
    %577 = vector.extract_strided_slice %575 {offsets = [0, 32], sizes = [1, 32], strides = [1, 1]} : vector<1x96xf32> to vector<1x32xf32>
    %578 = vector.extract_strided_slice %575 {offsets = [0, 64], sizes = [1, 32], strides = [1, 1]} : vector<1x96xf32> to vector<1x32xf32>
    %c0_151 = arith.constant 0 : index
    %c0_152 = arith.constant 0 : index
    %579 = vector.load %arg15[%c0_151, %c0_152] : memref<1x32xf32, #tpu.memory_space<vmem>>, vector<1x32xf32>
    %c0_i32_153 = arith.constant 0 : i32
    %cst_154 = arith.constant dense<0.000000e+00> : vector<2x96xf32>
    %580 = tpu.matmul %572, %574, %cst_154 {dimension_numbers = #tpu.dot_dimension_numbers<[1], [0], [0], [1], [0, 0, 1, 1], [], []>} : vector<2x32xf32>, vector<32x96xf32>, vector<2x96xf32> -> vector<2x96xf32>
    %581 = vector.extract_strided_slice %580 {offsets = [0, 0], sizes = [2, 32], strides = [1, 1]} : vector<2x96xf32> to vector<2x32xf32>
    %582 = vector.broadcast %576 : vector<1x32xf32> to vector<2x32xf32>
    %583 = arith.addf %581, %582 : vector<2x32xf32>
    %584 = arith.negf %583 : vector<2x32xf32>
    %585 = math.exp %584 : vector<2x32xf32>
    %cst_155 = arith.constant 1.000000e+00 : f32
    %586 = vector.broadcast %cst_155 : f32 to vector<2x32xf32>
    %587 = arith.addf %586, %585 : vector<2x32xf32>
    %588 = arith.divf %586, %587 : vector<2x32xf32>
    %589 = vector.extract_strided_slice %580 {offsets = [0, 32], sizes = [2, 32], strides = [1, 1]} : vector<2x96xf32> to vector<2x32xf32>
    %590 = vector.broadcast %577 : vector<1x32xf32> to vector<2x32xf32>
    %591 = arith.addf %589, %590 : vector<2x32xf32>
    %592 = arith.negf %591 : vector<2x32xf32>
    %593 = math.exp %592 : vector<2x32xf32>
    %cst_156 = arith.constant 1.000000e+00 : f32
    %594 = vector.broadcast %cst_156 : f32 to vector<2x32xf32>
    %595 = arith.addf %594, %593 : vector<2x32xf32>
    %596 = arith.divf %594, %595 : vector<2x32xf32>
    %597 = vector.extract_strided_slice %580 {offsets = [0, 64], sizes = [2, 32], strides = [1, 1]} : vector<2x96xf32> to vector<2x32xf32>
    %598 = vector.broadcast %579 : vector<1x32xf32> to vector<2x32xf32>
    %599 = arith.addf %597, %598 : vector<2x32xf32>
    %600 = arith.mulf %588, %599 : vector<2x32xf32>
    %601 = vector.broadcast %578 : vector<1x32xf32> to vector<2x32xf32>
    %602 = arith.addf %601, %600 : vector<2x32xf32>
    %603 = math.tanh %602 : vector<2x32xf32>
    %cst_157 = arith.constant 1.000000e+00 : f32
    %604 = vector.broadcast %cst_157 : f32 to vector<2x32xf32>
    %605 = arith.subf %604, %596 : vector<2x32xf32>
    %606 = arith.mulf %605, %603 : vector<2x32xf32>
    %607 = arith.mulf %596, %572 : vector<2x32xf32>
    %608 = arith.addf %606, %607 : vector<2x32xf32>
    %c2_i32_158 = arith.constant 2 : i32
    %609 = arith.muli %c0_i32_153, %c2_i32_158 : i32
    %610 = arith.index_cast %609 : i32 to index
    %c0_159 = arith.constant 0 : index
    %611 = vector.load %arg19[%610, %c0_159] : memref<16x32xf32, #tpu.memory_space<vmem>>, vector<2x32xf32>
    tpu.vector_store %arg19[%610, %c0_159], %608 {strides = array<i32>} : memref<16x32xf32, #tpu.memory_space<vmem>>, vector<2x32xf32>,
    %c1_i32_160 = arith.constant 1 : i32
    %cst_161 = arith.constant dense<0.000000e+00> : vector<2x96xf32>
    %612 = tpu.matmul %608, %574, %cst_161 {dimension_numbers = #tpu.dot_dimension_numbers<[1], [0], [0], [1], [0, 0, 1, 1], [], []>} : vector<2x32xf32>, vector<32x96xf32>, vector<2x96xf32> -> vector<2x96xf32>
    %613 = vector.extract_strided_slice %612 {offsets = [0, 0], sizes = [2, 32], strides = [1, 1]} : vector<2x96xf32> to vector<2x32xf32>
    %614 = vector.broadcast %576 : vector<1x32xf32> to vector<2x32xf32>
    %615 = arith.addf %613, %614 : vector<2x32xf32>
    %616 = arith.negf %615 : vector<2x32xf32>
    %617 = math.exp %616 : vector<2x32xf32>
    %cst_162 = arith.constant 1.000000e+00 : f32
    %618 = vector.broadcast %cst_162 : f32 to vector<2x32xf32>
    %619 = arith.addf %618, %617 : vector<2x32xf32>
    %620 = arith.divf %618, %619 : vector<2x32xf32>
    %621 = vector.extract_strided_slice %612 {offsets = [0, 32], sizes = [2, 32], strides = [1, 1]} : vector<2x96xf32> to vector<2x32xf32>
    %622 = vector.broadcast %577 : vector<1x32xf32> to vector<2x32xf32>
    %623 = arith.addf %621, %622 : vector<2x32xf32>
    %624 = arith.negf %623 : vector<2x32xf32>
    %625 = math.exp %624 : vector<2x32xf32>
    %cst_163 = arith.constant 1.000000e+00 : f32
    %626 = vector.broadcast %cst_163 : f32 to vector<2x32xf32>
    %627 = arith.addf %626, %625 : vector<2x32xf32>
    %628 = arith.divf %626, %627 : vector<2x32xf32>
    %629 = vector.extract_strided_slice %612 {offsets = [0, 64], sizes = [2, 32], strides = [1, 1]} : vector<2x96xf32> to vector<2x32xf32>
    %630 = vector.broadcast %579 : vector<1x32xf32> to vector<2x32xf32>
    %631 = arith.addf %629, %630 : vector<2x32xf32>
    %632 = arith.mulf %620, %631 : vector<2x32xf32>
    %633 = vector.broadcast %578 : vector<1x32xf32> to vector<2x32xf32>
    %634 = arith.addf %633, %632 : vector<2x32xf32>
    %635 = math.tanh %634 : vector<2x32xf32>
    %cst_164 = arith.constant 1.000000e+00 : f32
    %636 = vector.broadcast %cst_164 : f32 to vector<2x32xf32>
    %637 = arith.subf %636, %628 : vector<2x32xf32>
    %638 = arith.mulf %637, %635 : vector<2x32xf32>
    %639 = arith.mulf %628, %608 : vector<2x32xf32>
    %640 = arith.addf %638, %639 : vector<2x32xf32>
    %c2_i32_165 = arith.constant 2 : i32
    %641 = arith.muli %c1_i32_160, %c2_i32_165 : i32
    %642 = arith.index_cast %641 : i32 to index
    %c0_166 = arith.constant 0 : index
    %643 = vector.load %arg19[%642, %c0_166] : memref<16x32xf32, #tpu.memory_space<vmem>>, vector<2x32xf32>
    tpu.vector_store %arg19[%642, %c0_166], %640 {strides = array<i32>} : memref<16x32xf32, #tpu.memory_space<vmem>>, vector<2x32xf32>,
    %c2_i32_167 = arith.constant 2 : i32
    %cst_168 = arith.constant dense<0.000000e+00> : vector<2x96xf32>
    %644 = tpu.matmul %640, %574, %cst_168 {dimension_numbers = #tpu.dot_dimension_numbers<[1], [0], [0], [1], [0, 0, 1, 1], [], []>} : vector<2x32xf32>, vector<32x96xf32>, vector<2x96xf32> -> vector<2x96xf32>
    %645 = vector.extract_strided_slice %644 {offsets = [0, 0], sizes = [2, 32], strides = [1, 1]} : vector<2x96xf32> to vector<2x32xf32>
    %646 = vector.broadcast %576 : vector<1x32xf32> to vector<2x32xf32>
    %647 = arith.addf %645, %646 : vector<2x32xf32>
    %648 = arith.negf %647 : vector<2x32xf32>
    %649 = math.exp %648 : vector<2x32xf32>
    %cst_169 = arith.constant 1.000000e+00 : f32
    %650 = vector.broadcast %cst_169 : f32 to vector<2x32xf32>
    %651 = arith.addf %650, %649 : vector<2x32xf32>
    %652 = arith.divf %650, %651 : vector<2x32xf32>
    %653 = vector.extract_strided_slice %644 {offsets = [0, 32], sizes = [2, 32], strides = [1, 1]} : vector<2x96xf32> to vector<2x32xf32>
    %654 = vector.broadcast %577 : vector<1x32xf32> to vector<2x32xf32>
    %655 = arith.addf %653, %654 : vector<2x32xf32>
    %656 = arith.negf %655 : vector<2x32xf32>
    %657 = math.exp %656 : vector<2x32xf32>
    %cst_170 = arith.constant 1.000000e+00 : f32
    %658 = vector.broadcast %cst_170 : f32 to vector<2x32xf32>
    %659 = arith.addf %658, %657 : vector<2x32xf32>
    %660 = arith.divf %658, %659 : vector<2x32xf32>
    %661 = vector.extract_strided_slice %644 {offsets = [0, 64], sizes = [2, 32], strides = [1, 1]} : vector<2x96xf32> to vector<2x32xf32>
    %662 = vector.broadcast %579 : vector<1x32xf32> to vector<2x32xf32>
    %663 = arith.addf %661, %662 : vector<2x32xf32>
    %664 = arith.mulf %652, %663 : vector<2x32xf32>
    %665 = vector.broadcast %578 : vector<1x32xf32> to vector<2x32xf32>
    %666 = arith.addf %665, %664 : vector<2x32xf32>
    %667 = math.tanh %666 : vector<2x32xf32>
    %cst_171 = arith.constant 1.000000e+00 : f32
    %668 = vector.broadcast %cst_171 : f32 to vector<2x32xf32>
    %669 = arith.subf %668, %660 : vector<2x32xf32>
    %670 = arith.mulf %669, %667 : vector<2x32xf32>
    %671 = arith.mulf %660, %640 : vector<2x32xf32>
    %672 = arith.addf %670, %671 : vector<2x32xf32>
    %c2_i32_172 = arith.constant 2 : i32
    %673 = arith.muli %c2_i32_167, %c2_i32_172 : i32
    %674 = arith.index_cast %673 : i32 to index
    %c0_173 = arith.constant 0 : index
    %675 = vector.load %arg19[%674, %c0_173] : memref<16x32xf32, #tpu.memory_space<vmem>>, vector<2x32xf32>
    tpu.vector_store %arg19[%674, %c0_173], %672 {strides = array<i32>} : memref<16x32xf32, #tpu.memory_space<vmem>>, vector<2x32xf32>,
    %c3_i32_174 = arith.constant 3 : i32
    %cst_175 = arith.constant dense<0.000000e+00> : vector<2x96xf32>
    %676 = tpu.matmul %672, %574, %cst_175 {dimension_numbers = #tpu.dot_dimension_numbers<[1], [0], [0], [1], [0, 0, 1, 1], [], []>} : vector<2x32xf32>, vector<32x96xf32>, vector<2x96xf32> -> vector<2x96xf32>
    %677 = vector.extract_strided_slice %676 {offsets = [0, 0], sizes = [2, 32], strides = [1, 1]} : vector<2x96xf32> to vector<2x32xf32>
    %678 = vector.broadcast %576 : vector<1x32xf32> to vector<2x32xf32>
    %679 = arith.addf %677, %678 : vector<2x32xf32>
    %680 = arith.negf %679 : vector<2x32xf32>
    %681 = math.exp %680 : vector<2x32xf32>
    %cst_176 = arith.constant 1.000000e+00 : f32
    %682 = vector.broadcast %cst_176 : f32 to vector<2x32xf32>
    %683 = arith.addf %682, %681 : vector<2x32xf32>
    %684 = arith.divf %682, %683 : vector<2x32xf32>
    %685 = vector.extract_strided_slice %676 {offsets = [0, 32], sizes = [2, 32], strides = [1, 1]} : vector<2x96xf32> to vector<2x32xf32>
    %686 = vector.broadcast %577 : vector<1x32xf32> to vector<2x32xf32>
    %687 = arith.addf %685, %686 : vector<2x32xf32>
    %688 = arith.negf %687 : vector<2x32xf32>
    %689 = math.exp %688 : vector<2x32xf32>
    %cst_177 = arith.constant 1.000000e+00 : f32
    %690 = vector.broadcast %cst_177 : f32 to vector<2x32xf32>
    %691 = arith.addf %690, %689 : vector<2x32xf32>
    %692 = arith.divf %690, %691 : vector<2x32xf32>
    %693 = vector.extract_strided_slice %676 {offsets = [0, 64], sizes = [2, 32], strides = [1, 1]} : vector<2x96xf32> to vector<2x32xf32>
    %694 = vector.broadcast %579 : vector<1x32xf32> to vector<2x32xf32>
    %695 = arith.addf %693, %694 : vector<2x32xf32>
    %696 = arith.mulf %684, %695 : vector<2x32xf32>
    %697 = vector.broadcast %578 : vector<1x32xf32> to vector<2x32xf32>
    %698 = arith.addf %697, %696 : vector<2x32xf32>
    %699 = math.tanh %698 : vector<2x32xf32>
    %cst_178 = arith.constant 1.000000e+00 : f32
    %700 = vector.broadcast %cst_178 : f32 to vector<2x32xf32>
    %701 = arith.subf %700, %692 : vector<2x32xf32>
    %702 = arith.mulf %701, %699 : vector<2x32xf32>
    %703 = arith.mulf %692, %672 : vector<2x32xf32>
    %704 = arith.addf %702, %703 : vector<2x32xf32>
    %c2_i32_179 = arith.constant 2 : i32
    %705 = arith.muli %c3_i32_174, %c2_i32_179 : i32
    %706 = arith.index_cast %705 : i32 to index
    %c0_180 = arith.constant 0 : index
    %707 = vector.load %arg19[%706, %c0_180] : memref<16x32xf32, #tpu.memory_space<vmem>>, vector<2x32xf32>
    tpu.vector_store %arg19[%706, %c0_180], %704 {strides = array<i32>} : memref<16x32xf32, #tpu.memory_space<vmem>>, vector<2x32xf32>,
    %c4_i32_181 = arith.constant 4 : i32
    %cst_182 = arith.constant dense<0.000000e+00> : vector<2x96xf32>
    %708 = tpu.matmul %704, %574, %cst_182 {dimension_numbers = #tpu.dot_dimension_numbers<[1], [0], [0], [1], [0, 0, 1, 1], [], []>} : vector<2x32xf32>, vector<32x96xf32>, vector<2x96xf32> -> vector<2x96xf32>
    %709 = vector.extract_strided_slice %708 {offsets = [0, 0], sizes = [2, 32], strides = [1, 1]} : vector<2x96xf32> to vector<2x32xf32>
    %710 = vector.broadcast %576 : vector<1x32xf32> to vector<2x32xf32>
    %711 = arith.addf %709, %710 : vector<2x32xf32>
    %712 = arith.negf %711 : vector<2x32xf32>
    %713 = math.exp %712 : vector<2x32xf32>
    %cst_183 = arith.constant 1.000000e+00 : f32
    %714 = vector.broadcast %cst_183 : f32 to vector<2x32xf32>
    %715 = arith.addf %714, %713 : vector<2x32xf32>
    %716 = arith.divf %714, %715 : vector<2x32xf32>
    %717 = vector.extract_strided_slice %708 {offsets = [0, 32], sizes = [2, 32], strides = [1, 1]} : vector<2x96xf32> to vector<2x32xf32>
    %718 = vector.broadcast %577 : vector<1x32xf32> to vector<2x32xf32>
    %719 = arith.addf %717, %718 : vector<2x32xf32>
    %720 = arith.negf %719 : vector<2x32xf32>
    %721 = math.exp %720 : vector<2x32xf32>
    %cst_184 = arith.constant 1.000000e+00 : f32
    %722 = vector.broadcast %cst_184 : f32 to vector<2x32xf32>
    %723 = arith.addf %722, %721 : vector<2x32xf32>
    %724 = arith.divf %722, %723 : vector<2x32xf32>
    %725 = vector.extract_strided_slice %708 {offsets = [0, 64], sizes = [2, 32], strides = [1, 1]} : vector<2x96xf32> to vector<2x32xf32>
    %726 = vector.broadcast %579 : vector<1x32xf32> to vector<2x32xf32>
    %727 = arith.addf %725, %726 : vector<2x32xf32>
    %728 = arith.mulf %716, %727 : vector<2x32xf32>
    %729 = vector.broadcast %578 : vector<1x32xf32> to vector<2x32xf32>
    %730 = arith.addf %729, %728 : vector<2x32xf32>
    %731 = math.tanh %730 : vector<2x32xf32>
    %cst_185 = arith.constant 1.000000e+00 : f32
    %732 = vector.broadcast %cst_185 : f32 to vector<2x32xf32>
    %733 = arith.subf %732, %724 : vector<2x32xf32>
    %734 = arith.mulf %733, %731 : vector<2x32xf32>
    %735 = arith.mulf %724, %704 : vector<2x32xf32>
    %736 = arith.addf %734, %735 : vector<2x32xf32>
    %c2_i32_186 = arith.constant 2 : i32
    %737 = arith.muli %c4_i32_181, %c2_i32_186 : i32
    %738 = arith.index_cast %737 : i32 to index
    %c0_187 = arith.constant 0 : index
    %739 = vector.load %arg19[%738, %c0_187] : memref<16x32xf32, #tpu.memory_space<vmem>>, vector<2x32xf32>
    tpu.vector_store %arg19[%738, %c0_187], %736 {strides = array<i32>} : memref<16x32xf32, #tpu.memory_space<vmem>>, vector<2x32xf32>,
    %c5_i32_188 = arith.constant 5 : i32
    %cst_189 = arith.constant dense<0.000000e+00> : vector<2x96xf32>
    %740 = tpu.matmul %736, %574, %cst_189 {dimension_numbers = #tpu.dot_dimension_numbers<[1], [0], [0], [1], [0, 0, 1, 1], [], []>} : vector<2x32xf32>, vector<32x96xf32>, vector<2x96xf32> -> vector<2x96xf32>
    %741 = vector.extract_strided_slice %740 {offsets = [0, 0], sizes = [2, 32], strides = [1, 1]} : vector<2x96xf32> to vector<2x32xf32>
    %742 = vector.broadcast %576 : vector<1x32xf32> to vector<2x32xf32>
    %743 = arith.addf %741, %742 : vector<2x32xf32>
    %744 = arith.negf %743 : vector<2x32xf32>
    %745 = math.exp %744 : vector<2x32xf32>
    %cst_190 = arith.constant 1.000000e+00 : f32
    %746 = vector.broadcast %cst_190 : f32 to vector<2x32xf32>
    %747 = arith.addf %746, %745 : vector<2x32xf32>
    %748 = arith.divf %746, %747 : vector<2x32xf32>
    %749 = vector.extract_strided_slice %740 {offsets = [0, 32], sizes = [2, 32], strides = [1, 1]} : vector<2x96xf32> to vector<2x32xf32>
    %750 = vector.broadcast %577 : vector<1x32xf32> to vector<2x32xf32>
    %751 = arith.addf %749, %750 : vector<2x32xf32>
    %752 = arith.negf %751 : vector<2x32xf32>
    %753 = math.exp %752 : vector<2x32xf32>
    %cst_191 = arith.constant 1.000000e+00 : f32
    %754 = vector.broadcast %cst_191 : f32 to vector<2x32xf32>
    %755 = arith.addf %754, %753 : vector<2x32xf32>
    %756 = arith.divf %754, %755 : vector<2x32xf32>
    %757 = vector.extract_strided_slice %740 {offsets = [0, 64], sizes = [2, 32], strides = [1, 1]} : vector<2x96xf32> to vector<2x32xf32>
    %758 = vector.broadcast %579 : vector<1x32xf32> to vector<2x32xf32>
    %759 = arith.addf %757, %758 : vector<2x32xf32>
    %760 = arith.mulf %748, %759 : vector<2x32xf32>
    %761 = vector.broadcast %578 : vector<1x32xf32> to vector<2x32xf32>
    %762 = arith.addf %761, %760 : vector<2x32xf32>
    %763 = math.tanh %762 : vector<2x32xf32>
    %cst_192 = arith.constant 1.000000e+00 : f32
    %764 = vector.broadcast %cst_192 : f32 to vector<2x32xf32>
    %765 = arith.subf %764, %756 : vector<2x32xf32>
    %766 = arith.mulf %765, %763 : vector<2x32xf32>
    %767 = arith.mulf %756, %736 : vector<2x32xf32>
    %768 = arith.addf %766, %767 : vector<2x32xf32>
    %c2_i32_193 = arith.constant 2 : i32
    %769 = arith.muli %c5_i32_188, %c2_i32_193 : i32
    %770 = arith.index_cast %769 : i32 to index
    %c0_194 = arith.constant 0 : index
    %771 = vector.load %arg19[%770, %c0_194] : memref<16x32xf32, #tpu.memory_space<vmem>>, vector<2x32xf32>
    tpu.vector_store %arg19[%770, %c0_194], %768 {strides = array<i32>} : memref<16x32xf32, #tpu.memory_space<vmem>>, vector<2x32xf32>,
    %c6_i32_195 = arith.constant 6 : i32
    %cst_196 = arith.constant dense<0.000000e+00> : vector<2x96xf32>
    %772 = tpu.matmul %768, %574, %cst_196 {dimension_numbers = #tpu.dot_dimension_numbers<[1], [0], [0], [1], [0, 0, 1, 1], [], []>} : vector<2x32xf32>, vector<32x96xf32>, vector<2x96xf32> -> vector<2x96xf32>
    %773 = vector.extract_strided_slice %772 {offsets = [0, 0], sizes = [2, 32], strides = [1, 1]} : vector<2x96xf32> to vector<2x32xf32>
    %774 = vector.broadcast %576 : vector<1x32xf32> to vector<2x32xf32>
    %775 = arith.addf %773, %774 : vector<2x32xf32>
    %776 = arith.negf %775 : vector<2x32xf32>
    %777 = math.exp %776 : vector<2x32xf32>
    %cst_197 = arith.constant 1.000000e+00 : f32
    %778 = vector.broadcast %cst_197 : f32 to vector<2x32xf32>
    %779 = arith.addf %778, %777 : vector<2x32xf32>
    %780 = arith.divf %778, %779 : vector<2x32xf32>
    %781 = vector.extract_strided_slice %772 {offsets = [0, 32], sizes = [2, 32], strides = [1, 1]} : vector<2x96xf32> to vector<2x32xf32>
    %782 = vector.broadcast %577 : vector<1x32xf32> to vector<2x32xf32>
    %783 = arith.addf %781, %782 : vector<2x32xf32>
    %784 = arith.negf %783 : vector<2x32xf32>
    %785 = math.exp %784 : vector<2x32xf32>
    %cst_198 = arith.constant 1.000000e+00 : f32
    %786 = vector.broadcast %cst_198 : f32 to vector<2x32xf32>
    %787 = arith.addf %786, %785 : vector<2x32xf32>
    %788 = arith.divf %786, %787 : vector<2x32xf32>
    %789 = vector.extract_strided_slice %772 {offsets = [0, 64], sizes = [2, 32], strides = [1, 1]} : vector<2x96xf32> to vector<2x32xf32>
    %790 = vector.broadcast %579 : vector<1x32xf32> to vector<2x32xf32>
    %791 = arith.addf %789, %790 : vector<2x32xf32>
    %792 = arith.mulf %780, %791 : vector<2x32xf32>
    %793 = vector.broadcast %578 : vector<1x32xf32> to vector<2x32xf32>
    %794 = arith.addf %793, %792 : vector<2x32xf32>
    %795 = math.tanh %794 : vector<2x32xf32>
    %cst_199 = arith.constant 1.000000e+00 : f32
    %796 = vector.broadcast %cst_199 : f32 to vector<2x32xf32>
    %797 = arith.subf %796, %788 : vector<2x32xf32>
    %798 = arith.mulf %797, %795 : vector<2x32xf32>
    %799 = arith.mulf %788, %768 : vector<2x32xf32>
    %800 = arith.addf %798, %799 : vector<2x32xf32>
    %c2_i32_200 = arith.constant 2 : i32
    %801 = arith.muli %c6_i32_195, %c2_i32_200 : i32
    %802 = arith.index_cast %801 : i32 to index
    %c0_201 = arith.constant 0 : index
    %803 = vector.load %arg19[%802, %c0_201] : memref<16x32xf32, #tpu.memory_space<vmem>>, vector<2x32xf32>
    tpu.vector_store %arg19[%802, %c0_201], %800 {strides = array<i32>} : memref<16x32xf32, #tpu.memory_space<vmem>>, vector<2x32xf32>,
    %c7_i32_202 = arith.constant 7 : i32
    %cst_203 = arith.constant dense<0.000000e+00> : vector<2x96xf32>
    %804 = tpu.matmul %800, %574, %cst_203 {dimension_numbers = #tpu.dot_dimension_numbers<[1], [0], [0], [1], [0, 0, 1, 1], [], []>} : vector<2x32xf32>, vector<32x96xf32>, vector<2x96xf32> -> vector<2x96xf32>
    %805 = vector.extract_strided_slice %804 {offsets = [0, 0], sizes = [2, 32], strides = [1, 1]} : vector<2x96xf32> to vector<2x32xf32>
    %806 = vector.broadcast %576 : vector<1x32xf32> to vector<2x32xf32>
    %807 = arith.addf %805, %806 : vector<2x32xf32>
    %808 = arith.negf %807 : vector<2x32xf32>
    %809 = math.exp %808 : vector<2x32xf32>
    %cst_204 = arith.constant 1.000000e+00 : f32
    %810 = vector.broadcast %cst_204 : f32 to vector<2x32xf32>
    %811 = arith.addf %810, %809 : vector<2x32xf32>
    %812 = arith.divf %810, %811 : vector<2x32xf32>
    %813 = vector.extract_strided_slice %804 {offsets = [0, 32], sizes = [2, 32], strides = [1, 1]} : vector<2x96xf32> to vector<2x32xf32>
    %814 = vector.broadcast %577 : vector<1x32xf32> to vector<2x32xf32>
    %815 = arith.addf %813, %814 : vector<2x32xf32>
    %816 = arith.negf %815 : vector<2x32xf32>
    %817 = math.exp %816 : vector<2x32xf32>
    %cst_205 = arith.constant 1.000000e+00 : f32
    %818 = vector.broadcast %cst_205 : f32 to vector<2x32xf32>
    %819 = arith.addf %818, %817 : vector<2x32xf32>
    %820 = arith.divf %818, %819 : vector<2x32xf32>
    %821 = vector.extract_strided_slice %804 {offsets = [0, 64], sizes = [2, 32], strides = [1, 1]} : vector<2x96xf32> to vector<2x32xf32>
    %822 = vector.broadcast %579 : vector<1x32xf32> to vector<2x32xf32>
    %823 = arith.addf %821, %822 : vector<2x32xf32>
    %824 = arith.mulf %812, %823 : vector<2x32xf32>
    %825 = vector.broadcast %578 : vector<1x32xf32> to vector<2x32xf32>
    %826 = arith.addf %825, %824 : vector<2x32xf32>
    %827 = math.tanh %826 : vector<2x32xf32>
    %cst_206 = arith.constant 1.000000e+00 : f32
    %828 = vector.broadcast %cst_206 : f32 to vector<2x32xf32>
    %829 = arith.subf %828, %820 : vector<2x32xf32>
    %830 = arith.mulf %829, %827 : vector<2x32xf32>
    %831 = arith.mulf %820, %800 : vector<2x32xf32>
    %832 = arith.addf %830, %831 : vector<2x32xf32>
    %c2_i32_207 = arith.constant 2 : i32
    %833 = arith.muli %c7_i32_202, %c2_i32_207 : i32
    %834 = arith.index_cast %833 : i32 to index
    %c0_208 = arith.constant 0 : index
    %835 = vector.load %arg19[%834, %c0_208] : memref<16x32xf32, #tpu.memory_space<vmem>>, vector<2x32xf32>
    tpu.vector_store %arg19[%834, %c0_208], %832 {strides = array<i32>} : memref<16x32xf32, #tpu.memory_space<vmem>>, vector<2x32xf32>,
    %c8_i32_209 = arith.constant 8 : i32
    %c0_210 = arith.constant 0 : index
    %c0_211 = arith.constant 0 : index
    %836 = vector.load %arg19[%c0_210, %c0_211] : memref<16x32xf32, #tpu.memory_space<vmem>>, vector<16x32xf32>
    %c0_212 = arith.constant 0 : index
    %c0_213 = arith.constant 0 : index
    %837 = vector.load %arg16[%c0_212, %c0_213] : memref<32x4xf32, #tpu.memory_space<vmem>>, vector<32x4xf32>
    %cst_214 = arith.constant dense<0.000000e+00> : vector<16x4xf32>
    %838 = tpu.matmul %836, %837, %cst_214 {dimension_numbers = #tpu.dot_dimension_numbers<[1], [0], [0], [1], [0, 0, 1, 1], [], []>} : vector<16x32xf32>, vector<32x4xf32>, vector<16x4xf32> -> vector<16x4xf32>
    %c0_215 = arith.constant 0 : index
    %c0_216 = arith.constant 0 : index
    %839 = vector.load %arg17[%c0_215, %c0_216] : memref<1x4xf32, #tpu.memory_space<vmem>>, vector<1x4xf32>
    %840 = vector.broadcast %839 : vector<1x4xf32> to vector<16x4xf32>
    %841 = arith.addf %838, %840 : vector<16x4xf32>
    %c0_217 = arith.constant 0 : index
    %c0_218 = arith.constant 0 : index
    %842 = vector.load %arg18[%c0_217, %c0_218] : memref<16x4xf32, #tpu.memory_space<vmem>>, vector<16x4xf32>
    tpu.vector_store %arg18[%c0_217, %c0_218], %841 {strides = array<i32>} : memref<16x4xf32, #tpu.memory_space<vmem>>, vector<16x4xf32>,
    return
  }
}

</mosaic_0001>

<bundles_post_ra>
// kernel: tpu_custom_call.1
= control target key start
LH: loop header
LB: loop body
LE: loop exit
PB: predicated region body
PF: predicated region fallthrough
CT: control target
= control target key end

     0   :  { %s4798_s0 = inlined_call_operand.vmem [shape: f32[16,4], index: 0, kind: input, shape index: {}]   ;;  %s4799_s1 = inlined_call_operand.hbm [shape: f32[2,32], index: 1, kind: input, shape index: {}]   ;;  %s4800_s2 = inlined_call_operand.hbm [shape: f32[4,48], index: 2, kind: input, shape index: {}]   ;;  %s4801_s3 = inlined_call_operand.vmem [shape: f32[16,48], index: 3, kind: input, shape index: {}]   ;;  %s4802_s4 = inlined_call_operand.vmem [shape: f32[1,48], index: 4, kind: input, shape index: {}]   ;;  %s4803_s5 = inlined_call_operand.hbm [shape: f32[1,16], index: 5, kind: input, shape index: {}]   ;;  %s4804_s6 = inlined_call_operand.hbm [shape: f32[4,48], index: 6, kind: input, shape index: {}]   ;;  %s4805_s7 = inlined_call_operand.vmem [shape: f32[16,48], index: 7, kind: input, shape index: {}]   ;;  %s4806_s8 = inlined_call_operand.hbm [shape: f32[1,48], index: 8, kind: input, shape index: {}]   ;;  %s4807_s9 = inlined_call_operand.hbm [shape: f32[1,16], index: 9, kind: input, shape index: {}]   ;;  %s4808_s10 = inlined_call_operand.vmem [shape: f32[16,64], index: 10, kind: input, shape index: {}]   ;;  %s4809_s11 = inlined_call_operand.vmem [shape: f32[16,64], index: 11, kind: input, shape index: {}]   ;;  %s4810_s12 = inlined_call_operand.hbm [shape: f32[1,64], index: 12, kind: input, shape index: {}]   ;;  %s4811_s13 = inlined_call_operand.vmem [shape: f32[32,96], index: 13, kind: input, shape index: {}]   ;;  %s4812_s14 = inlined_call_operand.vmem [shape: f32[1,96], index: 14, kind: input, shape index: {}]   ;;  %s4813_s15 = inlined_call_operand.vmem [shape: f32[1,32], index: 15, kind: input, shape index: {}]   ;;  %s4814_s16 = inlined_call_operand.vmem [shape: f32[32,4], index: 16, kind: input, shape index: {}]   ;;  %s4815_s17 = inlined_call_operand.vmem [shape: f32[1,4], index: 17, kind: input, shape index: {}]   ;;  %s4816_s18 = inlined_call_operand.vmem [shape: f32[16,4], index: 18, kind: output, shape index: {0}]   ;;  %s4817_s19 = inlined_call_operand.hbm [shape: f32[16,32], index: 19, kind: output, shape index: {1}]   ;;  %s4818_s20 = inlined_call_operand.hbm [shape: f32[2,32], index: 20, kind: output, shape index: {2}]   ;;  %s4819_s21 = inlined_call_operand.hbm [shape: f32[1,1], index: 21, kind: output, shape index: {3}]  }
   0x1   :  { %4825 = sst [smem:[#allocation26_spill]] %s4798_s0 }
   0x2   :  { %4826 = sst [smem:[#allocation27_spill]] %s4799_s1 }
   0x3   :  { %4827 = sst [smem:[#allocation28_spill]] %s4800_s2 }
   0x4   :  { %4828 = sst [smem:[#allocation29_spill]] %s4801_s3 }
   0x5   :  { %4829 = sst [smem:[#allocation30_spill]] %s4802_s4 }
   0x6   :  { %4830 = sst [smem:[#allocation31_spill]] %s4803_s5 }
   0x7   :  { %27 = vsyncpa [#allocation5], 0 }
   0x8   :  { %28 = vsyncpa [#allocation8], 0 }
   0x9   :  { %29 = vsyncpa [#allocation11], 0 }
   0xa   :  { %30 = vsyncpa [#allocation14], 0 }
   0xb   :  { %31 = vsyncpa [#allocation6], 0 }
   0xc   :  { %32 = vsyncpa [#allocation18], 0  ;;  %s4131_s2 = smov [#allocation7]   ;;  %s4132_s26 = smov [#allocation10]  }
   0xd   :  { %s51_s25 = sshll.u32 %s4131_s2, 4  ;;  %s75_s27 = sshll.u32 %s4132_s26, 4  ;;  %s52_s25 = int_to_ptr.vmem [resolvable:$true] %s51_s25  ;;  %s76_s27 = int_to_ptr.vmem [resolvable:$true] %s75_s27 }
   0xe   :  { %s4831_s29 = sld [smem:[#allocation28_spill]] }
  0x14   :  { %s3899_s0 = scalar_lea.hbm %s4831_s29, 64 }
  0x15   :  { %p3900_p0 = scmp.ne.s32.totalorder %s4831_s29, %s3899_s0  ;;  %p3903_p1 = scmp.lt.u32.totalorder %s3899_s0, %s4831_s29 }
  0x17   :  { %p3905_p2 = pnand %p3903_p1, %p3900_p0 }
  0x19   :  { %3908 = shalt.err (!%p3905_p2)
}
  0x1a   :  { %s3909_s23 = scalar_lea.vmem %s52_s25, 64  ;;  %p3914_p4 = scmp.lt.s32.totalorder %s52_s25, %s52_s25 }
  0x1b   :  { %p3910_p3 = scmp.ne.s32.totalorder %s52_s25, %s3909_s23  ;;  %p3915_p5 = scmp.lt.s32.totalorder %s3909_s23, %s3909_s23 }
  0x1d   :  { %p3916_p6 = por %p3915_p5, %p3914_p4 }
  0x1f   :  { %p3917_p7 = pnand %p3916_p6, %p3910_p3 }
  0x21   :  { %3920 = shalt.err (!%p3917_p7)
}
  0x22   :  { %54 = dma.hbm_to_vmem [thread:$0]  %s4831_s29, 64, %s52_s25, [#allocation8]  }
  0x23   :  { %s3921_s3 = scalar_lea.hbm %s4804_s6, 64 }
  0x24   :  { %p3922_p8 = scmp.ne.s32.totalorder %s4804_s6, %s3921_s3  ;;  %p3925_p9 = scmp.lt.u32.totalorder %s3921_s3, %s4804_s6 }
  0x26   :  { %p3927_p10 = pnand %p3925_p9, %p3922_p8 }
  0x28   :  { %3930 = shalt.err (!%p3927_p10)
}
  0x29   :  { %s3931_s5 = scalar_lea.vmem %s76_s27, 64  ;;  %p3936_p12 = scmp.lt.s32.totalorder %s76_s27, %s76_s27 }
  0x2a   :  { %p3932_p11 = scmp.ne.s32.totalorder %s76_s27, %s3931_s5  ;;  %p3937_p13 = scmp.lt.s32.totalorder %s3931_s5, %s3931_s5 }
  0x2c   :  { %p3938_p0 = por %p3937_p13, %p3936_p12 }
  0x2e   :  { %p3939_p1 = pnand %p3938_p0, %p3932_p11 }
  0x30   :  { %3942 = shalt.err (!%p3939_p1)
}
  0x31   :  { %78 = dma.hbm_to_vmem [thread:$0]  %s4804_s6, 64, %s76_s27, [#allocation11]  }
  0x32   :  { %s4133_s22 = smov [#allocation13]   ;;  %s4134_s1 = smov [#allocation4]  }
  0x33   :  { %s97_s23 = sshll.u32 %s4133_s22, 4  ;;  %s41_s24 = sshll.u32 %s4134_s1, 4  ;;  %s98_s23 = int_to_ptr.vmem [resolvable:$true] %s97_s23  ;;  %s42_s24 = int_to_ptr.vmem [resolvable:$true] %s41_s24 }
  0x34   :  { %s3943_s3 = scalar_lea.hbm %s4807_s9, 16 }
  0x35   :  { %p3944_p2 = scmp.ne.s32.totalorder %s4807_s9, %s3943_s3  ;;  %p3947_p3 = scmp.lt.u32.totalorder %s3943_s3, %s4807_s9 }
  0x37   :  { %p3949_p4 = pnand %p3947_p3, %p3944_p2 }
  0x39   :  { %3952 = shalt.err (!%p3949_p4)
}
  0x3a   :  { %s3953_s6 = scalar_lea.vmem %s98_s23, 16  ;;  %s3957_s27 = scalar_lea.vmem %s98_s23, 32 }
  0x3b   :  { %p3954_p5 = scmp.ne.s32.totalorder %s98_s23, %s3953_s6  ;;  %p3958_p6 = scmp.lt.s32.totalorder %s98_s23, %s98_s23 }
  0x3c   :  { %p3959_p7 = scmp.lt.s32.totalorder %s3957_s27, %s3953_s6 }
  0x3e   :  { %p3960_p8 = por %p3959_p7, %p3958_p6 }
  0x40   :  { %p3961_p9 = pnand %p3960_p8, %p3954_p5 }
  0x42   :  { %3964 = shalt.err (!%p3961_p9)
}
  0x43   :  { %100 = dma.hbm_to_vmem [thread:$0]  %s4807_s9, 16, %s98_s23, [#allocation14]  }
  0x44   :  { %s4832_s1 = sld [smem:[#allocation27_spill]] }
  0x4a   :  { %s3965_s2 = scalar_lea.hbm %s4832_s1, 32 }
  0x4b   :  { %p3966_p10 = scmp.ne.s32.totalorder %s4832_s1, %s3965_s2  ;;  %p3969_p11 = scmp.lt.u32.totalorder %s3965_s2, %s4832_s1 }
  0x4d   :  { %p3971_p12 = pnand %p3969_p11, %p3966_p10 }
  0x4f   :  { %3974 = shalt.err (!%p3971_p12)
}
  0x50   :  { %s3975_s0 = scalar_lea.vmem %s42_s24, 32  ;;  %p3980_p0 = scmp.lt.s32.totalorder %s42_s24, %s42_s24 }
  0x51   :  { %p3976_p13 = scmp.ne.s32.totalorder %s42_s24, %s3975_s0  ;;  %p3981_p1 = scmp.lt.s32.totalorder %s3975_s0, %s3975_s0 }
  0x53   :  { %p3982_p2 = por %p3981_p1, %p3980_p0 }
  0x55   :  { %p3983_p3 = pnand %p3982_p2, %p3976_p13 }
  0x57   :  { %3986 = shalt.err (!%p3983_p3)
}
  0x58   :  { %44 = dma.hbm_to_vmem [thread:$0]  %s4832_s1, 32, %s42_s24, [#allocation5]  }
  0x59   :  { %s4135_s30 = smov [#allocation9]   ;;  %s4136_s27 = smov [#allocation12]  }
  0x5a   :  { %s65_s6 = sshll.u32 %s4135_s30, 4  ;;  %s87_s5 = sshll.u32 %s4136_s27, 4  ;;  %s66_s6 = int_to_ptr.vmem [resolvable:$true] %s65_s6  ;;  %s88_s5 = int_to_ptr.vmem [resolvable:$true] %s87_s5 }
  0x5b   :  { %s4833_s22 = sld [smem:[#allocation31_spill]] }
  0x61   :  { %s3987_s2 = scalar_lea.hbm %s4833_s22, 16 }
  0x62   :  { %p3988_p4 = scmp.ne.s32.totalorder %s4833_s22, %s3987_s2  ;;  %p3991_p5 = scmp.lt.u32.totalorder %s3987_s2, %s4833_s22 }
  0x64   :  { %p3993_p6 = pnand %p3991_p5, %p3988_p4 }
  0x66   :  { %3996 = shalt.err (!%p3993_p6)
}
  0x67   :  { %s3997_s24 = scalar_lea.vmem %s66_s6, 16  ;;  %s4001_s1 = scalar_lea.vmem %s66_s6, 32 }
  0x68   :  { %p3998_p7 = scmp.ne.s32.totalorder %s66_s6, %s3997_s24  ;;  %p4002_p8 = scmp.lt.s32.totalorder %s66_s6, %s66_s6 }
  0x69   :  { %p4003_p9 = scmp.lt.s32.totalorder %s4001_s1, %s3997_s24 }
  0x6b   :  { %p4004_p10 = por %p4003_p9, %p4002_p8 }
  0x6d   :  { %p4005_p11 = pnand %p4004_p10, %p3998_p7 }
  0x6f   :  { %4008 = shalt.err (!%p4005_p11)
}
  0x70   :  { %68 = dma.hbm_to_vmem [thread:$0]  %s4833_s22, 16, %s66_s6, [#allocation8]  }
  0x71   :  { %s4009_s27 = scalar_lea.hbm %s4806_s8, 16 }
  0x72   :  { %p4010_p12 = scmp.ne.s32.totalorder %s4806_s8, %s4009_s27  ;;  %p4013_p13 = scmp.lt.u32.totalorder %s4009_s27, %s4806_s8 }
  0x74   :  { %p4015_p0 = pnand %p4013_p13, %p4010_p12 }
  0x76   :  { %4018 = shalt.err (!%p4015_p0)
}
  0x77   :  { %s4019_s3 = scalar_lea.vmem %s88_s5, 16  ;;  %s4023_s28 = scalar_lea.vmem %s88_s5, 32 }
  0x78   :  { %p4020_p1 = scmp.ne.s32.totalorder %s88_s5, %s4019_s3  ;;  %p4024_p2 = scmp.lt.s32.totalorder %s88_s5, %s88_s5 }
  0x79   :  { %p4025_p3 = scmp.lt.s32.totalorder %s4023_s28, %s4019_s3 }
  0x7b   :  { %p4026_p4 = por %p4025_p3, %p4024_p2 }
  0x7d   :  { %p4027_p5 = pnand %p4026_p4, %p4020_p1 }
  0x7f   :  { %4030 = shalt.err (!%p4027_p5)
}
  0x80   :  { %90 = dma.hbm_to_vmem [thread:$0]  %s4806_s8, 16, %s88_s5, [#allocation11]  }
  0x81   :  { %s4137_s4 = smov [#allocation15]   ;;  %s4031_s9 = scalar_lea.hbm %s4810_s12, 16 }
  0x82   :  { %s111_s24 = sshll.u32 %s4137_s4, 4  ;;  %p4032_p6 = scmp.ne.s32.totalorder %s4810_s12, %s4031_s9  ;;  %s112_s24 = int_to_ptr.vmem [resolvable:$true] %s111_s24 }
  0x83   :  { %p4035_p7 = scmp.lt.u32.totalorder %s4031_s9, %s4810_s12 }
  0x85   :  { %p4037_p8 = pnand %p4035_p7, %p4032_p6 }
  0x87   :  { %4040 = shalt.err (!%p4037_p8)
}
  0x88   :  { %s4041_s29 = scalar_lea.vmem %s112_s24, 16  ;;  %s4045_s8 = scalar_lea.vmem %s112_s24, 32 }
  0x89   :  { %p4042_p9 = scmp.ne.s32.totalorder %s112_s24, %s4041_s29  ;;  %p4046_p10 = scmp.lt.s32.totalorder %s112_s24, %s112_s24 }
  0x8a   :  { %p4047_p11 = scmp.lt.s32.totalorder %s4045_s8, %s4041_s29 }
  0x8c   :  { %p4048_p12 = por %p4047_p11, %p4046_p10 }
  0x8e   :  { %p4049_p13 = pnand %p4048_p12, %p4042_p9 }
  0x90   :  { %4052 = shalt.err (!%p4049_p13)
}
  0x91   :  { %114 = dma.hbm_to_vmem [thread:$0]  %s4810_s12, 16, %s112_s24, [#allocation14]  }
  0x92   :  { %4119 = dma.done.wait [#allocation5], 32  }
  0x93   :  { %4120 = vsyncadd [#allocation5], 4294967264 }
  0x94   :  { %4121 = dma.done.wait [#allocation8], 80  }
  0x95   :  { %4122 = vsyncadd [#allocation8], 4294967216 }
  0x96   :  { %4123 = dma.done.wait [#allocation11], 80  }
  0x97   :  { %4124 = vsyncadd [#allocation11], 4294967216 }
  0x98   :  { %4125 = dma.done.wait [#allocation14], 32  }
  0x99   :  { %4126 = vsyncadd [#allocation14], 4294967264  ;;  %vm163_vm0 = vcmask 1043456   ;;  %vm156_vm1 = vcmask 31744   ;;  %v148_v0 = vld [vmem:[#allocation7] sm:$0xf] }
  0x9a   :  { %v245_v1 = vld [vmem:[#allocation10] sm:$0xf]  ;;  %s4834_s28 = sld [smem:[#allocation26_spill]]  ;;  %3385 = vmatprep.subr.msk.mxu0 %vm163_vm0, %v148_v0  ;;  %s4835_s24 = sld [smem:[#allocation29_spill]]  ;;  %v335_v7 = vld [vmem:[%s4805_s7] sm:$0xff]  ;;  %v4138_v10 = vmov 0.0|0.0  }
  0x9b   :  { %3390 = vmatprep.subr.msk.mxu1 %vm163_vm0, %v245_v1  ;;  %3386 = vmatpush3.msk.msra.mxu0 %vm163_vm0, %v148_v0  ;;  %v336_v8 = vld [vmem:[%s4805_s7 + $0x8] sm:$0xff]  ;;  %v3224_v9 = vld [vmem:[#allocation9] ss:$0 sm:$0xff]  ;;  %vm4139_vm2 = vmmov 0   ;;  %v4140_v11 = vmov 0.0   ;;  %s4141_s25 = smov 32  }
  0x9c   :  { %3391 = vmatpush3.msk.msra.mxu1 %vm163_vm0, %v245_v1  ;;  %v4372_v12 = vpack.c.bf16 %v336_v8, %v335_v7  ;;  %427 = vrot.lane.b32.xlu0 %v3224_v9, %s4141_s25  ;;  %v3226_v13 = vld [vmem:[#allocation13] ss:$0 sm:$0xff]  ;;  %v3219_v14 = vld [vmem:[#allocation12] ss:$0 sm:$0xff]  ;;  %s4836_s8 = sld [smem:[#allocation30_spill]]  ;;  %vm242_vm3 = vcmask 392192  }
  0x9d   :  { %3620 = vmatprep.subr.bf16.mxu1 %v4138_v10  ;;  %3626 = vmatprep.subr.bf16.mxu0 %v4138_v10  ;;  %s4142_s5 = smov 96   ;;  %s4143_s2 = smov 112   ;;  %vm341_vm4 = vcmask 130048   ;;  %vm2221_vm5 = vcmask 261120   ;;  %vm2180_vm6 = vcmask 254976  }
  0x9e   :  { %s4144_s29 = smov 64   ;;  %s4146_s4 = smov [#allocation16]  }
  0xa0   :  { %v146_v2 = vld [vmem:[%s4834_s28] sm:$0xff]  ;;  %v147_v3 = vld [vmem:[%s4834_s28 + $0x8] sm:$0xff]  ;;  %532 = vrot.lane.b32.xlu0 %v3226_v13, %s4141_s25 }
  0xa1   :  { %v333_v4 = vld [vmem:[%s4835_s24] sm:$0xff]  ;;  %v334_v5 = vld [vmem:[%s4835_s24 + $0x8] sm:$0xff]  ;;  %3387 = vmatprep.mubr.msk.f32.mxu0 %vm156_vm1, %v146_v2  ;;  %3392 = vmatprep.mubr.msk.f32.mxu1 %vm156_vm1, %v146_v2  ;;  %s3171_s24 = sshll.u32 %s4146_s4, 4  ;;  %s4744_s24 = int_to_ptr.vmem [resolvable:$true] %s3171_s24 }
  0xa2   :  { %v4357_v6 = vpack.c.bf16 %v334_v5, %v333_v4  ;;  %3388 = vmatmul.mubr.msk.f32.vlgmr.msra.gmra.mrb[0].mxu0 %vm156_vm1, %v147_v3  ;;  %3393 = vmatmul.mubr.msk.f32.vlgmr.msra.gmra.mrb[0].mxu1 %vm156_vm1, %v147_v3  ;;  %v3215_v15 = vld [vmem:[%s4836_s8] ss:$0 sm:$0xff] }
  0xa3   :  { %3399 = vmatprep.mubr.msk.f32.mxu1 %vm4139_vm2, %v4140_v11  ;;  %3413 = vmatprep.mubr.msk.f32.mxu0 %vm4139_vm2, %v4140_v11 }
  0xa4   :  { %3622 = vmatpush3.bf16.msra.mxu1 %v4357_v6  ;;  %3628 = vmatpush3.bf16.msra.mxu0 %v4357_v6 }
  0xa5   :  { %3623 = vmatprep.subr.bf16.mxu1 %v4138_v10  ;;  %3632 = vmatprep.subr.bf16.mxu0 %v4138_v10 }
  0xa7   :  { %3400 = vmatmul.mubr.f32.vlgmr.msra.gmra.mrb[2].mxu1 %v4140_v11 }
  0xa8   :  { %3625 = vmatpush3.bf16.msra.mxu1 %v4372_v12  ;;  %3406 = vmatprep.mubr.msk.f32.mxu1 %vm4139_vm2, %v4140_v11 }
  0xa9   :  { %3629 = vmatprep.subr.bf16.mxu1 %v4138_v10 }
  0xab   :  { %3407 = vmatmul.mubr.f32.vlgmr.msra.gmra.mrb[4].mxu1 %v4140_v11 }
  0xac   :  { %3631 = vmatpush3.bf16.msra.mxu1 %v4372_v12  ;;  %3420 = vmatprep.mubr.msk.f32.mxu1 %vm4139_vm2, %v4140_v11 }
  0xad   :  { %3635 = vmatprep.subr.bf16.mxu1 %v4138_v10 }
 0x10e   :  { %v4395_v16 = vpop.permute.xlu0 %427 }
 0x112   :  { %v4398_v28 = vpop.permute.xlu0 %532 }
 0x175   :  { %v3389_v17 = vpop.f32.mrb[0].mxu0  ;;  %v3394_v18 = vpop.f32.mrb[0].mxu1 }
 0x176   :  { %v239_v19 = vadd.f32 %v3389_v17, %v3215_v15  ;;  %v328_v20 = vadd.f32 %v3394_v18, %v3219_v14  ;;  %v233_v21 = vpop.f32.mrb[1].mxu0  ;;  %v322_v22 = vpop.f32.mrb[1].mxu1 }
 0x177   :  { %v234_v23 = vadd.f32 %v3215_v15, %v233_v21  ;;  %v323_v24 = vadd.f32 %v3219_v14, %v322_v22 }
 0x178   :  { %244 = vst.msk [vmem:[#allocation2 + $0x8] sm:$0xff] %vm242_vm3, %v239_v19  ;;  %332 = vst.msk [vmem:[#allocation3 + $0x8] sm:$0xff] %vm242_vm3, %v328_v20 }
 0x179   :  { %243 = vst.msk [vmem:[#allocation2] sm:$0xff] %vm242_vm3, %v234_v23  ;;  %331 = vst.msk [vmem:[#allocation3] sm:$0xff] %vm242_vm3, %v323_v24 }
 0x17a   :  { %v411_v25 = vpop.f32.mrb[2].mxu1 }
 0x17b   :  { %v3401_v26 = vpop.f32.mrb[3].mxu1  ;;  %v430_v27 = vadd.f32 %v4395_v16, %v411_v25 }
 0x17d   :  { %432 = vrot.lane.b32.xlu1 %v430_v27, %s4142_s5 }
 0x17e   :  { %v516_v29 = vpop.f32.mrb[4].mxu1 }
 0x17f   :  { %v535_v30 = vadd.f32 %v4398_v28, %v516_v29  ;;  %v3408_v31 = vpop.f32.mrb[5].mxu1  ;;  %v340_v34 = vld [vmem:[#allocation3 + $0xe] sm:$0x3]  ;;  %v556_v14 = vld [vmem:[#allocation3 + $0xc] sm:$0x3] }
 0x180   :  { %v339_v32 = vld [vmem:[#allocation2] sm:$0x3]  ;;  %v520_v36 = vadd.f32 %v516_v29, %v340_v34  ;;  %v555_v9 = vld [vmem:[#allocation2 + $0x2] sm:$0x3] }
 0x181   :  { %537 = vrot.lane.b32.xlu1 %v535_v30, %s4142_s5  ;;  %v415_v33 = vadd.f32 %v411_v25, %v339_v32 }
 0x182   :  { %v3225_v37 = vmul.f32 -1.442695, %v520_v36 }
 0x183   :  { %v3223_v35 = vmul.f32 -1.442695, %v415_v33 }
 0x185   :  { %3751 = vpow2.f32 %v3223_v35 }
 0x186   :  { %3753 = vpow2.f32 %v3225_v37 }
 0x18f   :  { %v3752_v38 = vpop.eup %3751 }
 0x190   :  { %v419_v39 = vadd.f32 1.0, %v3752_v38  ;;  %v3754_v40 = vpop.eup %3753 }
 0x191   :  { %v524_v41 = vadd.f32 1.0, %v3754_v40 }
 0x192   :  { %3755 = vrcp.f32 %v419_v39 }
 0x193   :  { %3757 = vrcp.f32 %v524_v41 }
 0x19c   :  { %v3756_v42 = vpop.eup %3755 }
 0x19d   :  { %v3758_v45 = vpop.eup %3757  ;;  %v442_v54 = vsub.f32 1.0, %v3756_v42  ;;  %v448_v56 = vmul.f32 0.0, %v3756_v42 }
 0x19e   :  { %v547_v59 = vsub.f32 1.0, %v3758_v45  ;;  %v553_v61 = vmul.f32 0.0, %v3758_v45 }
 0x1ef   :  { %v433_v43 = vpop.permute.xlu1 %432 }
 0x1f0   :  { %v435_v44 = vmul.f32 %v3756_v42, %v433_v43 }
 0x1f2   :  { %437 = vrot.lane.b32.xlu0 %v435_v44, %s4141_s25 }
 0x1f3   :  { %v538_v46 = vpop.permute.xlu1 %537 }
 0x1f4   :  { %v540_v47 = vmul.f32 %v3758_v45, %v538_v46 }
 0x1f6   :  { %542 = vrot.lane.b32.xlu1 %v540_v47, %s4141_s25 }
 0x264   :  { %v438_v48 = vpop.permute.xlu0 %437 }
 0x265   :  { %v440_v49 = vadd.f32 %v438_v48, %v339_v32 }
 0x267   :  { %3759 = vtanh.f32 %v440_v49 }
 0x268   :  { %v543_v50 = vpop.permute.xlu1 %542 }
 0x269   :  { %v545_v51 = vadd.f32 %v543_v50, %v340_v34 }
 0x26b   :  { %3761 = vtanh.f32 %v545_v51 }
 0x271   :  { %v3760_v52 = vpop.eup %3759 }
 0x272   :  { %444 = vrot.lane.b32.xlu0 %v3760_v52, %s4143_s2 }
 0x275   :  { %v3762_v53 = vpop.eup %3761 }
 0x276   :  { %549 = vrot.lane.b32.xlu1 %v3762_v53, %s4143_s2 }
 0x2e4   :  { %v445_v55 = vpop.permute.xlu0 %444 }
 0x2e5   :  { %v447_v57 = vmul.f32 %v445_v55, %v442_v54  ;;  %v761_v54 = vld [vmem:[#allocation2 + $0x4] sm:$0x3] }
 0x2e7   :  { %v449_v58 = vadd.f32 %v448_v56, %v447_v57  ;;  %v762_v56 = vld [vmem:[#allocation3 + $0xa] sm:$0x3] }
 0x2e8   :  { %v550_v60 = vpop.permute.xlu1 %549 }
 0x2e9   :  { %v552_v62 = vmul.f32 %v550_v60, %v547_v59  ;;  %558 = vrot.lane.b32.xlu0 %v449_v58, %s4143_s2 }
 0x2eb   :  { %v554_v63 = vadd.f32 %v553_v61, %v552_v62 }
 0x2ed   :  { %660 = vrot.lane.b32.xlu1 %v554_v63, %s4143_s2 }
 0x35b   :  { %v559_v0 = vpop.permute.xlu0 %558 }
 0x35c   :  { %3414 = vmatmul.mubr.msk.f32.vlgmr.msra.gmra.mrb[2].mxu0 %vm341_vm4, %v559_v0 }
 0x35d   :  { %3634 = vmatpush3.bf16.msra.mxu0 %v4357_v6  ;;  %3427 = vmatprep.mubr.msk.f32.mxu0 %vm4139_vm2, %v4140_v11 }
 0x35e   :  { %3638 = vmatprep.subr.bf16.mxu0 %v4138_v10 }
 0x35f   :  { %v661_v1 = vpop.permute.xlu1 %660 }
 0x360   :  { %3421 = vmatmul.mubr.msk.f32.vlgmr.msra.gmra.mrb[6].mxu1 %vm341_vm4, %v661_v1 }
 0x361   :  { %3637 = vmatpush3.bf16.msra.mxu1 %v4372_v12  ;;  %3434 = vmatprep.mubr.msk.f32.mxu1 %vm4139_vm2, %v4140_v11 }
 0x362   :  { %3641 = vmatprep.subr.bf16.mxu1 %v4138_v10 }
 0x42f   :  { %v628_v2 = vpop.f32.mrb[2].mxu0 }
 0x430   :  { %v639_v3 = vadd.f32 %v628_v2, %v4395_v16  ;;  %v3415_v4 = vpop.f32.mrb[3].mxu0  ;;  %v632_v13 = vadd.f32 %v628_v2, %v555_v9 }
 0x432   :  { %641 = vrot.lane.b32.xlu0 %v639_v3, %s4142_s5  ;;  %v3228_v15 = vmul.f32 -1.442695, %v632_v13 }
 0x433   :  { %v730_v5 = vpop.f32.mrb[6].mxu1 }
 0x434   :  { %v741_v7 = vadd.f32 %v730_v5, %v4398_v28  ;;  %v3422_v8 = vpop.f32.mrb[7].mxu1  ;;  %v734_v17 = vadd.f32 %v730_v5, %v556_v14  ;;  %3763 = vpow2.f32 %v3228_v15 }
 0x436   :  { %743 = vrot.lane.b32.xlu1 %v741_v7, %s4142_s5  ;;  %v3230_v18 = vmul.f32 -1.442695, %v734_v17 }
 0x438   :  { %3765 = vpow2.f32 %v3230_v18 }
 0x43e   :  { %v3764_v19 = vpop.eup %3763 }
 0x43f   :  { %v636_v20 = vadd.f32 1.0, %v3764_v19 }
 0x441   :  { %3767 = vrcp.f32 %v636_v20 }
 0x442   :  { %v3766_v21 = vpop.eup %3765 }
 0x443   :  { %v738_v22 = vadd.f32 1.0, %v3766_v21 }
 0x445   :  { %3769 = vrcp.f32 %v738_v22 }
 0x44b   :  { %v3768_v23 = vpop.eup %3767 }
 0x44c   :  { %v651_v36 = vsub.f32 1.0, %v3768_v23  ;;  %v657_v38 = vmul.f32 %v3768_v23, %v449_v58 }
 0x44f   :  { %v3770_v26 = vpop.eup %3769 }
 0x450   :  { %v753_v41 = vsub.f32 1.0, %v3770_v26  ;;  %v759_v43 = vmul.f32 %v3770_v26, %v554_v63 }
 0x4a4   :  { %v642_v24 = vpop.permute.xlu0 %641 }
 0x4a5   :  { %v644_v25 = vmul.f32 %v3768_v23, %v642_v24 }
 0x4a7   :  { %646 = vrot.lane.b32.xlu0 %v644_v25, %s4141_s25 }
 0x4a8   :  { %v744_v27 = vpop.permute.xlu1 %743 }
 0x4a9   :  { %v746_v29 = vmul.f32 %v3770_v26, %v744_v27 }
 0x4ab   :  { %748 = vrot.lane.b32.xlu1 %v746_v29, %s4141_s25 }
 0x519   :  { %v647_v30 = vpop.permute.xlu0 %646 }
 0x51a   :  { %v649_v31 = vadd.f32 %v647_v30, %v555_v9 }
 0x51c   :  { %3771 = vtanh.f32 %v649_v31 }
 0x51d   :  { %v749_v32 = vpop.permute.xlu1 %748 }
 0x51e   :  { %v751_v33 = vadd.f32 %v749_v32, %v556_v14 }
 0x520   :  { %3773 = vtanh.f32 %v751_v33 }
 0x526   :  { %v3772_v34 = vpop.eup %3771 }
 0x527   :  { %653 = vrot.lane.b32.xlu0 %v3772_v34, %s4143_s2 }
 0x52a   :  { %v3774_v35 = vpop.eup %3773 }
 0x52b   :  { %755 = vrot.lane.b32.xlu1 %v3774_v35, %s4143_s2 }
 0x599   :  { %v654_v37 = vpop.permute.xlu0 %653 }
 0x59a   :  { %v656_v39 = vmul.f32 %v654_v37, %v651_v36  ;;  %v967_v36 = vld [vmem:[#allocation2 + $0x6] sm:$0x3] }
 0x59c   :  { %v658_v40 = vadd.f32 %v657_v38, %v656_v39  ;;  %v968_v38 = vld [vmem:[#allocation3 + $0x8] sm:$0x3] }
 0x59d   :  { %v756_v42 = vpop.permute.xlu1 %755 }
 0x59e   :  { %v758_v44 = vmul.f32 %v756_v42, %v753_v41  ;;  %764 = vrot.lane.b32.xlu0 %v658_v40, %s4143_s2 }
 0x5a0   :  { %v760_v45 = vadd.f32 %v759_v43, %v758_v44 }
 0x5a2   :  { %866 = vrot.lane.b32.xlu1 %v760_v45, %s4143_s2 }
 0x610   :  { %v765_v46 = vpop.permute.xlu0 %764 }
 0x611   :  { %3428 = vmatmul.mubr.msk.f32.vlgmr.msra.gmra.mrb[4].mxu0 %vm341_vm4, %v765_v46 }
 0x612   :  { %3640 = vmatpush3.bf16.msra.mxu0 %v4357_v6  ;;  %3441 = vmatprep.mubr.msk.f32.mxu0 %vm4139_vm2, %v4140_v11 }
 0x613   :  { %3644 = vmatprep.subr.bf16.mxu0 %v4138_v10 }
 0x614   :  { %v867_v47 = vpop.permute.xlu1 %866 }
 0x615   :  { %3435 = vmatmul.mubr.msk.f32.vlgmr.msra.gmra.mrb[8].mxu1 %vm341_vm4, %v867_v47 }
 0x616   :  { %3643 = vmatpush3.bf16.msra.mxu1 %v4372_v12  ;;  %3448 = vmatprep.mubr.msk.f32.mxu1 %vm4139_vm2, %v4140_v11 }
 0x617   :  { %3647 = vmatprep.subr.bf16.mxu1 %v4138_v10 }
 0x6e4   :  { %v834_v48 = vpop.f32.mrb[4].mxu0 }
 0x6e5   :  { %v845_v49 = vadd.f32 %v834_v48, %v4395_v16  ;;  %v3429_v50 = vpop.f32.mrb[5].mxu0  ;;  %v838_v55 = vadd.f32 %v834_v48, %v761_v54 }
 0x6e7   :  { %847 = vrot.lane.b32.xlu0 %v845_v49, %s4142_s5  ;;  %v3232_v57 = vmul.f32 -1.442695, %v838_v55 }
 0x6e8   :  { %v936_v51 = vpop.f32.mrb[8].mxu1 }
 0x6e9   :  { %v947_v52 = vadd.f32 %v936_v51, %v4398_v28  ;;  %v3436_v53 = vpop.f32.mrb[9].mxu1  ;;  %v940_v58 = vadd.f32 %v936_v51, %v762_v56  ;;  %3775 = vpow2.f32 %v3232_v57 }
 0x6eb   :  { %949 = vrot.lane.b32.xlu1 %v947_v52, %s4142_s5  ;;  %v3234_v59 = vmul.f32 -1.442695, %v940_v58 }
 0x6ed   :  { %3777 = vpow2.f32 %v3234_v59 }
 0x6f3   :  { %v3776_v60 = vpop.eup %3775 }
 0x6f4   :  { %v842_v61 = vadd.f32 1.0, %v3776_v60 }
 0x6f6   :  { %3779 = vrcp.f32 %v842_v61 }
 0x6f7   :  { %v3778_v62 = vpop.eup %3777 }
 0x6f8   :  { %v944_v63 = vadd.f32 1.0, %v3778_v62 }
 0x6fa   :  { %3781 = vrcp.f32 %v944_v63 }
 0x700   :  { %v3780_v0 = vpop.eup %3779 }
 0x701   :  { %v857_v17 = vsub.f32 1.0, %v3780_v0  ;;  %v863_v19 = vmul.f32 %v3780_v0, %v658_v40 }
 0x704   :  { %v3782_v3 = vpop.eup %3781 }
 0x705   :  { %v959_v22 = vsub.f32 1.0, %v3782_v3  ;;  %v965_v24 = vmul.f32 %v3782_v3, %v760_v45 }
 0x759   :  { %v848_v1 = vpop.permute.xlu0 %847 }
 0x75a   :  { %v850_v2 = vmul.f32 %v3780_v0, %v848_v1 }
 0x75c   :  { %852 = vrot.lane.b32.xlu0 %v850_v2, %s4141_s25 }
 0x75d   :  { %v950_v4 = vpop.permute.xlu1 %949 }
 0x75e   :  { %v952_v5 = vmul.f32 %v3782_v3, %v950_v4 }
 0x760   :  { %954 = vrot.lane.b32.xlu1 %v952_v5, %s4141_s25 }
 0x7ce   :  { %v853_v7 = vpop.permute.xlu0 %852 }
 0x7cf   :  { %v855_v8 = vadd.f32 %v853_v7, %v761_v54 }
 0x7d1   :  { %3783 = vtanh.f32 %v855_v8 }
 0x7d2   :  { %v955_v9 = vpop.permute.xlu1 %954 }
 0x7d3   :  { %v957_v13 = vadd.f32 %v955_v9, %v762_v56 }
 0x7d5   :  { %3785 = vtanh.f32 %v957_v13 }
 0x7db   :  { %v3784_v14 = vpop.eup %3783 }
 0x7dc   :  { %859 = vrot.lane.b32.xlu0 %v3784_v14, %s4143_s2 }
 0x7df   :  { %v3786_v15 = vpop.eup %3785 }
 0x7e0   :  { %961 = vrot.lane.b32.xlu1 %v3786_v15, %s4143_s2 }
 0x84e   :  { %v860_v18 = vpop.permute.xlu0 %859 }
 0x84f   :  { %v862_v20 = vmul.f32 %v860_v18, %v857_v17  ;;  %v1173_v17 = vld [vmem:[#allocation2 + $0x8] sm:$0x3] }
 0x851   :  { %v864_v21 = vadd.f32 %v863_v19, %v862_v20  ;;  %v1174_v19 = vld [vmem:[#allocation3 + $0x6] sm:$0x3] }
 0x852   :  { %v962_v23 = vpop.permute.xlu1 %961 }
 0x853   :  { %v964_v25 = vmul.f32 %v962_v23, %v959_v22  ;;  %970 = vrot.lane.b32.xlu0 %v864_v21, %s4143_s2 }
 0x855   :  { %v966_v26 = vadd.f32 %v965_v24, %v964_v25 }
 0x857   :  { %1072 = vrot.lane.b32.xlu1 %v966_v26, %s4143_s2 }
 0x8c5   :  { %v971_v27 = vpop.permute.xlu0 %970 }
 0x8c6   :  { %3442 = vmatmul.mubr.msk.f32.vlgmr.msra.gmra.mrb[6].mxu0 %vm341_vm4, %v971_v27 }
 0x8c7   :  { %3646 = vmatpush3.bf16.msra.mxu0 %v4357_v6  ;;  %3455 = vmatprep.mubr.msk.f32.mxu0 %vm4139_vm2, %v4140_v11 }
 0x8c8   :  { %3650 = vmatprep.subr.bf16.mxu0 %v4138_v10 }
 0x8c9   :  { %v1073_v29 = vpop.permute.xlu1 %1072 }
 0x8ca   :  { %3449 = vmatmul.mubr.msk.f32.vlgmr.msra.gmra.mrb[10].mxu1 %vm341_vm4, %v1073_v29 }
 0x8cb   :  { %3649 = vmatpush3.bf16.msra.mxu1 %v4372_v12  ;;  %3462 = vmatprep.mubr.msk.f32.mxu1 %vm4139_vm2, %v4140_v11 }
 0x8cc   :  { %3653 = vmatprep.subr.bf16.mxu1 %v4138_v10 }
 0x999   :  { %v1040_v30 = vpop.f32.mrb[6].mxu0 }
 0x99a   :  { %v1051_v31 = vadd.f32 %v1040_v30, %v4395_v16  ;;  %v3443_v32 = vpop.f32.mrb[7].mxu0  ;;  %v1044_v37 = vadd.f32 %v1040_v30, %v967_v36 }
 0x99c   :  { %1053 = vrot.lane.b32.xlu0 %v1051_v31, %s4142_s5  ;;  %v3236_v39 = vmul.f32 -1.442695, %v1044_v37 }
 0x99d   :  { %v1142_v33 = vpop.f32.mrb[10].mxu1 }
 0x99e   :  { %v1153_v34 = vadd.f32 %v1142_v33, %v4398_v28  ;;  %v3450_v35 = vpop.f32.mrb[11].mxu1  ;;  %v1146_v40 = vadd.f32 %v1142_v33, %v968_v38  ;;  %3787 = vpow2.f32 %v3236_v39 }
 0x9a0   :  { %1155 = vrot.lane.b32.xlu1 %v1153_v34, %s4142_s5  ;;  %v3238_v41 = vmul.f32 -1.442695, %v1146_v40 }
 0x9a2   :  { %3789 = vpow2.f32 %v3238_v41 }
 0x9a8   :  { %v3788_v42 = vpop.eup %3787 }
 0x9a9   :  { %v1048_v43 = vadd.f32 1.0, %v3788_v42 }
 0x9ab   :  { %3791 = vrcp.f32 %v1048_v43 }
 0x9ac   :  { %v3790_v44 = vpop.eup %3789 }
 0x9ad   :  { %v1150_v45 = vadd.f32 1.0, %v3790_v44 }
 0x9af   :  { %3793 = vrcp.f32 %v1150_v45 }
 0x9b5   :  { %v3792_v46 = vpop.eup %3791 }
 0x9b6   :  { %v1063_v58 = vsub.f32 1.0, %v3792_v46  ;;  %v1069_v60 = vmul.f32 %v3792_v46, %v864_v21 }
 0x9b9   :  { %v3794_v49 = vpop.eup %3793 }
 0x9ba   :  { %v1165_v63 = vsub.f32 1.0, %v3794_v49  ;;  %v1171_v1 = vmul.f32 %v3794_v49, %v966_v26 }
 0xa0e   :  { %v1054_v47 = vpop.permute.xlu0 %1053 }
 0xa0f   :  { %v1056_v48 = vmul.f32 %v3792_v46, %v1054_v47 }
 0xa11   :  { %1058 = vrot.lane.b32.xlu0 %v1056_v48, %s4141_s25 }
 0xa12   :  { %v1156_v50 = vpop.permute.xlu1 %1155 }
 0xa13   :  { %v1158_v51 = vmul.f32 %v3794_v49, %v1156_v50 }
 0xa15   :  { %1160 = vrot.lane.b32.xlu1 %v1158_v51, %s4141_s25 }
 0xa83   :  { %v1059_v52 = vpop.permute.xlu0 %1058 }
 0xa84   :  { %v1061_v53 = vadd.f32 %v1059_v52, %v967_v36 }
 0xa86   :  { %3795 = vtanh.f32 %v1061_v53 }
 0xa87   :  { %v1161_v54 = vpop.permute.xlu1 %1160 }
 0xa88   :  { %v1163_v55 = vadd.f32 %v1161_v54, %v968_v38 }
 0xa8a   :  { %3797 = vtanh.f32 %v1163_v55 }
 0xa90   :  { %v3796_v56 = vpop.eup %3795 }
 0xa91   :  { %1065 = vrot.lane.b32.xlu0 %v3796_v56, %s4143_s2 }
 0xa94   :  { %v3798_v57 = vpop.eup %3797 }
 0xa95   :  { %1167 = vrot.lane.b32.xlu1 %v3798_v57, %s4143_s2 }
 0xb03   :  { %v1066_v59 = vpop.permute.xlu0 %1065 }
 0xb04   :  { %v1068_v61 = vmul.f32 %v1066_v59, %v1063_v58  ;;  %v1379_v58 = vld [vmem:[#allocation2 + $0xa] sm:$0x3] }
 0xb06   :  { %v1070_v62 = vadd.f32 %v1069_v60, %v1068_v61  ;;  %v1380_v60 = vld [vmem:[#allocation3 + $0x4] sm:$0x3] }
 0xb07   :  { %v1168_v0 = vpop.permute.xlu1 %1167 }
 0xb08   :  { %v1170_v2 = vmul.f32 %v1168_v0, %v1165_v63  ;;  %1176 = vrot.lane.b32.xlu0 %v1070_v62, %s4143_s2 }
 0xb0a   :  { %v1172_v3 = vadd.f32 %v1171_v1, %v1170_v2 }
 0xb0c   :  { %1278 = vrot.lane.b32.xlu1 %v1172_v3, %s4143_s2 }
 0xb7a   :  { %v1177_v4 = vpop.permute.xlu0 %1176 }
 0xb7b   :  { %3456 = vmatmul.mubr.msk.f32.vlgmr.msra.gmra.mrb[8].mxu0 %vm341_vm4, %v1177_v4 }
 0xb7c   :  { %3652 = vmatpush3.bf16.msra.mxu0 %v4357_v6  ;;  %3469 = vmatprep.mubr.msk.f32.mxu0 %vm4139_vm2, %v4140_v11 }
 0xb7d   :  { %3656 = vmatprep.subr.bf16.mxu0 %v4138_v10 }
 0xb7e   :  { %v1279_v5 = vpop.permute.xlu1 %1278 }
 0xb7f   :  { %3463 = vmatmul.mubr.msk.f32.vlgmr.msra.gmra.mrb[12].mxu1 %vm341_vm4, %v1279_v5 }
 0xb80   :  { %3655 = vmatpush3.bf16.msra.mxu1 %v4372_v12  ;;  %3476 = vmatprep.mubr.msk.f32.mxu1 %vm4139_vm2, %v4140_v11 }
 0xb81   :  { %3659 = vmatprep.subr.bf16.mxu1 %v4138_v10 }
 0xc4e   :  { %v1246_v7 = vpop.f32.mrb[8].mxu0 }
 0xc4f   :  { %v1257_v8 = vadd.f32 %v1246_v7, %v4395_v16  ;;  %v3457_v9 = vpop.f32.mrb[9].mxu0  ;;  %v1250_v18 = vadd.f32 %v1246_v7, %v1173_v17 }
 0xc51   :  { %1259 = vrot.lane.b32.xlu0 %v1257_v8, %s4142_s5  ;;  %v3240_v20 = vmul.f32 -1.442695, %v1250_v18 }
 0xc52   :  { %v1348_v13 = vpop.f32.mrb[12].mxu1 }
 0xc53   :  { %v1359_v14 = vadd.f32 %v1348_v13, %v4398_v28  ;;  %v3464_v15 = vpop.f32.mrb[13].mxu1  ;;  %v1352_v21 = vadd.f32 %v1348_v13, %v1174_v19  ;;  %3799 = vpow2.f32 %v3240_v20 }
 0xc55   :  { %1361 = vrot.lane.b32.xlu1 %v1359_v14, %s4142_s5  ;;  %v3242_v22 = vmul.f32 -1.442695, %v1352_v21 }
 0xc57   :  { %3801 = vpow2.f32 %v3242_v22 }
 0xc5d   :  { %v3800_v23 = vpop.eup %3799 }
 0xc5e   :  { %v1254_v24 = vadd.f32 1.0, %v3800_v23 }
 0xc60   :  { %3803 = vrcp.f32 %v1254_v24 }
 0xc61   :  { %v3802_v25 = vpop.eup %3801 }
 0xc62   :  { %v1356_v26 = vadd.f32 1.0, %v3802_v25 }
 0xc64   :  { %3805 = vrcp.f32 %v1356_v26 }
 0xc6a   :  { %v3804_v27 = vpop.eup %3803 }
 0xc6b   :  { %v1269_v40 = vsub.f32 1.0, %v3804_v27  ;;  %v1275_v42 = vmul.f32 %v3804_v27, %v1070_v62 }
 0xc6e   :  { %v3806_v31 = vpop.eup %3805 }
 0xc6f   :  { %v1371_v45 = vsub.f32 1.0, %v3806_v31  ;;  %v1377_v47 = vmul.f32 %v3806_v31, %v1172_v3 }
 0xcc3   :  { %v1260_v29 = vpop.permute.xlu0 %1259 }
 0xcc4   :  { %v1262_v30 = vmul.f32 %v3804_v27, %v1260_v29 }
 0xcc6   :  { %1264 = vrot.lane.b32.xlu0 %v1262_v30, %s4141_s25 }
 0xcc7   :  { %v1362_v32 = vpop.permute.xlu1 %1361 }
 0xcc8   :  { %v1364_v33 = vmul.f32 %v3806_v31, %v1362_v32 }
 0xcca   :  { %1366 = vrot.lane.b32.xlu1 %v1364_v33, %s4141_s25 }
 0xd38   :  { %v1265_v34 = vpop.permute.xlu0 %1264 }
 0xd39   :  { %v1267_v35 = vadd.f32 %v1265_v34, %v1173_v17 }
 0xd3b   :  { %3807 = vtanh.f32 %v1267_v35 }
 0xd3c   :  { %v1367_v36 = vpop.permute.xlu1 %1366 }
 0xd3d   :  { %v1369_v37 = vadd.f32 %v1367_v36, %v1174_v19 }
 0xd3f   :  { %3809 = vtanh.f32 %v1369_v37 }
 0xd45   :  { %v3808_v38 = vpop.eup %3807 }
 0xd46   :  { %1271 = vrot.lane.b32.xlu0 %v3808_v38, %s4143_s2 }
 0xd49   :  { %v3810_v39 = vpop.eup %3809 }
 0xd4a   :  { %1373 = vrot.lane.b32.xlu1 %v3810_v39, %s4143_s2  ;;  %v1585_v39 = vld [vmem:[#allocation2 + $0xc] sm:$0x3] }
 0xdb8   :  { %v1272_v41 = vpop.permute.xlu0 %1271 }
 0xdb9   :  { %v1274_v43 = vmul.f32 %v1272_v41, %v1269_v40 }
 0xdbb   :  { %v1276_v44 = vadd.f32 %v1275_v42, %v1274_v43 }
 0xdbc   :  { %v1374_v46 = vpop.permute.xlu1 %1373 }
 0xdbd   :  { %v1376_v48 = vmul.f32 %v1374_v46, %v1371_v45  ;;  %1382 = vrot.lane.b32.xlu0 %v1276_v44, %s4143_s2 }
 0xdbf   :  { %v1378_v49 = vadd.f32 %v1377_v47, %v1376_v48 }
 0xdc1   :  { %1484 = vrot.lane.b32.xlu1 %v1378_v49, %s4143_s2 }
 0xe2f   :  { %v1383_v50 = vpop.permute.xlu0 %1382 }
 0xe30   :  { %3470 = vmatmul.mubr.msk.f32.vlgmr.msra.gmra.mrb[10].mxu0 %vm341_vm4, %v1383_v50 }
 0xe31   :  { %3658 = vmatpush3.bf16.msra.mxu0 %v4357_v6  ;;  %3483 = vmatprep.mubr.msk.f32.mxu0 %vm4139_vm2, %v4140_v11 }
 0xe32   :  { %3662 = vmatprep.subr.bf16.mxu0 %v4138_v10 }
 0xe33   :  { %v1485_v51 = vpop.permute.xlu1 %1484 }
 0xe34   :  { %3477 = vmatmul.mubr.msk.f32.vlgmr.msra.gmra.mrb[14].mxu1 %vm341_vm4, %v1485_v51 }
 0xe35   :  { %3661 = vmatpush3.bf16.msra.mxu1 %v4372_v12  ;;  %3490 = vmatprep.mubr.msk.f32.mxu1 %vm4139_vm2, %v4140_v11 }
 0xe36   :  { %3665 = vmatprep.subr.bf16.mxu1 %v4138_v10 }
 0xf03   :  { %v1452_v52 = vpop.f32.mrb[10].mxu0 }
 0xf04   :  { %v1463_v53 = vadd.f32 %v1452_v52, %v4395_v16  ;;  %v3471_v54 = vpop.f32.mrb[11].mxu0  ;;  %v1456_v59 = vadd.f32 %v1452_v52, %v1379_v58 }
 0xf06   :  { %1465 = vrot.lane.b32.xlu0 %v1463_v53, %s4142_s5  ;;  %v3244_v61 = vmul.f32 -1.442695, %v1456_v59 }
 0xf07   :  { %v1554_v55 = vpop.f32.mrb[14].mxu1 }
 0xf08   :  { %v1565_v56 = vadd.f32 %v1554_v55, %v4398_v28  ;;  %v3478_v57 = vpop.f32.mrb[15].mxu1  ;;  %v1558_v62 = vadd.f32 %v1554_v55, %v1380_v60  ;;  %3811 = vpow2.f32 %v3244_v61 }
 0xf0a   :  { %1567 = vrot.lane.b32.xlu1 %v1565_v56, %s4142_s5  ;;  %v3246_v63 = vmul.f32 -1.442695, %v1558_v62 }
 0xf0c   :  { %3813 = vpow2.f32 %v3246_v63 }
 0xf12   :  { %v3812_v0 = vpop.eup %3811 }
 0xf13   :  { %v1460_v1 = vadd.f32 1.0, %v3812_v0 }
 0xf15   :  { %3815 = vrcp.f32 %v1460_v1 }
 0xf16   :  { %v3814_v2 = vpop.eup %3813 }
 0xf17   :  { %v1562_v3 = vadd.f32 1.0, %v3814_v2 }
 0xf19   :  { %3817 = vrcp.f32 %v1562_v3 }
 0xf1f   :  { %v3816_v4 = vpop.eup %3815 }
 0xf20   :  { %v1475_v21 = vsub.f32 1.0, %v3816_v4  ;;  %v1481_v23 = vmul.f32 %v3816_v4, %v1276_v44 }
 0xf23   :  { %v3818_v8 = vpop.eup %3817 }
 0xf24   :  { %v1577_v26 = vsub.f32 1.0, %v3818_v8  ;;  %v1583_v29 = vmul.f32 %v3818_v8, %v1378_v49 }
 0xf78   :  { %v1466_v5 = vpop.permute.xlu0 %1465 }
 0xf79   :  { %v1468_v7 = vmul.f32 %v3816_v4, %v1466_v5 }
 0xf7b   :  { %1470 = vrot.lane.b32.xlu0 %v1468_v7, %s4141_s25 }
 0xf7c   :  { %v1568_v9 = vpop.permute.xlu1 %1567 }
 0xf7d   :  { %v1570_v13 = vmul.f32 %v3818_v8, %v1568_v9 }
 0xf7f   :  { %1572 = vrot.lane.b32.xlu1 %v1570_v13, %s4141_s25 }
 0xfed   :  { %v1471_v14 = vpop.permute.xlu0 %1470 }
 0xfee   :  { %v1473_v15 = vadd.f32 %v1471_v14, %v1379_v58 }
 0xff0   :  { %3819 = vtanh.f32 %v1473_v15 }
 0xff1   :  { %v1573_v17 = vpop.permute.xlu1 %1572 }
 0xff2   :  { %v1575_v18 = vadd.f32 %v1573_v17, %v1380_v60 }
 0xff4   :  { %3821 = vtanh.f32 %v1575_v18 }
 0xffa   :  { %v3820_v19 = vpop.eup %3819 }
 0xffb   :  { %1477 = vrot.lane.b32.xlu0 %v3820_v19, %s4143_s2  ;;  %v1791_v19 = vld [vmem:[#allocation2 + $0xe] sm:$0x3] }
 0xffe   :  { %v3822_v20 = vpop.eup %3821 }
 0xfff   :  { %1579 = vrot.lane.b32.xlu1 %v3822_v20, %s4143_s2 }
0x106d   :  { %v1478_v22 = vpop.permute.xlu0 %1477 }
0x106e   :  { %v1480_v24 = vmul.f32 %v1478_v22, %v1475_v21  ;;  %v1792_v21 = vld [vmem:[#allocation3] sm:$0x3] }
0x1070   :  { %v1482_v25 = vadd.f32 %v1481_v23, %v1480_v24 }
0x1071   :  { %v1580_v27 = vpop.permute.xlu1 %1579 }
0x1072   :  { %v1582_v30 = vmul.f32 %v1580_v27, %v1577_v26  ;;  %1588 = vrot.lane.b32.xlu0 %v1482_v25, %s4143_s2 }
0x1074   :  { %v1584_v31 = vadd.f32 %v1583_v29, %v1582_v30 }
0x1076   :  { %1690 = vrot.lane.b32.xlu1 %v1584_v31, %s4143_s2 }
0x10e4   :  { %v1589_v32 = vpop.permute.xlu0 %1588 }
0x10e5   :  { %3484 = vmatmul.mubr.msk.f32.vlgmr.msra.gmra.mrb[12].mxu0 %vm341_vm4, %v1589_v32 }
0x10e6   :  { %3664 = vmatpush3.bf16.msra.mxu0 %v4357_v6  ;;  %3497 = vmatprep.mubr.msk.f32.mxu0 %vm4139_vm2, %v4140_v11 }
0x10e7   :  { %3668 = vmatprep.subr.bf16.mxu0 %v4138_v10 }
0x10e8   :  { %v1691_v33 = vpop.permute.xlu1 %1690 }
0x10e9   :  { %3491 = vmatmul.mubr.msk.f32.vlgmr.msra.gmra.mrb[16].mxu1 %vm341_vm4, %v1691_v33 }
0x10ea   :  { %3667 = vmatpush3.bf16.msra.mxu1 %v4372_v12  ;;  %3504 = vmatprep.mubr.msk.f32.mxu1 %vm4139_vm2, %v4140_v11  ;;  %v1586_v12 = vld [vmem:[#allocation3 + $0x2] sm:$0x3] }
0x10eb   :  { %3671 = vmatprep.subr.bf16.mxu1 %v4138_v10 }
0x11b8   :  { %v1658_v34 = vpop.f32.mrb[12].mxu0 }
0x11b9   :  { %v1669_v35 = vadd.f32 %v1658_v34, %v4395_v16  ;;  %v3485_v36 = vpop.f32.mrb[13].mxu0  ;;  %v1662_v40 = vadd.f32 %v1658_v34, %v1585_v39 }
0x11bb   :  { %1671 = vrot.lane.b32.xlu0 %v1669_v35, %s4142_s5  ;;  %v3248_v41 = vmul.f32 -1.442695, %v1662_v40 }
0x11bc   :  { %v1760_v6 = vpop.f32.mrb[16].mxu1 }
0x11bd   :  { %v1771_v37 = vadd.f32 %v1760_v6, %v4398_v28  ;;  %v3492_v38 = vpop.f32.mrb[17].mxu1  ;;  %v1764_v42 = vadd.f32 %v1760_v6, %v1586_v12  ;;  %3823 = vpow2.f32 %v3248_v41  ;;  %v1999_v41 = vld [vmem:[%s4809_s11] sm:$0xff] }
0x11be   :  { %v1998_v38 = vld [vmem:[%s4808_s10 + $0x8] sm:$0xff] }
0x11bf   :  { %1773 = vrot.lane.b32.xlu1 %v1771_v37, %s4142_s5  ;;  %v3250_v43 = vmul.f32 -1.442695, %v1764_v42  ;;  %v1997_v37 = vld [vmem:[%s4808_s10] sm:$0xff]  ;;  %v2000_v42 = vld [vmem:[%s4809_s11 + $0x8] sm:$0xff] }
0x11c1   :  { %3825 = vpow2.f32 %v3250_v43  ;;  %v3669_v43 = vpack.c.bf16 %v2000_v42, %v1999_v41 }
0x11c7   :  { %v3824_v44 = vpop.eup %3823 }
0x11c8   :  { %v1666_v45 = vadd.f32 1.0, %v3824_v44 }
0x11ca   :  { %3827 = vrcp.f32 %v1666_v45 }
0x11cb   :  { %v3826_v46 = vpop.eup %3825 }
0x11cc   :  { %v1768_v47 = vadd.f32 1.0, %v3826_v46 }
0x11ce   :  { %3829 = vrcp.f32 %v1768_v47 }
0x11d4   :  { %v3828_v48 = vpop.eup %3827 }
0x11d5   :  { %v1681_v60 = vsub.f32 1.0, %v3828_v48  ;;  %v1687_v62 = vmul.f32 %v3828_v48, %v1482_v25 }
0x11d8   :  { %v3830_v51 = vpop.eup %3829 }
0x11d9   :  { %v1783_v1 = vsub.f32 1.0, %v3830_v51  ;;  %v1789_v3 = vmul.f32 %v3830_v51, %v1584_v31 }
0x122d   :  { %v1672_v49 = vpop.permute.xlu0 %1671 }
0x122e   :  { %v1674_v50 = vmul.f32 %v3828_v48, %v1672_v49 }
0x1230   :  { %1676 = vrot.lane.b32.xlu0 %v1674_v50, %s4141_s25 }
0x1231   :  { %v1774_v52 = vpop.permute.xlu1 %1773 }
0x1232   :  { %v1776_v53 = vmul.f32 %v3830_v51, %v1774_v52 }
0x1234   :  { %1778 = vrot.lane.b32.xlu1 %v1776_v53, %s4141_s25 }
0x12a2   :  { %v1677_v54 = vpop.permute.xlu0 %1676 }
0x12a3   :  { %v1679_v55 = vadd.f32 %v1677_v54, %v1585_v39  ;;  %v3672_v39 = vpack.c.bf16 %v1998_v38, %v1997_v37  ;;  %v2199_v54 = vld [vmem:[#allocation4] sm:$0x3] }
0x12a5   :  { %3831 = vtanh.f32 %v1679_v55 }
0x12a6   :  { %v1779_v56 = vpop.permute.xlu1 %1778 }
0x12a7   :  { %v1781_v57 = vadd.f32 %v1779_v56, %v1586_v12 }
0x12a9   :  { %3833 = vtanh.f32 %v1781_v57  ;;  %v2215_v57 = vld [vmem:[%s4811_s13] sm:$0xff] }
0x12af   :  { %v3832_v58 = vpop.eup %3831 }
0x12b0   :  { %1683 = vrot.lane.b32.xlu0 %v3832_v58, %s4143_s2  ;;  %v2216_v58 = vld [vmem:[%s4811_s13 + $0x8] sm:$0xff] }
0x12b3   :  { %v3834_v59 = vpop.eup %3833 }
0x12b4   :  { %1785 = vrot.lane.b32.xlu1 %v3834_v59, %s4143_s2  ;;  %v2217_v59 = vld [vmem:[%s4811_s13 + $0x10] sm:$0xff] }
0x1322   :  { %v1684_v61 = vpop.permute.xlu0 %1683 }
0x1323   :  { %v1686_v63 = vmul.f32 %v1684_v61, %v1681_v60  ;;  %v4583_v60 = vpack.c.bf16 %v2216_v58, %v2215_v57  ;;  %v2218_v61 = vld [vmem:[%s4811_s13 + $0x18] sm:$0xff] }
0x1325   :  { %v4527_v0 = vadd.f32 %v1687_v62, %v1686_v63 }
0x1326   :  { %v1786_v2 = vpop.permute.xlu1 %1785 }
0x1327   :  { %v1788_v4 = vmul.f32 %v1786_v2, %v1783_v1  ;;  %1794 = vrot.lane.b32.xlu0 %v4527_v0, %s4143_s2  ;;  %v3257_v2 = vld [vmem:[#allocation15] ss:$0 sm:$0xff] }
0x1329   :  { %v4531_v5 = vadd.f32 %v1789_v3, %v1788_v4 }
0x132b   :  { %1896 = vrot.lane.b32.xlu1 %v4531_v5, %s4143_s2 }
0x1399   :  { %v1795_v7 = vpop.permute.xlu0 %1794 }
0x139a   :  { %3498 = vmatmul.mubr.msk.f32.vlgmr.msra.gmra.mrb[14].mxu0 %vm341_vm4, %v1795_v7 }
0x139b   :  { %3511 = vmatprep.mubr.msk.f32.mxu0 %vm4139_vm2, %v4140_v11  ;;  %3670 = vmatpush3.bf16.msra.mxu0 %v3669_v43 }
0x139c   :  { %3674 = vmatprep.subr.bf16.mxu0 %v4138_v10 }
0x139d   :  { %v1897_v8 = vpop.permute.xlu1 %1896 }
0x139e   :  { %3505 = vmatmul.mubr.msk.f32.vlgmr.msra.gmra.mrb[18].mxu1 %vm341_vm4, %v1897_v8 }
0x139f   :  { %3518 = vmatprep.mubr.msk.f32.mxu1 %vm4139_vm2, %v4140_v11  ;;  %3673 = vmatpush3.bf16.msra.mxu1 %v3672_v39 }
0x13a0   :  { %3680 = vmatprep.subr.bf16.mxu1 %v4138_v10 }
0x146d   :  { %v1864_v9 = vpop.f32.mrb[14].mxu0 }
0x146e   :  { %v1875_v13 = vadd.f32 %v1864_v9, %v4395_v16  ;;  %v3499_v14 = vpop.f32.mrb[15].mxu0  ;;  %v1868_v20 = vadd.f32 %v1864_v9, %v1791_v19  ;;  %v3261_v9 = vld [vmem:[%s4813_s15] ss:$0 sm:$0xff] }
0x1470   :  { %1877 = vrot.lane.b32.xlu0 %v1875_v13, %s4142_s5  ;;  %v3252_v22 = vmul.f32 -1.442695, %v1868_v20 }
0x1471   :  { %v1966_v15 = vpop.f32.mrb[18].mxu1 }
0x1472   :  { %v1977_v17 = vadd.f32 %v1966_v15, %v4398_v28  ;;  %v3506_v18 = vpop.f32.mrb[19].mxu1  ;;  %v1970_v23 = vadd.f32 %v1966_v15, %v1792_v21  ;;  %3835 = vpow2.f32 %v3252_v22 }
0x1474   :  { %1979 = vrot.lane.b32.xlu1 %v1977_v17, %s4142_s5  ;;  %v3254_v24 = vmul.f32 -1.442695, %v1970_v23 }
0x1476   :  { %3837 = vpow2.f32 %v3254_v24  ;;  %v4623_v24 = vld [vmem:[%s4812_s14] ss:$0 sm:$0xff] }
0x147c   :  { %v3836_v25 = vpop.eup %3835 }
0x147d   :  { %v1872_v26 = vadd.f32 1.0, %v3836_v25 }
0x147f   :  { %3839 = vrcp.f32 %v1872_v26 }
0x1480   :  { %v3838_v16 = vpop.eup %3837 }
0x1481   :  { %v1974_v27 = vadd.f32 1.0, %v3838_v16 }
0x1483   :  { %3841 = vrcp.f32 %v1974_v27 }
0x1489   :  { %v3840_v29 = vpop.eup %3839 }
0x148a   :  { %v1887_v44 = vsub.f32 1.0, %v3840_v29  ;;  %v1893_v46 = vmul.f32 %v3840_v29, %v4527_v0  ;;  %v4589_v0 = vpack.c.bf16 %v2218_v61, %v2217_v59 }
0x148d   :  { %v3842_v31 = vpop.eup %3841 }
0x148e   :  { %v1989_v49 = vsub.f32 1.0, %v3842_v31  ;;  %v1995_v51 = vmul.f32 %v3842_v31, %v4531_v5 }
0x14e2   :  { %v1878_v30 = vpop.permute.xlu0 %1877 }
0x14e3   :  { %v1880_v28 = vmul.f32 %v3840_v29, %v1878_v30 }
0x14e5   :  { %1882 = vrot.lane.b32.xlu0 %v1880_v28, %s4141_s25 }
0x14e6   :  { %v1980_v32 = vpop.permute.xlu1 %1979 }
0x14e7   :  { %v1982_v33 = vmul.f32 %v3842_v31, %v1980_v32 }
0x14e9   :  { %1984 = vrot.lane.b32.xlu1 %v1982_v33, %s4141_s25 }
0x1557   :  { %v1883_v34 = vpop.permute.xlu0 %1882 }
0x1558   :  { %v1885_v35 = vadd.f32 %v1883_v34, %v1791_v19 }
0x155a   :  { %3843 = vtanh.f32 %v1885_v35 }
0x155b   :  { %v1985_v36 = vpop.permute.xlu1 %1984 }
0x155c   :  { %v1987_v6 = vadd.f32 %v1985_v36, %v1792_v21 }
0x155e   :  { %3845 = vtanh.f32 %v1987_v6 }
0x1564   :  { %v3844_v40 = vpop.eup %3843 }
0x1565   :  { %1889 = vrot.lane.b32.xlu0 %v3844_v40, %s4143_s2 }
0x1568   :  { %v3846_v12 = vpop.eup %3845 }
0x1569   :  { %1991 = vrot.lane.b32.xlu1 %v3846_v12, %s4143_s2 }
0x15d7   :  { %v1890_v45 = vpop.permute.xlu0 %1889 }
0x15d8   :  { %v1892_v47 = vmul.f32 %v1890_v45, %v1887_v44 }
0x15da   :  { %v1894_v48 = vadd.f32 %v1893_v46, %v1892_v47 }
0x15db   :  { %v1992_v50 = vpop.permute.xlu1 %1991 }
0x15dc   :  { %v1994_v52 = vmul.f32 %v1992_v50, %v1989_v49  ;;  %2077 = vrot.lane.b32.xlu1 %v1894_v48, %s4143_s2 }
0x15de   :  { %v1996_v53 = vadd.f32 %v1995_v51, %v1994_v52 }
0x15e0   :  { %2002 = vrot.lane.b32.xlu0 %v1996_v53, %s4143_s2 }
0x15e4   :  { %2201 = vrot.lane.b32.xlu0 %v2199_v54, %s4141_s25 }
0x164e   :  { %v2078_v55 = vpop.permute.xlu1 %2077 }
0x164f   :  { %3519 = vmatmul.mubr.msk.f32.vlgmr.msra.gmra.mrb[20].mxu1 %vm341_vm4, %v2078_v55 }
0x1650   :  { %3540 = vmatprep.mubr.msk.f32.mxu1 %vm4139_vm2, %v4140_v11  ;;  %3682 = vmatpush3.bf16.msra.mxu1 %v4583_v60 }
0x1651   :  { %3683 = vmatprep.subr.bf16.mxu1 %v4138_v10 }
0x1652   :  { %v2003_v56 = vpop.permute.xlu0 %2002 }
0x1653   :  { %3512 = vmatmul.mubr.msk.f32.vlgmr.msra.gmra.mrb[16].mxu0 %vm341_vm4, %v2003_v56 }
0x1654   :  { %3529 = vmatprep.mubr.msk.f32.mxu0 %vm4139_vm2, %v4140_v11  ;;  %3676 = vmatpush3.bf16.msra.mxu0 %v4583_v60 }
0x1655   :  { %3677 = vmatprep.subr.bf16.mxu0 %v4138_v10  ;;  %3685 = vmatpush3.bf16.msra.mxu1 %v4589_v0 }
0x1656   :  { %3692 = vmatprep.subr.bf16.mxu1 %v4138_v10  ;;  %v2202_v14 = vpop.permute.xlu0 %2201 }
0x1658   :  { %3679 = vmatpush3.bf16.msra.mxu0 %v4589_v0 }
0x1659   :  { %3686 = vmatprep.subr.bf16.mxu0 %v4138_v10 }
0x1722   :  { %v2147_v62 = vpop.f32.mrb[20].mxu1 }
0x1723   :  { %v3520_v63 = vpop.f32.mrb[21].mxu1 }
0x1726   :  { %v2072_v1 = vpop.f32.mrb[16].mxu0 }
0x1727   :  { %v2148_v3 = vadd.f32 %v2147_v62, %v2072_v1  ;;  %v3513_v4 = vpop.f32.mrb[17].mxu0 }
0x1729   :  { %v4598_v5 = vadd.f32 %v3257_v2, %v2148_v3 }
0x172b   :  { %2206 = vrot.lane.b32.xlu1 %v4598_v5, %s4141_s25  ;;  %v2196_v7 = vmul.f32 0.5, %v4598_v5 }
0x172d   :  { %v2197_v8 = vmul.f32 1.442695, %v2196_v7 }
0x172f   :  { %3847 = vpow2.f32 %v2197_v8  ;;  %2312 = vrot.lane.b32.xlu1 %v3261_v9, %s4144_s29 }
0x1739   :  { %v3848_v13 = vpop.eup %3847 }
0x173a   :  { %v2204_v15 = vmul.f32 %v3848_v13, %v2202_v14 }
0x179d   :  { %v2207_v17 = vpop.permute.xlu1 %2206 }
0x179e   :  { %v2209_v18 = vadd.f32 %v2207_v17, %v2204_v15 }
0x17a0   :  { %2211 = vrot.lane.b32.xlu0 %v2209_v18, %s4142_s5 }
0x17a1   :  { %v4616_v20 = vpop.permute.xlu1 %2312 }
0x1812   :  { %v2212_v19 = vpop.permute.xlu0 %2211 }
0x1813   :  { %3530 = vmatmul.mubr.msk.f32.vlgmr.msra.gmra.mrb[18].mxu0 %vm2221_vm5, %v2212_v19  ;;  %2214 = vst.msk [vmem:[#allocation17] sm:$0x3] %vm2180_vm6, %v2212_v19 }
0x1814   :  { %3688 = vmatpush3.bf16.msra.mxu0 %v4583_v60  ;;  %3551 = vmatprep.mubr.msk.f32.mxu0 %vm4139_vm2, %v4140_v11 }
0x1815   :  { %3689 = vmatprep.subr.bf16.mxu0 %v4138_v10 }
0x1818   :  { %3691 = vmatpush3.bf16.msra.mxu0 %v4589_v0 }
0x1819   :  { %3698 = vmatprep.subr.bf16.mxu0 %v4138_v10 }
0x18e6   :  { %v2290_v21 = vpop.f32.mrb[18].mxu0 }
0x18e7   :  { %v2315_v22 = vadd.f32 %v4616_v20, %v2290_v21  ;;  %v3531_v23 = vpop.f32.mrb[19].mxu0  ;;  %v2300_v25 = vadd.f32 %v4623_v24, %v2290_v21 }
0x18e9   :  { %2317 = vrot.lane.b32.xlu0 %v2315_v22, %s4144_s29  ;;  %v3260_v26 = vmul.f32 -1.442695, %v2300_v25 }
0x18eb   :  { %3849 = vpow2.f32 %v3260_v26 }
0x18f5   :  { %v3850_v16 = vpop.eup %3849 }
0x18f6   :  { %v2304_v27 = vadd.f32 1.0, %v3850_v16 }
0x18f8   :  { %3851 = vrcp.f32 %v2304_v27 }
0x1902   :  { %v3852_v29 = vpop.eup %3851 }
0x1903   :  { %v2327_v34 = vsub.f32 1.0, %v3852_v29  ;;  %v2333_v36 = vmul.f32 %v3852_v29, %v2209_v18 }
0x195b   :  { %v2318_v30 = vpop.permute.xlu0 %2317 }
0x195c   :  { %v2320_v28 = vmul.f32 %v3852_v29, %v2318_v30 }
0x195e   :  { %2322 = vrot.lane.b32.xlu1 %v2320_v28, %s4144_s29 }
0x19d0   :  { %v2323_v31 = vpop.permute.xlu1 %2322 }
0x19d1   :  { %v2325_v32 = vadd.f32 %v4623_v24, %v2323_v31 }
0x19d3   :  { %3853 = vtanh.f32 %v2325_v32 }
0x19dd   :  { %v3854_v33 = vpop.eup %3853 }
0x19de   :  { %2329 = vrot.lane.b32.xlu0 %v3854_v33, %s4142_s5 }
0x1a50   :  { %v2330_v35 = vpop.permute.xlu0 %2329 }
0x1a51   :  { %v2332_v6 = vmul.f32 %v2330_v35, %v2327_v34 }
0x1a53   :  { %v2334_v37 = vadd.f32 %v2333_v36, %v2332_v6 }
0x1a55   :  { %2336 = vrot.lane.b32.xlu1 %v2334_v37, %s4142_s5 }
0x1ac7   :  { %v2337_v38 = vpop.permute.xlu1 %2336 }
0x1ac8   :  { %2339 = vst.msk [vmem:[#allocation16] sm:$0x3] %vm2180_vm6, %v2337_v38  ;;  %3541 = vmatmul.mubr.msk.f32.vlgmr.msra.gmra.mrb[22].mxu1 %vm2221_vm5, %v2337_v38 }
0x1ac9   :  { %3694 = vmatpush3.bf16.msra.mxu1 %v4583_v60  ;;  %3562 = vmatprep.mubr.msk.f32.mxu1 %vm4139_vm2, %v4140_v11 }
0x1aca   :  { %3695 = vmatprep.subr.bf16.mxu1 %v4138_v10 }
0x1acd   :  { %3697 = vmatpush3.bf16.msra.mxu1 %v4589_v0 }
0x1ace   :  { %3704 = vmatprep.subr.bf16.mxu1 %v4138_v10 }
0x1b9b   :  { %v2408_v39 = vpop.f32.mrb[22].mxu1 }
0x1b9c   :  { %v2419_v40 = vadd.f32 %v2408_v39, %v4616_v20  ;;  %v3542_v12 = vpop.f32.mrb[23].mxu1  ;;  %v2412_v41 = vadd.f32 %v4623_v24, %v2408_v39 }
0x1b9e   :  { %2421 = vrot.lane.b32.xlu0 %v2419_v40, %s4144_s29  ;;  %v3263_v42 = vmul.f32 -1.442695, %v2412_v41 }
0x1ba0   :  { %3855 = vpow2.f32 %v3263_v42 }
0x1baa   :  { %v3856_v43 = vpop.eup %3855 }
0x1bab   :  { %v2416_v44 = vadd.f32 1.0, %v3856_v43 }
0x1bad   :  { %3857 = vrcp.f32 %v2416_v44 }
0x1bb7   :  { %v3858_v45 = vpop.eup %3857 }
0x1bb8   :  { %v2431_v51 = vsub.f32 1.0, %v3858_v45  ;;  %v2437_v53 = vmul.f32 %v3858_v45, %v2334_v37 }
0x1c10   :  { %v2422_v46 = vpop.permute.xlu0 %2421 }
0x1c11   :  { %v2424_v47 = vmul.f32 %v3858_v45, %v2422_v46 }
0x1c13   :  { %2426 = vrot.lane.b32.xlu1 %v2424_v47, %s4144_s29 }
0x1c85   :  { %v2427_v48 = vpop.permute.xlu1 %2426 }
0x1c86   :  { %v2429_v49 = vadd.f32 %v4623_v24, %v2427_v48 }
0x1c88   :  { %3859 = vtanh.f32 %v2429_v49 }
0x1c92   :  { %v3860_v50 = vpop.eup %3859 }
0x1c93   :  { %2433 = vrot.lane.b32.xlu0 %v3860_v50, %s4142_s5 }
0x1d05   :  { %v2434_v52 = vpop.permute.xlu0 %2433 }
0x1d06   :  { %v2436_v54 = vmul.f32 %v2434_v52, %v2431_v51 }
0x1d08   :  { %v2438_v55 = vadd.f32 %v2437_v53, %v2436_v54 }
0x1d0a   :  { %2440 = vrot.lane.b32.xlu1 %v2438_v55, %s4142_s5 }
0x1d7c   :  { %v2441_v56 = vpop.permute.xlu1 %2440 }
0x1d7d   :  { %2443 = vst.msk [vmem:[#allocation16 + $0x2] sm:$0x3] %vm2180_vm6, %v2441_v56  ;;  %3552 = vmatmul.mubr.msk.f32.vlgmr.msra.gmra.mrb[20].mxu0 %vm2221_vm5, %v2441_v56 }
0x1d7e   :  { %3700 = vmatpush3.bf16.msra.mxu0 %v4583_v60  ;;  %3573 = vmatprep.mubr.msk.f32.mxu0 %vm4139_vm2, %v4140_v11 }
0x1d7f   :  { %3701 = vmatprep.subr.bf16.mxu0 %v4138_v10 }
0x1d82   :  { %3703 = vmatpush3.bf16.msra.mxu0 %v4589_v0 }
0x1d83   :  { %3710 = vmatprep.subr.bf16.mxu0 %v4138_v10 }
0x1e50   :  { %v2512_v57 = vpop.f32.mrb[20].mxu0 }
0x1e51   :  { %v2523_v58 = vadd.f32 %v2512_v57, %v4616_v20  ;;  %v3553_v59 = vpop.f32.mrb[21].mxu0  ;;  %v2516_v61 = vadd.f32 %v4623_v24, %v2512_v57 }
0x1e53   :  { %2525 = vrot.lane.b32.xlu0 %v2523_v58, %s4144_s29  ;;  %v3265_v62 = vmul.f32 -1.442695, %v2516_v61 }
0x1e55   :  { %3861 = vpow2.f32 %v3265_v62 }
0x1e5f   :  { %v3862_v63 = vpop.eup %3861 }
0x1e60   :  { %v2520_v1 = vadd.f32 1.0, %v3862_v63 }
0x1e62   :  { %3863 = vrcp.f32 %v2520_v1 }
0x1e6c   :  { %v3864_v2 = vpop.eup %3863 }
0x1e6d   :  { %v2535_v13 = vsub.f32 1.0, %v3864_v2  ;;  %v2541_v15 = vmul.f32 %v3864_v2, %v2438_v55 }
0x1ec5   :  { %v2526_v3 = vpop.permute.xlu0 %2525 }
0x1ec6   :  { %v2528_v4 = vmul.f32 %v3864_v2, %v2526_v3 }
0x1ec8   :  { %2530 = vrot.lane.b32.xlu1 %v2528_v4, %s4144_s29 }
0x1f3a   :  { %v2531_v7 = vpop.permute.xlu1 %2530 }
0x1f3b   :  { %v2533_v8 = vadd.f32 %v4623_v24, %v2531_v7 }
0x1f3d   :  { %3865 = vtanh.f32 %v2533_v8 }
0x1f47   :  { %v3866_v9 = vpop.eup %3865 }
0x1f48   :  { %2537 = vrot.lane.b32.xlu0 %v3866_v9, %s4142_s5 }
0x1fba   :  { %v2538_v14 = vpop.permute.xlu0 %2537 }
0x1fbb   :  { %v2540_v17 = vmul.f32 %v2538_v14, %v2535_v13 }
0x1fbd   :  { %v2542_v18 = vadd.f32 %v2541_v15, %v2540_v17 }
0x1fbf   :  { %2544 = vrot.lane.b32.xlu1 %v2542_v18, %s4142_s5 }
0x2031   :  { %v2545_v19 = vpop.permute.xlu1 %2544 }
0x2032   :  { %2547 = vst.msk [vmem:[#allocation16 + $0x4] sm:$0x3] %vm2180_vm6, %v2545_v19  ;;  %3563 = vmatmul.mubr.msk.f32.vlgmr.msra.gmra.mrb[24].mxu1 %vm2221_vm5, %v2545_v19 }
0x2033   :  { %3706 = vmatpush3.bf16.msra.mxu1 %v4583_v60  ;;  %3584 = vmatprep.mubr.msk.f32.mxu1 %vm4139_vm2, %v4140_v11 }
0x2034   :  { %3707 = vmatprep.subr.bf16.mxu1 %v4138_v10 }
0x2037   :  { %3709 = vmatpush3.bf16.msra.mxu1 %v4589_v0 }
0x2038   :  { %3716 = vmatprep.subr.bf16.mxu1 %v4138_v10 }
0x2105   :  { %v2616_v21 = vpop.f32.mrb[24].mxu1 }
0x2106   :  { %v2627_v22 = vadd.f32 %v2616_v21, %v4616_v20  ;;  %v3564_v23 = vpop.f32.mrb[25].mxu1  ;;  %v2620_v25 = vadd.f32 %v4623_v24, %v2616_v21 }
0x2108   :  { %2629 = vrot.lane.b32.xlu0 %v2627_v22, %s4144_s29  ;;  %v3267_v26 = vmul.f32 -1.442695, %v2620_v25 }
0x210a   :  { %3867 = vpow2.f32 %v3267_v26 }
0x2114   :  { %v3868_v16 = vpop.eup %3867 }
0x2115   :  { %v2624_v27 = vadd.f32 1.0, %v3868_v16 }
0x2117   :  { %3869 = vrcp.f32 %v2624_v27 }
0x2121   :  { %v3870_v29 = vpop.eup %3869 }
0x2122   :  { %v2639_v34 = vsub.f32 1.0, %v3870_v29  ;;  %v2645_v36 = vmul.f32 %v3870_v29, %v2542_v18 }
0x217a   :  { %v2630_v30 = vpop.permute.xlu0 %2629 }
0x217b   :  { %v2632_v28 = vmul.f32 %v3870_v29, %v2630_v30 }
0x217d   :  { %2634 = vrot.lane.b32.xlu1 %v2632_v28, %s4144_s29 }
0x21ef   :  { %v2635_v31 = vpop.permute.xlu1 %2634 }
0x21f0   :  { %v2637_v32 = vadd.f32 %v4623_v24, %v2635_v31 }
0x21f2   :  { %3871 = vtanh.f32 %v2637_v32 }
0x21fc   :  { %v3872_v33 = vpop.eup %3871 }
0x21fd   :  { %2641 = vrot.lane.b32.xlu0 %v3872_v33, %s4142_s5 }
0x226f   :  { %v2642_v35 = vpop.permute.xlu0 %2641 }
0x2270   :  { %v2644_v6 = vmul.f32 %v2642_v35, %v2639_v34 }
0x2272   :  { %v2646_v37 = vadd.f32 %v2645_v36, %v2644_v6 }
0x2274   :  { %2648 = vrot.lane.b32.xlu1 %v2646_v37, %s4142_s5 }
0x22e6   :  { %v2649_v38 = vpop.permute.xlu1 %2648 }
0x22e7   :  { %2651 = vst.msk [vmem:[#allocation16 + $0x6] sm:$0x3] %vm2180_vm6, %v2649_v38  ;;  %3574 = vmatmul.mubr.msk.f32.vlgmr.msra.gmra.mrb[22].mxu0 %vm2221_vm5, %v2649_v38 }
0x22e8   :  { %3712 = vmatpush3.bf16.msra.mxu0 %v4583_v60  ;;  %3595 = vmatprep.mubr.msk.f32.mxu0 %vm4139_vm2, %v4140_v11 }
0x22e9   :  { %3713 = vmatprep.subr.bf16.mxu0 %v4138_v10 }
0x22ec   :  { %3715 = vmatpush3.bf16.msra.mxu0 %v4589_v0 }
0x22ee   :  { %v3068_v15 = vld [vmem:[#allocation16] sm:$0xff] }
0x23ba   :  { %v2720_v39 = vpop.f32.mrb[22].mxu0 }
0x23bb   :  { %v2731_v40 = vadd.f32 %v2720_v39, %v4616_v20  ;;  %v3575_v12 = vpop.f32.mrb[23].mxu0  ;;  %v2724_v41 = vadd.f32 %v4623_v24, %v2720_v39 }
0x23bd   :  { %2733 = vrot.lane.b32.xlu0 %v2731_v40, %s4144_s29  ;;  %v3269_v42 = vmul.f32 -1.442695, %v2724_v41 }
0x23bf   :  { %3873 = vpow2.f32 %v3269_v42  ;;  %v2159_v42 = vsub.f32 0.0, %v4598_v5 }
0x23c9   :  { %v3874_v43 = vpop.eup %3873 }
0x23ca   :  { %v2728_v44 = vadd.f32 1.0, %v3874_v43  ;;  %v2160_v43 = vmul.f32 1.442695, %v2159_v42 }
0x23cc   :  { %3875 = vrcp.f32 %v2728_v44 }
0x23d6   :  { %v3876_v45 = vpop.eup %3875 }
0x23d7   :  { %v2743_v51 = vsub.f32 1.0, %v3876_v45  ;;  %v2749_v53 = vmul.f32 %v3876_v45, %v2646_v37 }
0x242f   :  { %v2734_v46 = vpop.permute.xlu0 %2733 }
0x2430   :  { %v2736_v47 = vmul.f32 %v3876_v45, %v2734_v46 }
0x2432   :  { %2738 = vrot.lane.b32.xlu1 %v2736_v47, %s4144_s29 }
0x24a4   :  { %v2739_v48 = vpop.permute.xlu1 %2738 }
0x24a5   :  { %v2741_v49 = vadd.f32 %v4623_v24, %v2739_v48 }
0x24a7   :  { %3877 = vtanh.f32 %v2741_v49  ;;  %v2163_v49 = vmul.f32 %v4598_v5, %v4598_v5 }
0x24b1   :  { %v3878_v50 = vpop.eup %3877 }
0x24b2   :  { %2745 = vrot.lane.b32.xlu0 %v3878_v50, %s4142_s5 }
0x2524   :  { %v2746_v52 = vpop.permute.xlu0 %2745 }
0x2525   :  { %v2748_v54 = vmul.f32 %v2746_v52, %v2743_v51 }
0x2527   :  { %v2750_v55 = vadd.f32 %v2749_v53, %v2748_v54  ;;  %v3070_v53 = vld [vmem:[%s4814_s16] sm:$0xff]  ;;  %v3071_v54 = vld [vmem:[%s4814_s16 + $0x8] sm:$0xff] }
0x2529   :  { %2752 = vrot.lane.b32.xlu1 %v2750_v55, %s4142_s5 }
0x259b   :  { %v2753_v56 = vpop.permute.xlu1 %2752 }
0x259c   :  { %2755 = vst.msk [vmem:[#allocation16 + $0x8] sm:$0x3] %vm2180_vm6, %v2753_v56  ;;  %3585 = vmatmul.mubr.msk.f32.vlgmr.msra.gmra.mrb[26].mxu1 %vm2221_vm5, %v2753_v56  ;;  %v3072_v56 = vld [vmem:[%s4814_s16 + $0x10] sm:$0xff] }
0x259d   :  { %3718 = vmatpush3.bf16.msra.mxu1 %v4583_v60  ;;  %3606 = vmatprep.mubr.msk.f32.mxu1 %vm4139_vm2, %v4140_v11 }
0x259e   :  { %3719 = vmatprep.subr.bf16.mxu1 %v4138_v10 }
0x25a1   :  { %3721 = vmatpush3.bf16.msra.mxu1 %v4589_v0 }
0x266f   :  { %v2824_v57 = vpop.f32.mrb[26].mxu1 }
0x2670   :  { %v2835_v58 = vadd.f32 %v2824_v57, %v4616_v20  ;;  %v3586_v59 = vpop.f32.mrb[27].mxu1  ;;  %v2828_v61 = vadd.f32 %v4623_v24, %v2824_v57  ;;  %v3073_v57 = vld [vmem:[%s4814_s16 + $0x18] sm:$0xff]  ;;  %s4145_s16 = smov [#allocation17]  }
0x2671   :  { %v3726_v59 = vpack.c.bf16 %v3073_v57, %v3072_v56  ;;  %s3184_s22 = sshll.u32 %s4145_s16, 4  ;;  %s3185_s22 = int_to_ptr.vmem [resolvable:$true] %s3184_s22 }
0x2672   :  { %2837 = vrot.lane.b32.xlu0 %v2835_v58, %s4144_s29  ;;  %v3271_v62 = vmul.f32 -1.442695, %v2828_v61  ;;  %s4053_s10 = scalar_lea.vmem %s3185_s22, 32  ;;  %p4058_p1 = scmp.lt.s32.totalorder %s3185_s22, %s3185_s22 }
0x2673   :  { %p4054_p0 = scmp.ne.s32.totalorder %s3185_s22, %s4053_s10  ;;  %p4059_p2 = scmp.lt.s32.totalorder %s4053_s10, %s4053_s10 }
0x2674   :  { %3879 = vpow2.f32 %v3271_v62 }
0x2675   :  { %p4060_p3 = por %p4059_p2, %p4058_p1 }
0x2677   :  { %p4061_p4 = pnand %p4060_p3, %p4054_p0 }
0x267e   :  { %v3880_v63 = vpop.eup %3879 }
0x267f   :  { %v2832_v1 = vadd.f32 1.0, %v3880_v63 }
0x2681   :  { %3881 = vrcp.f32 %v2832_v1 }
0x268b   :  { %v3882_v60 = vpop.eup %3881 }
0x268c   :  { %v2847_v4 = vsub.f32 1.0, %v3882_v60  ;;  %v2853_v8 = vmul.f32 %v3882_v60, %v2750_v55 }
0x26e4   :  { %v2838_v2 = vpop.permute.xlu0 %2837 }
0x26e5   :  { %v2840_v11 = vmul.f32 %v3882_v60, %v2838_v2 }
0x26e7   :  { %2842 = vrot.lane.b32.xlu1 %v2840_v11, %s4144_s29 }
0x2759   :  { %v2843_v10 = vpop.permute.xlu1 %2842 }
0x275a   :  { %v2845_v0 = vadd.f32 %v4623_v24, %v2843_v10 }
0x275c   :  { %3883 = vtanh.f32 %v2845_v0 }
0x2766   :  { %v3884_v3 = vpop.eup %3883 }
0x2767   :  { %2849 = vrot.lane.b32.xlu0 %v3884_v3, %s4142_s5 }
0x27d9   :  { %v2850_v7 = vpop.permute.xlu0 %2849 }
0x27da   :  { %v2852_v9 = vmul.f32 %v2850_v7, %v2847_v4 }
0x27dc   :  { %v2854_v13 = vadd.f32 %v2853_v8, %v2852_v9 }
0x27de   :  { %2856 = vrot.lane.b32.xlu1 %v2854_v13, %s4142_s5 }
0x2850   :  { %v2857_v14 = vpop.permute.xlu1 %2856 }
0x2851   :  { %2859 = vst.msk [vmem:[#allocation16 + $0xa] sm:$0x3] %vm2180_vm6, %v2857_v14  ;;  %3596 = vmatmul.mubr.msk.f32.vlgmr.msra.gmra.mrb[24].mxu0 %vm2221_vm5, %v2857_v14 }
0x2852   :  { %3617 = vmatprep.mubr.msk.f32.mxu0 %vm2221_vm5, %v3068_v15 }
0x2924   :  { %v2928_v17 = vpop.f32.mrb[24].mxu0 }
0x2925   :  { %v2939_v18 = vadd.f32 %v2928_v17, %v4616_v20  ;;  %v3597_v19 = vpop.f32.mrb[25].mxu0  ;;  %v2932_v21 = vadd.f32 %v4623_v24, %v2928_v17 }
0x2927   :  { %2941 = vrot.lane.b32.xlu0 %v2939_v18, %s4144_s29  ;;  %v3273_v22 = vmul.f32 -1.442695, %v2932_v21 }
0x2929   :  { %3885 = vpow2.f32 %v3273_v22 }
0x2933   :  { %v3886_v23 = vpop.eup %3885 }
0x2934   :  { %v2936_v25 = vadd.f32 1.0, %v3886_v23 }
0x2936   :  { %3887 = vrcp.f32 %v2936_v25 }
0x2940   :  { %v3888_v26 = vpop.eup %3887 }
0x2941   :  { %v2951_v31 = vsub.f32 1.0, %v3888_v26  ;;  %v2957_v33 = vmul.f32 %v3888_v26, %v2854_v13 }
0x2999   :  { %v2942_v16 = vpop.permute.xlu0 %2941 }
0x299a   :  { %v2944_v27 = vmul.f32 %v3888_v26, %v2942_v16 }
0x299c   :  { %2946 = vrot.lane.b32.xlu1 %v2944_v27, %s4144_s29 }
0x2a0e   :  { %v2947_v29 = vpop.permute.xlu1 %2946 }
0x2a0f   :  { %v2949_v30 = vadd.f32 %v4623_v24, %v2947_v29 }
0x2a11   :  { %3889 = vtanh.f32 %v2949_v30 }
0x2a1b   :  { %v3890_v28 = vpop.eup %3889 }
0x2a1c   :  { %2953 = vrot.lane.b32.xlu0 %v3890_v28, %s4142_s5 }
0x2a8e   :  { %v2954_v32 = vpop.permute.xlu0 %2953 }
0x2a8f   :  { %v2956_v34 = vmul.f32 %v2954_v32, %v2951_v31 }
0x2a91   :  { %v2958_v35 = vadd.f32 %v2957_v33, %v2956_v34 }
0x2a93   :  { %2960 = vrot.lane.b32.xlu1 %v2958_v35, %s4142_s5 }
0x2b05   :  { %v2961_v36 = vpop.permute.xlu1 %2960 }
0x2b06   :  { %2963 = vst.msk [vmem:[#allocation16 + $0xc] sm:$0x3] %vm2180_vm6, %v2961_v36  ;;  %3607 = vmatmul.mubr.msk.f32.vlgmr.msra.gmra.mrb[28].mxu1 %vm2221_vm5, %v2961_v36 }
0x2bd9   :  { %v3032_v6 = vpop.f32.mrb[28].mxu1 }
0x2bda   :  { %v3043_v37 = vadd.f32 %v3032_v6, %v4616_v20  ;;  %v3608_v38 = vpop.f32.mrb[29].mxu1  ;;  %v3036_v39 = vadd.f32 %v4623_v24, %v3032_v6 }
0x2bdc   :  { %3045 = vrot.lane.b32.xlu0 %v3043_v37, %s4144_s29  ;;  %v3275_v40 = vmul.f32 -1.442695, %v3036_v39 }
0x2bde   :  { %3891 = vpow2.f32 %v3275_v40 }
0x2be8   :  { %v3892_v12 = vpop.eup %3891 }
0x2be9   :  { %v3040_v41 = vadd.f32 1.0, %v3892_v12 }
0x2beb   :  { %3893 = vrcp.f32 %v3040_v41 }
0x2bec   :  { %3895 = vpow2.f32 %v2160_v43 }
0x2bf5   :  { %v3894_v44 = vpop.eup %3893 }
0x2bf6   :  { %v3896_v20 = vpop.eup %3895  ;;  %v3055_v62 = vsub.f32 1.0, %v3894_v44  ;;  %v3061_v1 = vmul.f32 %v3894_v44, %v2958_v35 }
0x2bf7   :  { %v2162_v58 = vadd.f32 %v3896_v20, %v4598_v5 }
0x2c4e   :  { %v3046_v45 = vpop.permute.xlu0 %3045 }
0x2c4f   :  { %v3048_v46 = vmul.f32 %v3894_v44, %v3046_v45 }
0x2c51   :  { %3050 = vrot.lane.b32.xlu1 %v3048_v46, %s4144_s29 }
0x2c55   :  { %2165 = vrot.lane.b32.xlu1 %v3896_v20, %s4142_s5 }
0x2cc3   :  { %v3051_v47 = vpop.permute.xlu1 %3050 }
0x2cc4   :  { %v3053_v48 = vadd.f32 %v4623_v24, %v3051_v47  ;;  %v3722_v24 = vpack.c.bf16 %v3071_v54, %v3070_v53 }
0x2cc6   :  { %3897 = vtanh.f32 %v3053_v48  ;;  %3723 = vmatprep.subr.bf16.mxu0 %v3722_v24 }
0x2cc7   :  { %v2166_v50 = vpop.permute.xlu1 %2165  ;;  %3725 = vmatpush3.bf16.msra.mxu0 %v3722_v24 }
0x2cc8   :  { %v2168_v51 = vmul.f32 %v2166_v50, %v2163_v49  ;;  %3727 = vmatprep.subr.bf16.mxu0 %v3726_v59 }
0x2cca   :  { %2170 = vrot.lane.b32.xlu1 %v2168_v51, %s4141_s25 }
0x2ccb   :  { %3729 = vmatpush3.bf16.msra.mxu0 %v3726_v59 }
0x2cd0   :  { %v3898_v52 = vpop.eup %3897 }
0x2cd1   :  { %3057 = vrot.lane.b32.xlu0 %v3898_v52, %s4142_s5 }
0x2d3c   :  { %v2171_v55 = vpop.permute.xlu1 %2170 }
0x2d3d   :  { %v2173_v61 = vadd.f32 %v2171_v55, %v2162_v58 }
0x2d3f   :  { %v2174_v2 = vadd.f32 1.0, %v2173_v61 }
0x2d41   :  { %v2175_v10 = vmul.f32 0.5, %v2174_v2 }
0x2d43   :  { %v3058_v63 = vpop.permute.xlu0 %3057 }
0x2d44   :  { %v3060_v60 = vmul.f32 %v3058_v63, %v3055_v62 }
0x2d46   :  { %v3062_v11 = vadd.f32 %v3061_v1, %v3060_v60 }
0x2d48   :  { %3064 = vrot.lane.b32.xlu0 %v3062_v11, %s4142_s5 }
0x2d4c   :  { %2177 = vrot.lane.b32.xlu0 %v2175_v10, %s4142_s5 }
0x2dba   :  { %v3065_v0 = vpop.permute.xlu0 %3064 }
0x2dbb   :  { %3067 = vst.msk [vmem:[#allocation16 + $0xe] sm:$0x3] %vm2180_vm6, %v3065_v0 }
0x2dbe   :  { %v2178_v3 = vpop.permute.xlu0 %2177 }
0x2dbf   :  { %v2181_v5 = vsel %vm2180_vm6, %v2178_v3, 0.0 }
0x2dc0   :  { %2182 = vadd.xlane.f32.xlu1 %v2181_v5 }
0x2dc2   :  { %v3069_v4 = vld [vmem:[#allocation16 + $0x8] sm:$0xff] }
0x2dc3   :  { %3618 = vmatmul.mubr.msk.f32.vlgmr.msra.gmra.mrb[26].mxu0 %vm2221_vm5, %v3069_v4 }
0x2dc4   :  { %4064 = shalt.err (!%p4061_p4)
}
0x2dc5   :  { %s4065_s1 = scalar_lea.hbm %s4818_s20, 32 }
0x2dc6   :  { %p4066_p5 = scmp.ne.s32.totalorder %s4818_s20, %s4065_s1  ;;  %p4069_p6 = scmp.lt.u32.totalorder %s4065_s1, %s4818_s20 }
0x2dc8   :  { %p4071_p7 = pnand %p4069_p6, %p4066_p5 }
0x2dca   :  { %4074 = shalt.err (!%p4071_p7)
}
0x2dcb   :  { %3187 = dma.vmem_to_hbm [thread:$0]  %s3185_s22, 32, %s4818_s20, [#allocation18]  }
0x2dcc   :  { %s4075_s7 = scalar_lea.vmem %s4744_s24, 256  ;;  %p4080_p9 = scmp.lt.s32.totalorder %s4744_s24, %s4744_s24 }
0x2dcd   :  { %p4076_p8 = scmp.ne.s32.totalorder %s4744_s24, %s4075_s7  ;;  %p4081_p10 = scmp.lt.s32.totalorder %s4075_s7, %s4075_s7 }
0x2dcf   :  { %p4082_p11 = por %p4081_p10, %p4080_p9 }
0x2dd1   :  { %p4083_p12 = pnand %p4082_p11, %p4076_p8 }
0x2dd3   :  { %4086 = shalt.err (!%p4083_p12)
}
0x2dd4   :  { %s4087_s8 = scalar_lea.hbm %s4817_s19, 256 }
0x2dd5   :  { %p4088_p13 = scmp.ne.s32.totalorder %s4817_s19, %s4087_s8  ;;  %p4091_p0 = scmp.lt.u32.totalorder %s4087_s8, %s4817_s19 }
0x2dd7   :  { %p4093_p1 = pnand %p4091_p0, %p4088_p13 }
0x2dd9   :  { %4096 = shalt.err (!%p4093_p1)
}
0x2dda   :  { %s4147_s20 = smov 128   ;;  %s4148_s28 = smov 8   ;;  %vm2194_vm7 = vcmask 0  }
0x2ddb   :  { %3177 = dma.vmem_to_hbm [thread:$0]  %s4744_s24, 256, %s4817_s19, [#allocation6], %s4147_s20, %s4147_s20, %s4148_s28  }
0x2ddc   :  { %s4149_s12 = smov [#allocation19]  }
0x2ddd   :  { %s3194_s16 = sshll.u32 %s4149_s12, 4  ;;  %s3195_s16 = int_to_ptr.vmem [resolvable:$true] %s3194_s16 }
0x2dde   :  { %s4097_s4 = scalar_lea.vmem %s3195_s16, 16  ;;  %s4101_s10 = scalar_lea.vmem %s3195_s16, 32 }
0x2ddf   :  { %p4098_p2 = scmp.ne.s32.totalorder %s3195_s16, %s4097_s4  ;;  %p4102_p3 = scmp.lt.s32.totalorder %s3195_s16, %s3195_s16 }
0x2de0   :  { %p4103_p4 = scmp.lt.s32.totalorder %s4101_s10, %s4097_s4 }
0x2de2   :  { %p4104_p5 = por %p4103_p4, %p4102_p3 }
0x2de4   :  { %p4105_p6 = pnand %p4104_p5, %p4098_p2 }
0x2e4d   :  { %v2183_v7 = vpop.xlane.xlu1 %2182 }
0x2e4e   :  { %v2184_v8 = vrot.slane %v2183_v7, 4 }
0x2e50   :  { %v2185_v9 = vadd.f32 %v2184_v8, %v2183_v7 }
0x2e52   :  { %v2186_v13 = vrot.slane %v2185_v9, 2 }
0x2e54   :  { %v2187_v14 = vadd.f32 %v2186_v13, %v2185_v9 }
0x2e56   :  { %v2188_v15 = vrot.slane %v2187_v14, 1 }
0x2e58   :  { %v2189_v17 = vadd.f32 %v2188_v15, %v2187_v14 }
0x2e5a   :  { %3730 = vpush %v2189_v17 }
0x2e8b   :  { %s3731_s22 = spop %3730 }
0x2e8c   :  { %v2191_v18 = vstv %s3731_s22 }
0x2e8d   :  { %v2193_v19 = vmul.f32 0.015625, %v2191_v18 }
0x2e8f   :  { %2195 = vst.msk [vmem:[#allocation19] sm:$0x1] %vm2194_vm7, %v2193_v19 }
0x2e90   :  { %4108 = shalt.err (!%p4105_p6)
}
0x2e91   :  { %s4109_s5 = scalar_lea.hbm %s4819_s21, 16 }
0x2e92   :  { %p4110_p7 = scmp.ne.s32.totalorder %s4819_s21, %s4109_s5  ;;  %p4113_p8 = scmp.lt.u32.totalorder %s4109_s5, %s4819_s21 }
0x2e94   :  { %p4115_p9 = pnand %p4113_p8, %p4110_p7 }
0x2e96   :  { %4118 = shalt.err (!%p4115_p9)
}
0x2e97   :  { %3197 = dma.vmem_to_hbm [thread:$0]  %s3195_s16, 16, %s4819_s21, [#allocation18]   ;;  %v3276_v21 = vld [vmem:[%s4815_s17] ss:$0 sm:$0xff]  ;;  %v3619_v22 = vpop.f32.mrb[26].mxu0 }
0x2e98   :  { %v3159_v23 = vadd.f32 %v3619_v22, %v3276_v21  ;;  %v3153_v25 = vpop.f32.mrb[27].mxu0 }
0x2e99   :  { %v3154_v26 = vadd.f32 %v3276_v21, %v3153_v25 }
0x2e9a   :  { %3163 = vst.msk [vmem:[%s4816_s18 + $0x8] sm:$0xff] %vm156_vm1, %v3159_v23 }
0x2e9b   :  { %3162 = vst.msk [vmem:[%s4816_s18] sm:$0xff] %vm156_vm1, %v3154_v26 }
0x2e9c   :  { %4127 = dma.done.wait [#allocation6], 256  }
0x2e9d   :  { %4128 = vsyncadd [#allocation6], 4294967040 }
0x2e9e   :  { %4129 = dma.done.wait [#allocation18], 48  }
0x2e9f   :  { %4130 = vsyncadd [#allocation18], 4294967248 }
0x2ea0   :  { %3209 = vsyncpa [#allocation5], 1 }
0x2ea1   :  { %3210 = vsyncpa [#allocation8], 1 }
0x2ea2   :  { %3211 = vsyncpa [#allocation11], 1 }
0x2ea3   :  { %3212 = vsyncpa [#allocation14], 1 }
0x2ea4   :  { %3213 = vsyncpa [#allocation6], 1 }
0x2ea5   :  { %3214 = vsyncpa [#allocation18], 1 }

</bundles_post_ra>
